<compile_context>
chip_gen: v7x
topology: tpu7x:2x2x1
jax: 0.10.0
libtpu: 0.0.40
codegen_flags: <defaults>
</compile_context>

<pallas_src>
import jax
import jax.numpy as jnp
from jax.experimental import pallas as pl
from jax.experimental.pallas import tpu as pltpu


# ----------------------------- config (synthetic) -----------------------------
BATCH = 8                    # per-device batch
C, H, W = 4, 16, 16
IN_DIM = C * H * W           # 1024
DIM_MLP = 128                # backbone feature dim (encoder.fc.weight.shape[1])
MOCO_DIM = 64                # cfg.MODEL.MOCO_DIM
MOCO_K = 128                 # queue length, K % batch == 0
MOCO_M = 0.999               # momentum
MOCO_T = 0.07                # temperature
EPS = 1e-12                  # F.normalize eps

# MXU operand dtype: bf16 operands with f32 accumulation (elementwise math and
# stored parameters stay f32 — v5e VPU/EUP have no bf16).
MXU_DTYPE = jnp.bfloat16

_VMEM = pl.BlockSpec(memory_space=pltpu.MemorySpace.VMEM)
_SMEM = pl.BlockSpec(memory_space=pltpu.MemorySpace.SMEM)
_ANY = pl.BlockSpec(memory_space=pl.ANY)


# ----------------------------- fused Pallas kernel -----------------------------
def _encode(x, w0, b0, w1, b1, w2, b2):
    """Backbone Linear+ReLU, then MLP head Linear+ReLU+Linear. Weights are (in, out)."""
    h0 = jnp.dot(x.astype(MXU_DTYPE), w0.astype(MXU_DTYPE),
                 preferred_element_type=jnp.float32) + b0
    h0 = jnp.maximum(h0, 0.0)
    h1 = jnp.dot(h0.astype(MXU_DTYPE), w1.astype(MXU_DTYPE),
                 preferred_element_type=jnp.float32) + b1
    h1 = jnp.maximum(h1, 0.0)
    return jnp.dot(h1.astype(MXU_DTYPE), w2.astype(MXU_DTYPE),
                   preferred_element_type=jnp.float32) + b2


def _l2_normalize(x):
    # x / max(||x||, eps)  ==  x * rsqrt(max(||x||^2, eps^2))  (rsqrt -> EUP slot)
    sq = jnp.sum(x * x, axis=1, keepdims=True)
    return x * jax.lax.rsqrt(jnp.maximum(sq, EPS * EPS))


def fused_moco_kernel(
    # inputs
    ptr_ref, xi_ref, xj_ref,
    w0q_ref, b0q_ref, w1q_ref, b1q_ref, w2q_ref, b2q_ref,
    w0k_ref, b0k_ref, w1k_ref, b1k_ref, w2k_ref, b2k_ref,
    queue_hbm,
    # outputs
    l_pos_ref, l_neg_ref,
    w0k_out, b0k_out, w1k_out, b1k_out, w2k_out, b2k_out,
    queue_out_hbm,
    # scratch
    queue_vmem, kn_vmem, dma_sems,
):
    # Start the queue HBM->VMEM fetch early; it overlaps the encoder matmuls.
    queue_fetch = pltpu.make_async_copy(queue_hbm, queue_vmem, dma_sems.at[0])
    queue_fetch.start()

    # ---- query encoder ----
    q = _encode(xi_ref[...], w0q_ref[...], b0q_ref[...], w1q_ref[...],
                b1q_ref[...], w2q_ref[...], b2q_ref[...])

    # ---- momentum update of key encoder params (VPU filler under the MXU) ----
    # param_k = m * param_k + (1 - m) * param_q ; written straight to the output
    # refs, which are then reused as the key-encoder weights (no extra temps).
    one_m = 1.0 - MOCO_M
    w0k_out[...] = w0k_ref[...] * MOCO_M + w0q_ref[...] * one_m
    b0k_out[...] = b0k_ref[...] * MOCO_M + b0q_ref[...] * one_m
    w1k_out[...] = w1k_ref[...] * MOCO_M + w1q_ref[...] * one_m
    b1k_out[...] = b1k_ref[...] * MOCO_M + b1q_ref[...] * one_m
    w2k_out[...] = w2k_ref[...] * MOCO_M + w2q_ref[...] * one_m
    b2k_out[...] = b2k_ref[...] * MOCO_M + b2q_ref[...] * one_m

    # ---- key encoder (no grad in torch; pure values here) ----
    # TODO(synk): batch shuffle / unshuffle is a DDP-only BN trick; identity here.
    k = _encode(xj_ref[...], w0k_out[...], b0k_out[...], w1k_out[...],
                b1k_out[...], w2k_out[...], b2k_out[...])

    # ---- contrastive head ----
    qn = _l2_normalize(q)
    kn = _l2_normalize(k)
    inv_t = 1.0 / MOCO_T

    l_pos_ref[...] = jnp.sum(qn * kn, axis=1, keepdims=True) * inv_t      # (N, 1)

    queue_fetch.wait()
    # queue stored (K, dim): l_neg = qn @ queue.T  (contract the feature dims)
    l_neg = jax.lax.dot_general(
        qn.astype(MXU_DTYPE), queue_vmem[...].astype(MXU_DTYPE),
        (((1,), (1,)), ((), ())), preferred_element_type=jnp.float32)
    l_neg_ref[...] = l_neg * inv_t                                        # (N, K)

    # ---- dequeue & enqueue: queue[ptr:ptr+N, :] = kn (in-place, aliased HBM) ----
    kn_vmem[...] = kn
    ptr = pl.multiple_of(ptr_ref[0], BATCH)
    enqueue = pltpu.make_async_copy(
        kn_vmem, queue_out_hbm.at[pl.ds(ptr, BATCH)], dma_sems.at[1])
    enqueue.start()
    enqueue.wait()


# ----------------------------- wrapper (single jitted step) --------------------
def _moco_step(xis, xjs, params_q, params_k, queue_kd, queue_ptr):
    """Returns (logits, labels, new_params_k, new_queue, new_queue_ptr)."""
    n = xis.shape[0]
    xi_flat = xis.reshape(n, -1)
    xj_flat = xjs.reshape(n, -1)
    ptr_arr = jnp.reshape(queue_ptr, (1,)).astype(jnp.int32)

    out_shape = (
        jax.ShapeDtypeStruct((n, 1), jnp.float32),              # l_pos (scaled)
        jax.ShapeDtypeStruct((n, MOCO_K), jnp.float32),         # l_neg (scaled)
        *(jax.ShapeDtypeStruct(p.shape, p.dtype) for p in params_k),
        jax.ShapeDtypeStruct(queue_kd.shape, queue_kd.dtype),   # queue (aliased)
    )
    out_specs = (_VMEM, _VMEM, _VMEM, _VMEM, _VMEM, _VMEM, _VMEM, _VMEM, _ANY)
    in_specs = [_SMEM, _VMEM, _VMEM] + [_VMEM] * 12 + [_ANY]

    outs = pl.pallas_call(
        fused_moco_kernel,
        out_shape=out_shape,
        in_specs=in_specs,
        out_specs=out_specs,
        scratch_shapes=[
            pltpu.VMEM((MOCO_K, MOCO_DIM), jnp.float32),   # queue copy for l_neg
            pltpu.VMEM((n, MOCO_DIM), jnp.float32),        # normalized keys to enqueue
            pltpu.SemaphoreType.DMA((2,)),
        ],
        input_output_aliases={15: 8},                      # queue in -> queue out (in place)
    )(ptr_arr, xi_flat, xj_flat, *params_q, *params_k, queue_kd)

    l_pos, l_neg = outs[0], outs[1]
    new_params_k = tuple(outs[2:8])
    new_queue = outs[8]

    logits = jnp.concatenate([l_pos, l_neg], axis=1)       # (N, 1+K), done by XLA
    labels = jnp.zeros((n,), dtype=jnp.int32)
    new_ptr = ((queue_ptr + n) % MOCO_K).astype(jnp.int32)
    return logits, labels, new_params_k, new_queue, new_ptr


# jit end-to-end; donate the queue so the pallas-level alias is a true in-place update.
moco_forward = jax.jit(_moco_step, donate_argnums=(4,))


# ----------------------------- parameter setup ---------------------------------
def init_encoder_params(key):
    ks = jax.random.split(key, 6)
    # weights stored already transposed: (in_dim, out_dim); biases as (1, out_dim)
    w0 = jax.random.normal(ks[0], (IN_DIM, DIM_MLP), jnp.float32) * 0.02
    b0 = jnp.zeros((1, DIM_MLP), jnp.float32)
    w1 = jax.random.normal(ks[1], (DIM_MLP, DIM_MLP), jnp.float32) * 0.02
    b1 = jnp.zeros((1, DIM_MLP), jnp.float32)
    w2 = jax.random.normal(ks[2], (DIM_MLP, MOCO_DIM), jnp.float32) * 0.02
    b2 = jnp.zeros((1, MOCO_DIM), jnp.float32)
    return (w0, b0, w1, b1, w2, b2)


# ----------------------------- main ---------------------------------------------
if __name__ == "__main__":
    root = jax.random.PRNGKey(0)
    k_enc, k_queue, k_xi, k_xj = jax.random.split(root, 4)

    # encoder_q params; encoder_k initialized as an exact copy (as in __init__)
    params_q = init_encoder_params(k_enc)
    params_k = tuple(jnp.array(p) for p in params_q)

    # queue buffer: randn(dim, K) then L2-normalized along dim=0 (PyTorch layout),
    # stored transposed as (K, dim) so enqueue is a contiguous row write.
    queue_dk = jax.random.normal(k_queue, (MOCO_DIM, MOCO_K), jnp.float32)
    queue_dk = queue_dk / jnp.maximum(
        jnp.sqrt(jnp.sum(queue_dk * queue_dk, axis=0, keepdims=True)), EPS)
    queue_kd = jnp.asarray(queue_dk.T)                     # (K, dim)
    queue_ptr = jnp.zeros((), jnp.int32)

    # two augmented views (NCHW)
    xis = jax.random.normal(k_xi, (BATCH, C, H, W), jnp.float32)
    xjs = jax.random.normal(k_xj, (BATCH, C, H, W), jnp.float32)

    logits, labels, params_k, queue_kd, queue_ptr = moco_forward(
        xis, xjs, params_q, params_k, queue_kd, queue_ptr
    )
    jax.block_until_ready((logits, labels, params_k, queue_kd, queue_ptr))

    assert logits.shape == (BATCH, 1 + MOCO_K)
    assert labels.shape == (BATCH,)
    assert queue_kd.shape == (MOCO_K, MOCO_DIM)
    assert int(queue_ptr) == BATCH % MOCO_K
    print("KERNEL_OK")
</pallas_src>

<mosaic_0001>
module attributes {stable_mosaic.version = 11 : i64} {
  func.func @fused_moco_kernel(%arg0: memref<1xi32, #tpu.memory_space<smem>>, %arg1: memref<8x1024xf32, #tpu.memory_space<vmem>>, %arg2: memref<8x1024xf32, #tpu.memory_space<vmem>>, %arg3: memref<1024x128xf32, #tpu.memory_space<vmem>>, %arg4: memref<1x128xf32, #tpu.memory_space<vmem>>, %arg5: memref<128x128xf32, #tpu.memory_space<vmem>>, %arg6: memref<1x128xf32, #tpu.memory_space<vmem>>, %arg7: memref<128x64xf32, #tpu.memory_space<vmem>>, %arg8: memref<1x64xf32, #tpu.memory_space<vmem>>, %arg9: memref<1024x128xf32, #tpu.memory_space<vmem>>, %arg10: memref<1x128xf32, #tpu.memory_space<vmem>>, %arg11: memref<128x128xf32, #tpu.memory_space<vmem>>, %arg12: memref<1x128xf32, #tpu.memory_space<vmem>>, %arg13: memref<128x64xf32, #tpu.memory_space<vmem>>, %arg14: memref<1x64xf32, #tpu.memory_space<vmem>>, %arg15: memref<128x64xf32, #tpu.memory_space<any>>, %arg16: memref<8x1xf32, #tpu.memory_space<vmem>>, %arg17: memref<8x128xf32, #tpu.memory_space<vmem>>, %arg18: memref<1024x128xf32, #tpu.memory_space<vmem>>, %arg19: memref<1x128xf32, #tpu.memory_space<vmem>>, %arg20: memref<128x128xf32, #tpu.memory_space<vmem>>, %arg21: memref<1x128xf32, #tpu.memory_space<vmem>>, %arg22: memref<128x64xf32, #tpu.memory_space<vmem>>, %arg23: memref<1x64xf32, #tpu.memory_space<vmem>>, %arg24: memref<128x64xf32, #tpu.memory_space<any>>, %arg25: memref<128x64xf32, #tpu.memory_space<vmem>>, %arg26: memref<8x64xf32, #tpu.memory_space<vmem>>, %arg27: memref<2x!tpu.dma_semaphore, #tpu.memory_space<semaphore_mem>>) attributes {dimension_semantics = [], scalar_prefetch = 0 : i64, scratch_operands = 3 : i64, tpu.core_type = #tpu.core_type<tc>} {
    %c0_i32 = arith.constant 0 : i32
    %0 = tpu.memref_slice %arg27[%c0_i32] : memref<2x!tpu.dma_semaphore, #tpu.memory_space<semaphore_mem>> -> memref<1x!tpu.dma_semaphore, #tpu.memory_space<semaphore_mem>>
    %1 = tpu.memref_squeeze %0 : memref<1x!tpu.dma_semaphore, #tpu.memory_space<semaphore_mem>> -> memref<!tpu.dma_semaphore, #tpu.memory_space<semaphore_mem>>
    tpu.enqueue_dma source(%arg15 : memref<128x64xf32, #tpu.memory_space<any>>) target(%arg25 : memref<128x64xf32, #tpu.memory_space<vmem>>) target_semaphore(%1 : memref<!tpu.dma_semaphore, #tpu.memory_space<semaphore_mem>>)
    %c0 = arith.constant 0 : index
    %c0_0 = arith.constant 0 : index
    %2 = vector.load %arg1[%c0, %c0_0] : memref<8x1024xf32, #tpu.memory_space<vmem>>, vector<8x1024xf32>
    %c0_1 = arith.constant 0 : index
    %c0_2 = arith.constant 0 : index
    %3 = vector.load %arg3[%c0_1, %c0_2] : memref<1024x128xf32, #tpu.memory_space<vmem>>, vector<1024x128xf32>
    %c0_3 = arith.constant 0 : index
    %c0_4 = arith.constant 0 : index
    %4 = vector.load %arg4[%c0_3, %c0_4] : memref<1x128xf32, #tpu.memory_space<vmem>>, vector<1x128xf32>
    %c0_5 = arith.constant 0 : index
    %c0_6 = arith.constant 0 : index
    %5 = vector.load %arg5[%c0_5, %c0_6] : memref<128x128xf32, #tpu.memory_space<vmem>>, vector<128x128xf32>
    %c0_7 = arith.constant 0 : index
    %c0_8 = arith.constant 0 : index
    %6 = vector.load %arg6[%c0_7, %c0_8] : memref<1x128xf32, #tpu.memory_space<vmem>>, vector<1x128xf32>
    %c0_9 = arith.constant 0 : index
    %c0_10 = arith.constant 0 : index
    %7 = vector.load %arg7[%c0_9, %c0_10] : memref<128x64xf32, #tpu.memory_space<vmem>>, vector<128x64xf32>
    %c0_11 = arith.constant 0 : index
    %c0_12 = arith.constant 0 : index
    %8 = vector.load %arg8[%c0_11, %c0_12] : memref<1x64xf32, #tpu.memory_space<vmem>>, vector<1x64xf32>
    %9 = arith.truncf %2 : vector<8x1024xf32> to vector<8x1024xbf16>
    %10 = arith.truncf %3 : vector<1024x128xf32> to vector<1024x128xbf16>
    %cst = arith.constant dense<0.000000e+00> : vector<8x128xf32>
    %11 = tpu.matmul %9, %10, %cst {dimension_numbers = #tpu.dot_dimension_numbers<[1], [0], [0], [1], [0, 0, 1, 1], [], []>} : vector<8x1024xbf16>, vector<1024x128xbf16>, vector<8x128xf32> -> vector<8x128xf32>
    %12 = vector.broadcast %4 : vector<1x128xf32> to vector<8x128xf32>
    %13 = arith.addf %11, %12 : vector<8x128xf32>
    %cst_13 = arith.constant 0.000000e+00 : f32
    %14 = vector.broadcast %cst_13 : f32 to vector<8x128xf32>
    %15 = arith.maximumf %13, %14 : vector<8x128xf32>
    %16 = arith.truncf %15 : vector<8x128xf32> to vector<8x128xbf16>
    %17 = arith.truncf %5 : vector<128x128xf32> to vector<128x128xbf16>
    %cst_14 = arith.constant dense<0.000000e+00> : vector<8x128xf32>
    %18 = tpu.matmul %16, %17, %cst_14 {dimension_numbers = #tpu.dot_dimension_numbers<[1], [0], [0], [1], [0, 0, 1, 1], [], []>} : vector<8x128xbf16>, vector<128x128xbf16>, vector<8x128xf32> -> vector<8x128xf32>
    %19 = vector.broadcast %6 : vector<1x128xf32> to vector<8x128xf32>
    %20 = arith.addf %18, %19 : vector<8x128xf32>
    %cst_15 = arith.constant 0.000000e+00 : f32
    %21 = vector.broadcast %cst_15 : f32 to vector<8x128xf32>
    %22 = arith.maximumf %20, %21 : vector<8x128xf32>
    %23 = arith.truncf %22 : vector<8x128xf32> to vector<8x128xbf16>
    %24 = arith.truncf %7 : vector<128x64xf32> to vector<128x64xbf16>
    %cst_16 = arith.constant dense<0.000000e+00> : vector<8x64xf32>
    %25 = tpu.matmul %23, %24, %cst_16 {dimension_numbers = #tpu.dot_dimension_numbers<[1], [0], [0], [1], [0, 0, 1, 1], [], []>} : vector<8x128xbf16>, vector<128x64xbf16>, vector<8x64xf32> -> vector<8x64xf32>
    %26 = vector.broadcast %8 : vector<1x64xf32> to vector<8x64xf32>
    %27 = arith.addf %25, %26 : vector<8x64xf32>
    %c0_17 = arith.constant 0 : index
    %c0_18 = arith.constant 0 : index
    %28 = vector.load %arg9[%c0_17, %c0_18] : memref<1024x128xf32, #tpu.memory_space<vmem>>, vector<1024x128xf32>
    %cst_19 = arith.constant 9.990000e-01 : f32
    %29 = vector.broadcast %cst_19 : f32 to vector<1024x128xf32>
    %30 = arith.mulf %28, %29 : vector<1024x128xf32>
    %c0_20 = arith.constant 0 : index
    %c0_21 = arith.constant 0 : index
    %31 = vector.load %arg3[%c0_20, %c0_21] : memref<1024x128xf32, #tpu.memory_space<vmem>>, vector<1024x128xf32>
    %cst_22 = arith.constant 1.000000e-03 : f32
    %32 = vector.broadcast %cst_22 : f32 to vector<1024x128xf32>
    %33 = arith.mulf %31, %32 : vector<1024x128xf32>
    %34 = arith.addf %30, %33 : vector<1024x128xf32>
    %c0_23 = arith.constant 0 : index
    %c0_24 = arith.constant 0 : index
    %35 = vector.load %arg18[%c0_23, %c0_24] : memref<1024x128xf32, #tpu.memory_space<vmem>>, vector<1024x128xf32>
    tpu.vector_store %arg18[%c0_23, %c0_24], %34 {strides = array<i32>} : memref<1024x128xf32, #tpu.memory_space<vmem>>, vector<1024x128xf32>,
    %c0_25 = arith.constant 0 : index
    %c0_26 = arith.constant 0 : index
    %36 = vector.load %arg10[%c0_25, %c0_26] : memref<1x128xf32, #tpu.memory_space<vmem>>, vector<1x128xf32>
    %cst_27 = arith.constant 9.990000e-01 : f32
    %37 = vector.broadcast %cst_27 : f32 to vector<1x128xf32>
    %38 = arith.mulf %36, %37 : vector<1x128xf32>
    %c0_28 = arith.constant 0 : index
    %c0_29 = arith.constant 0 : index
    %39 = vector.load %arg4[%c0_28, %c0_29] : memref<1x128xf32, #tpu.memory_space<vmem>>, vector<1x128xf32>
    %cst_30 = arith.constant 1.000000e-03 : f32
    %40 = vector.broadcast %cst_30 : f32 to vector<1x128xf32>
    %41 = arith.mulf %39, %40 : vector<1x128xf32>
    %42 = arith.addf %38, %41 : vector<1x128xf32>
    %c0_31 = arith.constant 0 : index
    %c0_32 = arith.constant 0 : index
    %43 = vector.load %arg19[%c0_31, %c0_32] : memref<1x128xf32, #tpu.memory_space<vmem>>, vector<1x128xf32>
    tpu.vector_store %arg19[%c0_31, %c0_32], %42 {strides = array<i32>} : memref<1x128xf32, #tpu.memory_space<vmem>>, vector<1x128xf32>,
    %c0_33 = arith.constant 0 : index
    %c0_34 = arith.constant 0 : index
    %44 = vector.load %arg11[%c0_33, %c0_34] : memref<128x128xf32, #tpu.memory_space<vmem>>, vector<128x128xf32>
    %cst_35 = arith.constant 9.990000e-01 : f32
    %45 = vector.broadcast %cst_35 : f32 to vector<128x128xf32>
    %46 = arith.mulf %44, %45 : vector<128x128xf32>
    %c0_36 = arith.constant 0 : index
    %c0_37 = arith.constant 0 : index
    %47 = vector.load %arg5[%c0_36, %c0_37] : memref<128x128xf32, #tpu.memory_space<vmem>>, vector<128x128xf32>
    %cst_38 = arith.constant 1.000000e-03 : f32
    %48 = vector.broadcast %cst_38 : f32 to vector<128x128xf32>
    %49 = arith.mulf %47, %48 : vector<128x128xf32>
    %50 = arith.addf %46, %49 : vector<128x128xf32>
    %c0_39 = arith.constant 0 : index
    %c0_40 = arith.constant 0 : index
    %51 = vector.load %arg20[%c0_39, %c0_40] : memref<128x128xf32, #tpu.memory_space<vmem>>, vector<128x128xf32>
    tpu.vector_store %arg20[%c0_39, %c0_40], %50 {strides = array<i32>} : memref<128x128xf32, #tpu.memory_space<vmem>>, vector<128x128xf32>,
    %c0_41 = arith.constant 0 : index
    %c0_42 = arith.constant 0 : index
    %52 = vector.load %arg12[%c0_41, %c0_42] : memref<1x128xf32, #tpu.memory_space<vmem>>, vector<1x128xf32>
    %cst_43 = arith.constant 9.990000e-01 : f32
    %53 = vector.broadcast %cst_43 : f32 to vector<1x128xf32>
    %54 = arith.mulf %52, %53 : vector<1x128xf32>
    %c0_44 = arith.constant 0 : index
    %c0_45 = arith.constant 0 : index
    %55 = vector.load %arg6[%c0_44, %c0_45] : memref<1x128xf32, #tpu.memory_space<vmem>>, vector<1x128xf32>
    %cst_46 = arith.constant 1.000000e-03 : f32
    %56 = vector.broadcast %cst_46 : f32 to vector<1x128xf32>
    %57 = arith.mulf %55, %56 : vector<1x128xf32>
    %58 = arith.addf %54, %57 : vector<1x128xf32>
    %c0_47 = arith.constant 0 : index
    %c0_48 = arith.constant 0 : index
    %59 = vector.load %arg21[%c0_47, %c0_48] : memref<1x128xf32, #tpu.memory_space<vmem>>, vector<1x128xf32>
    tpu.vector_store %arg21[%c0_47, %c0_48], %58 {strides = array<i32>} : memref<1x128xf32, #tpu.memory_space<vmem>>, vector<1x128xf32>,
    %c0_49 = arith.constant 0 : index
    %c0_50 = arith.constant 0 : index
    %60 = vector.load %arg13[%c0_49, %c0_50] : memref<128x64xf32, #tpu.memory_space<vmem>>, vector<128x64xf32>
    %cst_51 = arith.constant 9.990000e-01 : f32
    %61 = vector.broadcast %cst_51 : f32 to vector<128x64xf32>
    %62 = arith.mulf %60, %61 : vector<128x64xf32>
    %c0_52 = arith.constant 0 : index
    %c0_53 = arith.constant 0 : index
    %63 = vector.load %arg7[%c0_52, %c0_53] : memref<128x64xf32, #tpu.memory_space<vmem>>, vector<128x64xf32>
    %cst_54 = arith.constant 1.000000e-03 : f32
    %64 = vector.broadcast %cst_54 : f32 to vector<128x64xf32>
    %65 = arith.mulf %63, %64 : vector<128x64xf32>
    %66 = arith.addf %62, %65 : vector<128x64xf32>
    %c0_55 = arith.constant 0 : index
    %c0_56 = arith.constant 0 : index
    %67 = vector.load %arg22[%c0_55, %c0_56] : memref<128x64xf32, #tpu.memory_space<vmem>>, vector<128x64xf32>
    tpu.vector_store %arg22[%c0_55, %c0_56], %66 {strides = array<i32>} : memref<128x64xf32, #tpu.memory_space<vmem>>, vector<128x64xf32>,
    %c0_57 = arith.constant 0 : index
    %c0_58 = arith.constant 0 : index
    %68 = vector.load %arg14[%c0_57, %c0_58] : memref<1x64xf32, #tpu.memory_space<vmem>>, vector<1x64xf32>
    %cst_59 = arith.constant 9.990000e-01 : f32
    %69 = vector.broadcast %cst_59 : f32 to vector<1x64xf32>
    %70 = arith.mulf %68, %69 : vector<1x64xf32>
    %c0_60 = arith.constant 0 : index
    %c0_61 = arith.constant 0 : index
    %71 = vector.load %arg8[%c0_60, %c0_61] : memref<1x64xf32, #tpu.memory_space<vmem>>, vector<1x64xf32>
    %cst_62 = arith.constant 1.000000e-03 : f32
    %72 = vector.broadcast %cst_62 : f32 to vector<1x64xf32>
    %73 = arith.mulf %71, %72 : vector<1x64xf32>
    %74 = arith.addf %70, %73 : vector<1x64xf32>
    %c0_63 = arith.constant 0 : index
    %c0_64 = arith.constant 0 : index
    %75 = vector.load %arg23[%c0_63, %c0_64] : memref<1x64xf32, #tpu.memory_space<vmem>>, vector<1x64xf32>
    tpu.vector_store %arg23[%c0_63, %c0_64], %74 {strides = array<i32>} : memref<1x64xf32, #tpu.memory_space<vmem>>, vector<1x64xf32>,
    %c0_65 = arith.constant 0 : index
    %c0_66 = arith.constant 0 : index
    %76 = vector.load %arg2[%c0_65, %c0_66] : memref<8x1024xf32, #tpu.memory_space<vmem>>, vector<8x1024xf32>
    %c0_67 = arith.constant 0 : index
    %c0_68 = arith.constant 0 : index
    %77 = vector.load %arg18[%c0_67, %c0_68] : memref<1024x128xf32, #tpu.memory_space<vmem>>, vector<1024x128xf32>
    %c0_69 = arith.constant 0 : index
    %c0_70 = arith.constant 0 : index
    %78 = vector.load %arg19[%c0_69, %c0_70] : memref<1x128xf32, #tpu.memory_space<vmem>>, vector<1x128xf32>
    %c0_71 = arith.constant 0 : index
    %c0_72 = arith.constant 0 : index
    %79 = vector.load %arg20[%c0_71, %c0_72] : memref<128x128xf32, #tpu.memory_space<vmem>>, vector<128x128xf32>
    %c0_73 = arith.constant 0 : index
    %c0_74 = arith.constant 0 : index
    %80 = vector.load %arg21[%c0_73, %c0_74] : memref<1x128xf32, #tpu.memory_space<vmem>>, vector<1x128xf32>
    %c0_75 = arith.constant 0 : index
    %c0_76 = arith.constant 0 : index
    %81 = vector.load %arg22[%c0_75, %c0_76] : memref<128x64xf32, #tpu.memory_space<vmem>>, vector<128x64xf32>
    %c0_77 = arith.constant 0 : index
    %c0_78 = arith.constant 0 : index
    %82 = vector.load %arg23[%c0_77, %c0_78] : memref<1x64xf32, #tpu.memory_space<vmem>>, vector<1x64xf32>
    %83 = arith.truncf %76 : vector<8x1024xf32> to vector<8x1024xbf16>
    %84 = arith.truncf %77 : vector<1024x128xf32> to vector<1024x128xbf16>
    %cst_79 = arith.constant dense<0.000000e+00> : vector<8x128xf32>
    %85 = tpu.matmul %83, %84, %cst_79 {dimension_numbers = #tpu.dot_dimension_numbers<[1], [0], [0], [1], [0, 0, 1, 1], [], []>} : vector<8x1024xbf16>, vector<1024x128xbf16>, vector<8x128xf32> -> vector<8x128xf32>
    %86 = vector.broadcast %78 : vector<1x128xf32> to vector<8x128xf32>
    %87 = arith.addf %85, %86 : vector<8x128xf32>
    %cst_80 = arith.constant 0.000000e+00 : f32
    %88 = vector.broadcast %cst_80 : f32 to vector<8x128xf32>
    %89 = arith.maximumf %87, %88 : vector<8x128xf32>
    %90 = arith.truncf %89 : vector<8x128xf32> to vector<8x128xbf16>
    %91 = arith.truncf %79 : vector<128x128xf32> to vector<128x128xbf16>
    %cst_81 = arith.constant dense<0.000000e+00> : vector<8x128xf32>
    %92 = tpu.matmul %90, %91, %cst_81 {dimension_numbers = #tpu.dot_dimension_numbers<[1], [0], [0], [1], [0, 0, 1, 1], [], []>} : vector<8x128xbf16>, vector<128x128xbf16>, vector<8x128xf32> -> vector<8x128xf32>
    %93 = vector.broadcast %80 : vector<1x128xf32> to vector<8x128xf32>
    %94 = arith.addf %92, %93 : vector<8x128xf32>
    %cst_82 = arith.constant 0.000000e+00 : f32
    %95 = vector.broadcast %cst_82 : f32 to vector<8x128xf32>
    %96 = arith.maximumf %94, %95 : vector<8x128xf32>
    %97 = arith.truncf %96 : vector<8x128xf32> to vector<8x128xbf16>
    %98 = arith.truncf %81 : vector<128x64xf32> to vector<128x64xbf16>
    %cst_83 = arith.constant dense<0.000000e+00> : vector<8x64xf32>
    %99 = tpu.matmul %97, %98, %cst_83 {dimension_numbers = #tpu.dot_dimension_numbers<[1], [0], [0], [1], [0, 0, 1, 1], [], []>} : vector<8x128xbf16>, vector<128x64xbf16>, vector<8x64xf32> -> vector<8x64xf32>
    %100 = vector.broadcast %82 : vector<1x64xf32> to vector<8x64xf32>
    %101 = arith.addf %99, %100 : vector<8x64xf32>
    %102 = arith.mulf %27, %27 : vector<8x64xf32>
    %cst_84 = arith.constant dense<0.000000e+00> : vector<8xf32>
    %103 = vector.multi_reduction <add>, %102, %cst_84 [1] : vector<8x64xf32> to vector<8xf32>
    %104 = vector.shape_cast %103 : vector<8xf32> to vector<8x1xf32>
    %cst_85 = arith.constant 1.000000e-24 : f32
    %105 = vector.broadcast %cst_85 : f32 to vector<8x1xf32>
    %106 = arith.maximumf %104, %105 : vector<8x1xf32>
    %107 = math.rsqrt %106 : vector<8x1xf32>
    %108 = vector.broadcast %107 : vector<8x1xf32> to vector<8x64xf32>
    %109 = arith.mulf %27, %108 : vector<8x64xf32>
    %110 = arith.mulf %101, %101 : vector<8x64xf32>
    %cst_86 = arith.constant dense<0.000000e+00> : vector<8xf32>
    %111 = vector.multi_reduction <add>, %110, %cst_86 [1] : vector<8x64xf32> to vector<8xf32>
    %112 = vector.shape_cast %111 : vector<8xf32> to vector<8x1xf32>
    %cst_87 = arith.constant 1.000000e-24 : f32
    %113 = vector.broadcast %cst_87 : f32 to vector<8x1xf32>
    %114 = arith.maximumf %112, %113 : vector<8x1xf32>
    %115 = math.rsqrt %114 : vector<8x1xf32>
    %116 = vector.broadcast %115 : vector<8x1xf32> to vector<8x64xf32>
    %117 = arith.mulf %101, %116 : vector<8x64xf32>
    %118 = arith.mulf %109, %117 : vector<8x64xf32>
    %cst_88 = arith.constant dense<0.000000e+00> : vector<8xf32>
    %119 = vector.multi_reduction <add>, %118, %cst_88 [1] : vector<8x64xf32> to vector<8xf32>
    %120 = vector.shape_cast %119 : vector<8xf32> to vector<8x1xf32>
    %cst_89 = arith.constant 14.2857141 : f32
    %121 = vector.broadcast %cst_89 : f32 to vector<8x1xf32>
    %122 = arith.mulf %120, %121 : vector<8x1xf32>
    %c0_90 = arith.constant 0 : index
    %c0_91 = arith.constant 0 : index
    %123 = vector.load %arg16[%c0_90, %c0_91] : memref<8x1xf32, #tpu.memory_space<vmem>>, vector<8x1xf32>
    tpu.vector_store %arg16[%c0_90, %c0_91], %122 {strides = array<i32>} : memref<8x1xf32, #tpu.memory_space<vmem>>, vector<8x1xf32>,
    %c0_i32_92 = arith.constant 0 : i32
    %124 = tpu.memref_slice %arg27[%c0_i32_92] : memref<2x!tpu.dma_semaphore, #tpu.memory_space<semaphore_mem>> -> memref<1x!tpu.dma_semaphore, #tpu.memory_space<semaphore_mem>>
    %125 = tpu.memref_squeeze %124 : memref<1x!tpu.dma_semaphore, #tpu.memory_space<semaphore_mem>> -> memref<!tpu.dma_semaphore, #tpu.memory_space<semaphore_mem>>
    tpu.wait_dma2 semaphore(%125 : memref<!tpu.dma_semaphore, #tpu.memory_space<semaphore_mem>>) src(%arg15 : memref<128x64xf32, #tpu.memory_space<any>>) dst(%arg25 : memref<128x64xf32, #tpu.memory_space<vmem>>)
    %126 = arith.truncf %109 : vector<8x64xf32> to vector<8x64xbf16>
    %c0_93 = arith.constant 0 : index
    %c0_94 = arith.constant 0 : index
    %127 = vector.load %arg25[%c0_93, %c0_94] : memref<128x64xf32, #tpu.memory_space<vmem>>, vector<128x64xf32>
    %128 = arith.truncf %127 : vector<128x64xf32> to vector<128x64xbf16>
    %cst_95 = arith.constant dense<0.000000e+00> : vector<8x128xf32>
    %129 = tpu.matmul %126, %128, %cst_95 {dimension_numbers = #tpu.dot_dimension_numbers<[1], [1], [0], [0], [0, 0, 1, 0], [], []>} : vector<8x64xbf16>, vector<128x64xbf16>, vector<8x128xf32> -> vector<8x128xf32>
    %cst_96 = arith.constant 14.2857141 : f32
    %130 = vector.broadcast %cst_96 : f32 to vector<8x128xf32>
    %131 = arith.mulf %129, %130 : vector<8x128xf32>
    %c0_97 = arith.constant 0 : index
    %c0_98 = arith.constant 0 : index
    %132 = vector.load %arg17[%c0_97, %c0_98] : memref<8x128xf32, #tpu.memory_space<vmem>>, vector<8x128xf32>
    tpu.vector_store %arg17[%c0_97, %c0_98], %131 {strides = array<i32>} : memref<8x128xf32, #tpu.memory_space<vmem>>, vector<8x128xf32>,
    %c0_99 = arith.constant 0 : index
    %c0_100 = arith.constant 0 : index
    %133 = vector.load %arg26[%c0_99, %c0_100] : memref<8x64xf32, #tpu.memory_space<vmem>>, vector<8x64xf32>
    tpu.vector_store %arg26[%c0_99, %c0_100], %117 {strides = array<i32>} : memref<8x64xf32, #tpu.memory_space<vmem>>, vector<8x64xf32>,
    %c0_101 = arith.constant 0 : index
    %134 = memref.load %arg0[%c0_101] : memref<1xi32, #tpu.memory_space<smem>>
    %135 = tpu.assume_multiple %134, 8 : i32
    %c1_i32 = arith.constant 1 : i32
    %c0_i32_102 = arith.constant 0 : i32
    %136 = tpu.memref_slice %arg24[%135, %c0_i32_102] : memref<128x64xf32, #tpu.memory_space<any>> -> memref<8x64xf32, #tpu.memory_space<any>>
    %137 = tpu.memref_slice %arg27[%c1_i32] : memref<2x!tpu.dma_semaphore, #tpu.memory_space<semaphore_mem>> -> memref<1x!tpu.dma_semaphore, #tpu.memory_space<semaphore_mem>>
    %138 = tpu.memref_squeeze %137 : memref<1x!tpu.dma_semaphore, #tpu.memory_space<semaphore_mem>> -> memref<!tpu.dma_semaphore, #tpu.memory_space<semaphore_mem>>
    tpu.enqueue_dma source(%arg26 : memref<8x64xf32, #tpu.memory_space<vmem>>) target(%136 : memref<8x64xf32, #tpu.memory_space<any>>) target_semaphore(%138 : memref<!tpu.dma_semaphore, #tpu.memory_space<semaphore_mem>>)
    %c1_i32_103 = arith.constant 1 : i32
    %c0_i32_104 = arith.constant 0 : i32
    %139 = tpu.memref_slice %arg24[%135, %c0_i32_104] : memref<128x64xf32, #tpu.memory_space<any>> -> memref<8x64xf32, #tpu.memory_space<any>>
    %140 = tpu.memref_slice %arg27[%c1_i32_103] : memref<2x!tpu.dma_semaphore, #tpu.memory_space<semaphore_mem>> -> memref<1x!tpu.dma_semaphore, #tpu.memory_space<semaphore_mem>>
    %141 = tpu.memref_squeeze %140 : memref<1x!tpu.dma_semaphore, #tpu.memory_space<semaphore_mem>> -> memref<!tpu.dma_semaphore, #tpu.memory_space<semaphore_mem>>
    tpu.wait_dma2 semaphore(%141 : memref<!tpu.dma_semaphore, #tpu.memory_space<semaphore_mem>>) src(%arg26 : memref<8x64xf32, #tpu.memory_space<vmem>>) dst(%139 : memref<8x64xf32, #tpu.memory_space<any>>)
    return
  }
}

</mosaic_0001>

<bundles_post_ra>
// kernel: _moco_step.1
= control target key start
LH: loop header
LB: loop body
LE: loop exit
PB: predicated region body
PF: predicated region fallthrough
CT: control target
= control target key end

     0   :  { %s4199_s0 = inlined_call_operand.<no memory space> [shape: s32[1], index: 0, kind: input, shape index: {}]   ;;  %s4200_s1 = inlined_call_operand.vmem [shape: f32[8,1024], index: 1, kind: input, shape index: {}]   ;;  %s4201_s2 = inlined_call_operand.vmem [shape: f32[8,1024], index: 2, kind: input, shape index: {}]   ;;  %s4202_s3 = inlined_call_operand.vmem [shape: f32[1024,128], index: 3, kind: input, shape index: {}]   ;;  %s4203_s4 = inlined_call_operand.vmem [shape: f32[1,128], index: 4, kind: input, shape index: {}]   ;;  %s4204_s5 = inlined_call_operand.vmem [shape: f32[128,128], index: 5, kind: input, shape index: {}]   ;;  %s4205_s6 = inlined_call_operand.vmem [shape: f32[1,128], index: 6, kind: input, shape index: {}]   ;;  %s4206_s7 = inlined_call_operand.vmem [shape: f32[128,64], index: 7, kind: input, shape index: {}]   ;;  %s4207_s8 = inlined_call_operand.vmem [shape: f32[1,64], index: 8, kind: input, shape index: {}]   ;;  %s4208_s9 = inlined_call_operand.hbm [shape: f32[1024,128], index: 9, kind: input, shape index: {}]   ;;  %s4209_s10 = inlined_call_operand.vmem [shape: f32[1,128], index: 10, kind: input, shape index: {}]   ;;  %s4210_s11 = inlined_call_operand.hbm [shape: f32[128,128], index: 11, kind: input, shape index: {}]   ;;  %s4211_s12 = inlined_call_operand.vmem [shape: f32[1,128], index: 12, kind: input, shape index: {}]   ;;  %s4212_s13 = inlined_call_operand.vmem [shape: f32[128,64], index: 13, kind: input, shape index: {}]   ;;  %s4213_s14 = inlined_call_operand.vmem [shape: f32[1,64], index: 14, kind: input, shape index: {}]   ;;  %s4214_s15 = inlined_call_operand.vmem [shape: f32[128,64], index: 15, kind: input, shape index: {}, may-alias: {15,24}]   ;;  %s4215_s16 = inlined_call_operand.vmem [shape: f32[8,1], index: 16, kind: output, shape index: {0}]   ;;  %s4216_s17 = inlined_call_operand.vmem [shape: f32[8,128], index: 17, kind: output, shape index: {1}]   ;;  %s4217_s18 = inlined_call_operand.hbm [shape: f32[1024,128], index: 18, kind: output, shape index: {2}]   ;;  %s4218_s19 = inlined_call_operand.hbm [shape: f32[1,128], index: 19, kind: output, shape index: {3}]   ;;  %s4219_s20 = inlined_call_operand.hbm [shape: f32[128,128], index: 20, kind: output, shape index: {4}]   ;;  %s4220_s21 = inlined_call_operand.hbm [shape: f32[1,128], index: 21, kind: output, shape index: {5}]   ;;  %s4221_s22 = inlined_call_operand.vmem [shape: f32[128,64], index: 22, kind: output, shape index: {6}]   ;;  %s4222_s23 = inlined_call_operand.hbm [shape: f32[1,64], index: 23, kind: output, shape index: {7}]   ;;  %s4223_s24 = inlined_call_operand.vmem [shape: f32[128,64], index: 24, kind: output, shape index: {8}, may-alias: {15,24}]  }
   0x1   :  { %4235 = sst [smem:[#allocation44_spill]] %s4199_s0 }
   0x2   :  { %4236 = sst [smem:[#allocation45_spill]] %s4200_s1 }
   0x3   :  { %4237 = sst [smem:[#allocation46_spill]] %s4201_s2 }
   0x4   :  { %4238 = sst [smem:[#allocation47_spill]] %s4202_s3 }
   0x5   :  { %4239 = sst [smem:[#allocation48_spill]] %s4203_s4 }
   0x6   :  { %4240 = sst [smem:[#allocation49_spill]] %s4204_s5 }
   0x7   :  { %4241 = sst [smem:[#allocation50_spill]] %s4205_s6 }
   0x8   :  { %4242 = sst [smem:[#allocation51_spill]] %s4206_s7 }
   0x9   :  { %4243 = sst [smem:[#allocation52_spill]] %s4207_s8 }
   0xa   :  { %31 = vsyncpa [#allocation7], 0 }
   0xb   :  { %32 = vsyncpa [#allocation10], 0 }
   0xc   :  { %33 = vsyncpa [#allocation8], 0 }
   0xd   :  { %34 = vsyncpa [#allocation13], 0 }
   0xe   :  { %35 = vsyncpa [#allocation16], 0  ;;  %s2855_s5 = smov [#allocation6]   ;;  %s2687_s6 = scalar_lea.hbm %s4208_s9, 16384 }
   0xf   :  { %s59_s26 = sshll.u32 %s2855_s5, 4  ;;  %p2688_p0 = scmp.ne.s32.totalorder %s4208_s9, %s2687_s6  ;;  %s60_s26 = int_to_ptr.vmem [resolvable:$true] %s59_s26 }
  0x10   :  { %p2691_p1 = scmp.lt.u32.totalorder %s2687_s6, %s4208_s9 }
  0x12   :  { %p2693_p2 = pnand %p2691_p1, %p2688_p0 }
  0x14   :  { %2696 = shalt.err (!%p2693_p2)
}
  0x15   :  { %s2697_s30 = scalar_lea.vmem %s60_s26, 16384  ;;  %p2702_p4 = scmp.lt.s32.totalorder %s60_s26, %s60_s26 }
  0x16   :  { %p2698_p3 = scmp.ne.s32.totalorder %s60_s26, %s2697_s30  ;;  %p2703_p5 = scmp.lt.s32.totalorder %s2697_s30, %s2697_s30 }
  0x18   :  { %p2704_p6 = por %p2703_p5, %p2702_p4 }
  0x1a   :  { %p2705_p7 = pnand %p2704_p6, %p2698_p3 }
  0x1c   :  { %2708 = shalt.err (!%p2705_p7)
}
  0x1d   :  { %s2856_s3 = smov 128   ;;  %s2857_s25 = smov 8  }
  0x1e   :  { %65 = dma.hbm_to_vmem [thread:$0]  %s4208_s9, 16384, %s60_s26, [#allocation7], %s2856_s3, %s2856_s3, %s2857_s25  }
  0x1f   :  { %s2858_s1 = smov [#allocation9]   ;;  %s2709_s6 = scalar_lea.hbm %s4210_s11, 2048 }
  0x20   :  { %s73_s5 = sshll.u32 %s2858_s1, 4  ;;  %p2710_p8 = scmp.ne.s32.totalorder %s4210_s11, %s2709_s6  ;;  %s74_s5 = int_to_ptr.vmem [resolvable:$true] %s73_s5 }
  0x21   :  { %p2713_p9 = scmp.lt.u32.totalorder %s2709_s6, %s4210_s11 }
  0x23   :  { %p2715_p10 = pnand %p2713_p9, %p2710_p8 }
  0x25   :  { %2718 = shalt.err (!%p2715_p10)
}
  0x26   :  { %s2719_s30 = scalar_lea.vmem %s74_s5, 2048  ;;  %p2724_p12 = scmp.lt.s32.totalorder %s74_s5, %s74_s5 }
  0x27   :  { %p2720_p11 = scmp.ne.s32.totalorder %s74_s5, %s2719_s30  ;;  %p2725_p13 = scmp.lt.s32.totalorder %s2719_s30, %s2719_s30 }
  0x29   :  { %p2726_p0 = por %p2725_p13, %p2724_p12 }
  0x2b   :  { %p2727_p1 = pnand %p2726_p0, %p2720_p11 }
  0x2d   :  { %2730 = shalt.err (!%p2727_p1)
}
  0x2e   :  { %79 = dma.hbm_to_vmem [thread:$0]  %s4210_s11, 2048, %s74_s5, [#allocation10], %s2856_s3, %s2856_s3, %s2857_s25  }
  0x2f   :  { %2841 = dma.done.wait [#allocation7], 16384  }
  0x30   :  { %2842 = vsyncadd [#allocation7], 4294950912 }
  0x31   :  { %2843 = dma.done.wait [#allocation10], 2048  }
  0x32   :  { %2844 = vsyncadd [#allocation10], 4294965248  ;;  %v3024_v0 = vld [vmem:[%s4214_s15] sm:$0xff]  ;;  %v3029_v1 = vld [vmem:[%s4214_s15 + $0x8] sm:$0xff] }
  0x33   :  { %4244 = vst [vmem:[#allocation27_spill] sm:$0xff] %v3024_v0  ;;  %4245 = vst [vmem:[#allocation28_spill] sm:$0xff] %v3029_v1  ;;  %v3034_v2 = vld [vmem:[%s4214_s15 + $0x10] sm:$0xff]  ;;  %v3039_v3 = vld [vmem:[%s4214_s15 + $0x18] sm:$0xff] }
  0x34   :  { %4246 = vst [vmem:[#allocation29_spill] sm:$0xff] %v3034_v2  ;;  %4247 = vst [vmem:[#allocation30_spill] sm:$0xff] %v3039_v3  ;;  %v3044_v4 = vld [vmem:[%s4214_s15 + $0x20] sm:$0xff]  ;;  %v3049_v5 = vld [vmem:[%s4214_s15 + $0x28] sm:$0xff] }
  0x35   :  { %4248 = vst [vmem:[#allocation31_spill] sm:$0xff] %v3044_v4  ;;  %4249 = vst [vmem:[#allocation32_spill] sm:$0xff] %v3049_v5  ;;  %v3054_v6 = vld [vmem:[%s4214_s15 + $0x30] sm:$0xff]  ;;  %v3059_v7 = vld [vmem:[%s4214_s15 + $0x38] sm:$0xff] }
  0x36   :  { %4250 = vst [vmem:[#allocation33_spill] sm:$0xff] %v3054_v6  ;;  %4251 = vst [vmem:[#allocation34_spill] sm:$0xff] %v3059_v7  ;;  %v3064_v8 = vld [vmem:[%s4214_s15 + $0x40] sm:$0xff]  ;;  %v3069_v9 = vld [vmem:[%s4214_s15 + $0x48] sm:$0xff] }
  0x37   :  { %4252 = vst [vmem:[#allocation35_spill] sm:$0xff] %v3064_v8  ;;  %4253 = vst [vmem:[#allocation36_spill] sm:$0xff] %v3069_v9  ;;  %v3074_v10 = vld [vmem:[%s4214_s15 + $0x50] sm:$0xff]  ;;  %v3079_v11 = vld [vmem:[%s4214_s15 + $0x58] sm:$0xff] }
  0x38   :  { %4254 = vst [vmem:[#allocation37_spill] sm:$0xff] %v3074_v10  ;;  %4255 = vst [vmem:[#allocation38_spill] sm:$0xff] %v3079_v11  ;;  %v3084_v12 = vld [vmem:[%s4214_s15 + $0x60] sm:$0xff]  ;;  %v3089_v13 = vld [vmem:[%s4214_s15 + $0x68] sm:$0xff] }
  0x39   :  { %4256 = vst [vmem:[#allocation39_spill] sm:$0xff] %v3084_v12  ;;  %4257 = vst [vmem:[#allocation40_spill] sm:$0xff] %v3089_v13  ;;  %v3094_v14 = vld [vmem:[%s4214_s15 + $0x70] sm:$0xff]  ;;  %v3099_v15 = vld [vmem:[%s4214_s15 + $0x78] sm:$0xff] }
  0x3a   :  { %4258 = vst [vmem:[#allocation41_spill] sm:$0xff] %v3094_v14  ;;  %4259 = vst [vmem:[#allocation42_spill] sm:$0xff] %v3099_v15 }
  0x3b   :  { %164 = vsyncadd [#allocation4], 2048  ;;  %s4260_s28 = sld [smem:[#allocation47_spill]]  ;;  %v702_v19 = vld [vmem:[#allocation6 + $0x80] sm:$0xff]  ;;  %v703_v20 = vld [vmem:[#allocation6 + $0x88] sm:$0xff]  ;;  %s4261_s15 = sld [smem:[#allocation45_spill]] }
  0x3c   :  { %v830_v23 = vmul.f32 0.999, %v702_v19  ;;  %v831_v24 = vmul.f32 0.999, %v703_v20  ;;  %v686_v28 = vld [vmem:[#allocation6] sm:$0xff]  ;;  %v687_v29 = vld [vmem:[#allocation6 + $0x8] sm:$0xff] }
  0x3d   :  { %v814_v34 = vmul.f32 0.999, %v686_v28  ;;  %v815_v35 = vmul.f32 0.999, %v687_v29  ;;  %v704_v39 = vld [vmem:[#allocation6 + $0x90] sm:$0xff]  ;;  %v705_v40 = vld [vmem:[#allocation6 + $0x98] sm:$0xff] }
  0x3e   :  { %v832_v45 = vmul.f32 0.999, %v704_v39  ;;  %v833_v46 = vmul.f32 0.999, %v705_v40  ;;  %v688_v50 = vld [vmem:[#allocation6 + $0x10] sm:$0xff]  ;;  %v689_v51 = vld [vmem:[#allocation6 + $0x18] sm:$0xff] }
  0x3f   :  { %v816_v56 = vmul.f32 0.999, %v688_v50  ;;  %v817_v57 = vmul.f32 0.999, %v689_v51  ;;  %v706_v61 = vld [vmem:[#allocation6 + $0xa0] sm:$0xff]  ;;  %v707_v62 = vld [vmem:[#allocation6 + $0xa8] sm:$0xff] }
  0x40   :  { %v834_v19 = vmul.f32 0.999, %v706_v61  ;;  %v835_v20 = vmul.f32 0.999, %v707_v62  ;;  %vm2860_vm0 = vmmov 0   ;;  %s4264_s2 = sld [smem:[#allocation51_spill]] }
  0x41   :  { %v189_v16 = vld [vmem:[%s4260_s28 + $0x80] sm:$0xff]  ;;  %v190_v17 = vld [vmem:[%s4260_s28 + $0x88] sm:$0xff]  ;;  %v191_v36 = vld [vmem:[%s4260_s28 + $0x90] sm:$0xff]  ;;  %v4265_v14 = vmov 0.0   ;;  %s4266_s11 = sld [smem:[#allocation48_spill]]  ;;  %s4267_s9 = sld [smem:[#allocation46_spill]] }
  0x42   :  { %v352_v18 = vpack.c.bf16 %v190_v17, %v189_v16  ;;  %v958_v21 = vmul.f32 0.001, %v189_v16  ;;  %v959_v22 = vmul.f32 0.001, %v190_v17  ;;  %v173_v25 = vld [vmem:[%s4260_s28] sm:$0xff]  ;;  %v174_v26 = vld [vmem:[%s4260_s28 + $0x8] sm:$0xff] }
  0x43   :  { %v344_v27 = vpack.c.bf16 %v174_v26, %v173_v25  ;;  %v942_v30 = vmul.f32 0.001, %v173_v25  ;;  %v943_v31 = vmul.f32 0.001, %v174_v26  ;;  %v192_v37 = vld [vmem:[%s4260_s28 + $0x98] sm:$0xff]  ;;  %v175_v47 = vld [vmem:[%s4260_s28 + $0x10] sm:$0xff] }
  0x44   :  { %2351 = vmatprep.subr.bf16.mxu1 %v352_v18  ;;  %v1086_v32 = vadd.f32 %v958_v21, %v830_v23  ;;  %v1087_v33 = vadd.f32 %v959_v22, %v831_v24  ;;  %v353_v38 = vpack.c.bf16 %v192_v37, %v191_v36  ;;  %v960_v41 = vmul.f32 0.001, %v191_v36  ;;  %v176_v48 = vld [vmem:[%s4260_s28 + $0x18] sm:$0xff]  ;;  %v193_v58 = vld [vmem:[%s4260_s28 + $0xa0] sm:$0xff]  ;;  %v194_v59 = vld [vmem:[%s4260_s28 + $0xa8] sm:$0xff]  ;;  %s4268_s29 = sld [smem:[#allocation50_spill]] }
  0x45   :  { %2352 = vmatpush3.bf16.msra.mxu1 %v344_v27  ;;  %v961_v42 = vmul.f32 0.001, %v192_v37  ;;  %v1070_v43 = vadd.f32 %v942_v30, %v814_v34  ;;  %v1071_v44 = vadd.f32 %v943_v31, %v815_v35  ;;  %v345_v49 = vpack.c.bf16 %v176_v48, %v175_v47  ;;  %v177_v21 = vld [vmem:[%s4260_s28 + $0x20] sm:$0xff]  ;;  %v178_v22 = vld [vmem:[%s4260_s28 + $0x28] sm:$0xff]  ;;  %v691_v25 = vld [vmem:[#allocation6 + $0x28] sm:$0xff] }
  0x46   :  { %1214 = vst [vmem:[#allocation11 + $0x80] sm:$0xff] %v1086_v32  ;;  %1215 = vst [vmem:[#allocation11 + $0x88] sm:$0xff] %v1087_v33  ;;  %2353 = vmatprep.subr.bf16.mxu1 %v353_v38  ;;  %v944_v52 = vmul.f32 0.001, %v175_v47  ;;  %v945_v53 = vmul.f32 0.001, %v176_v48  ;;  %v1088_v54 = vadd.f32 %v960_v41, %v832_v45  ;;  %v354_v60 = vpack.c.bf16 %v194_v59, %v193_v58 }
  0x47   :  { %1198 = vst [vmem:[#allocation11] sm:$0xff] %v1070_v43  ;;  %1199 = vst [vmem:[#allocation11 + $0x8] sm:$0xff] %v1071_v44  ;;  %v1089_v55 = vadd.f32 %v961_v42, %v833_v46  ;;  %v962_v63 = vmul.f32 0.001, %v193_v58  ;;  %v963_v16 = vmul.f32 0.001, %v194_v59  ;;  %v346_v23 = vpack.c.bf16 %v178_v22, %v177_v21 }
  0x48   :  { %1216 = vst [vmem:[#allocation11 + $0x90] sm:$0xff] %v1088_v54  ;;  %v1072_v17 = vadd.f32 %v944_v52, %v816_v56  ;;  %v1073_v18 = vadd.f32 %v945_v53, %v817_v57  ;;  %v690_v24 = vld [vmem:[#allocation6 + $0x20] sm:$0xff]  ;;  %v946_v26 = vmul.f32 0.001, %v177_v21  ;;  %v947_v27 = vmul.f32 0.001, %v178_v22 }
  0x49   :  { %2354 = vmatpush3.bf16.msra.mxu1 %v345_v49  ;;  %1217 = vst [vmem:[#allocation11 + $0x98] sm:$0xff] %v1089_v55  ;;  %v1090_v28 = vadd.f32 %v962_v63, %v834_v19  ;;  %v1091_v29 = vadd.f32 %v963_v16, %v835_v20  ;;  %v818_v30 = vmul.f32 0.999, %v690_v24  ;;  %v819_v31 = vmul.f32 0.999, %v691_v25  ;;  %v195_v32 = vld [vmem:[%s4260_s28 + $0xb0] sm:$0xff] }
  0x4a   :  { %2355 = vmatprep.subr.bf16.mxu1 %v354_v60  ;;  %1200 = vst [vmem:[#allocation11 + $0x10] sm:$0xff] %v1072_v17  ;;  %1201 = vst [vmem:[#allocation11 + $0x18] sm:$0xff] %v1073_v18  ;;  %v196_v33 = vld [vmem:[%s4260_s28 + $0xb8] sm:$0xff]  ;;  %v709_v36 = vld [vmem:[#allocation6 + $0xb8] sm:$0xff]  ;;  %v964_v37 = vmul.f32 0.001, %v195_v32 }
  0x4b   :  { %v355_v34 = vpack.c.bf16 %v196_v33, %v195_v32  ;;  %v708_v35 = vld [vmem:[#allocation6 + $0xb0] sm:$0xff]  ;;  %v965_v38 = vmul.f32 0.001, %v196_v33  ;;  %1218 = vst [vmem:[#allocation11 + $0xa0] sm:$0xff] %v1090_v28  ;;  %1219 = vst [vmem:[#allocation11 + $0xa8] sm:$0xff] %v1091_v29  ;;  %v1074_v39 = vadd.f32 %v946_v26, %v818_v30  ;;  %v1075_v40 = vadd.f32 %v947_v27, %v819_v31  ;;  %v179_v43 = vld [vmem:[%s4260_s28 + $0x30] sm:$0xff] }
  0x4c   :  { %v836_v41 = vmul.f32 0.999, %v708_v35  ;;  %v837_v42 = vmul.f32 0.999, %v709_v36  ;;  %v180_v44 = vld [vmem:[%s4260_s28 + $0x38] sm:$0xff]  ;;  %v693_v47 = vld [vmem:[#allocation6 + $0x38] sm:$0xff] }
  0x4d   :  { %2356 = vmatpush3.bf16.msra.mxu1 %v346_v23  ;;  %v347_v45 = vpack.c.bf16 %v180_v44, %v179_v43  ;;  %v692_v46 = vld [vmem:[#allocation6 + $0x30] sm:$0xff]  ;;  %v948_v48 = vmul.f32 0.001, %v179_v43  ;;  %v949_v49 = vmul.f32 0.001, %v180_v44  ;;  %1202 = vst [vmem:[#allocation11 + $0x20] sm:$0xff] %v1074_v39 }
  0x4e   :  { %2357 = vmatprep.subr.bf16.mxu1 %v355_v34  ;;  %1203 = vst [vmem:[#allocation11 + $0x28] sm:$0xff] %v1075_v40  ;;  %v1092_v50 = vadd.f32 %v964_v37, %v836_v41  ;;  %v1093_v51 = vadd.f32 %v965_v38, %v837_v42  ;;  %v820_v52 = vmul.f32 0.999, %v692_v46  ;;  %v821_v53 = vmul.f32 0.999, %v693_v47  ;;  %v197_v54 = vld [vmem:[%s4260_s28 + $0xc0] sm:$0xff] }
  0x4f   :  { %v198_v55 = vld [vmem:[%s4260_s28 + $0xc8] sm:$0xff]  ;;  %v711_v58 = vld [vmem:[#allocation6 + $0xc8] sm:$0xff]  ;;  %v966_v59 = vmul.f32 0.001, %v197_v54  ;;  %v181_v17 = vld [vmem:[%s4260_s28 + $0x40] sm:$0xff]  ;;  %vm1514_vm1 = vcmask 523264  }
  0x50   :  { %v356_v56 = vpack.c.bf16 %v198_v55, %v197_v54  ;;  %v710_v57 = vld [vmem:[#allocation6 + $0xc0] sm:$0xff]  ;;  %v967_v60 = vmul.f32 0.001, %v198_v55  ;;  %1220 = vst [vmem:[#allocation11 + $0xb0] sm:$0xff] %v1092_v50  ;;  %1221 = vst [vmem:[#allocation11 + $0xb8] sm:$0xff] %v1093_v51  ;;  %v1076_v61 = vadd.f32 %v948_v48, %v820_v52  ;;  %v1077_v62 = vadd.f32 %v949_v49, %v821_v53  ;;  %v695_v21 = vld [vmem:[#allocation6 + $0x48] sm:$0xff] }
  0x51   :  { %2358 = vmatpush3.bf16.msra.mxu1 %v347_v45  ;;  %v838_v63 = vmul.f32 0.999, %v710_v57  ;;  %v839_v16 = vmul.f32 0.999, %v711_v58  ;;  %v182_v18 = vld [vmem:[%s4260_s28 + $0x48] sm:$0xff]  ;;  %v199_v28 = vld [vmem:[%s4260_s28 + $0xd0] sm:$0xff] }
  0x52   :  { %2359 = vmatprep.subr.bf16.mxu1 %v356_v56  ;;  %v348_v19 = vpack.c.bf16 %v182_v18, %v181_v17  ;;  %v694_v20 = vld [vmem:[#allocation6 + $0x40] sm:$0xff]  ;;  %v950_v22 = vmul.f32 0.001, %v181_v17  ;;  %v951_v23 = vmul.f32 0.001, %v182_v18  ;;  %1204 = vst [vmem:[#allocation11 + $0x30] sm:$0xff] %v1076_v61 }
  0x53   :  { %1205 = vst [vmem:[#allocation11 + $0x38] sm:$0xff] %v1077_v62  ;;  %v1094_v24 = vadd.f32 %v966_v59, %v838_v63  ;;  %v1095_v25 = vadd.f32 %v967_v60, %v839_v16  ;;  %v822_v26 = vmul.f32 0.999, %v694_v20  ;;  %v823_v27 = vmul.f32 0.999, %v695_v21  ;;  %v200_v29 = vld [vmem:[%s4260_s28 + $0xd8] sm:$0xff] }
  0x54   :  { %v357_v30 = vpack.c.bf16 %v200_v29, %v199_v28  ;;  %v712_v31 = vld [vmem:[#allocation6 + $0xd0] sm:$0xff]  ;;  %v713_v32 = vld [vmem:[#allocation6 + $0xd8] sm:$0xff]  ;;  %v968_v33 = vmul.f32 0.001, %v199_v28  ;;  %v969_v34 = vmul.f32 0.001, %v200_v29 }
  0x55   :  { %2360 = vmatpush3.bf16.msra.mxu1 %v348_v19  ;;  %1222 = vst [vmem:[#allocation11 + $0xc0] sm:$0xff] %v1094_v24  ;;  %1223 = vst [vmem:[#allocation11 + $0xc8] sm:$0xff] %v1095_v25  ;;  %v1078_v35 = vadd.f32 %v950_v22, %v822_v26  ;;  %v1079_v36 = vadd.f32 %v951_v23, %v823_v27  ;;  %v840_v37 = vmul.f32 0.999, %v712_v31  ;;  %v841_v38 = vmul.f32 0.999, %v713_v32 }
  0x56   :  { %v183_v39 = vld [vmem:[%s4260_s28 + $0x50] sm:$0xff]  ;;  %v184_v40 = vld [vmem:[%s4260_s28 + $0x58] sm:$0xff]  ;;  %2361 = vmatprep.subr.bf16.mxu1 %v357_v30  ;;  %v697_v43 = vld [vmem:[#allocation6 + $0x58] sm:$0xff]  ;;  %vm1536_vm2 = vcmask 516096   ;;  %vm2078_vm3 = vcmask 7168  }
  0x57   :  { %v349_v41 = vpack.c.bf16 %v184_v40, %v183_v39  ;;  %v696_v42 = vld [vmem:[#allocation6 + $0x50] sm:$0xff]  ;;  %v952_v44 = vmul.f32 0.001, %v183_v39  ;;  %v953_v45 = vmul.f32 0.001, %v184_v40  ;;  %1206 = vst [vmem:[#allocation11 + $0x40] sm:$0xff] %v1078_v35  ;;  %v1096_v46 = vadd.f32 %v968_v33, %v840_v37 }
  0x58   :  { %1207 = vst [vmem:[#allocation11 + $0x48] sm:$0xff] %v1079_v36  ;;  %v1097_v47 = vadd.f32 %v969_v34, %v841_v38  ;;  %v824_v48 = vmul.f32 0.999, %v696_v42  ;;  %v825_v49 = vmul.f32 0.999, %v697_v43  ;;  %v201_v50 = vld [vmem:[%s4260_s28 + $0xe0] sm:$0xff] }
  0x59   :  { %v202_v51 = vld [vmem:[%s4260_s28 + $0xe8] sm:$0xff]  ;;  %2362 = vmatpush3.bf16.msra.mxu1 %v349_v41  ;;  %v715_v54 = vld [vmem:[#allocation6 + $0xe8] sm:$0xff]  ;;  %v970_v55 = vmul.f32 0.001, %v201_v50  ;;  %1224 = vst [vmem:[#allocation11 + $0xd0] sm:$0xff] %v1096_v46  ;;  %v185_v61 = vld [vmem:[%s4260_s28 + $0x60] sm:$0xff] }
  0x5a   :  { %v358_v52 = vpack.c.bf16 %v202_v51, %v201_v50  ;;  %v714_v53 = vld [vmem:[#allocation6 + $0xe0] sm:$0xff]  ;;  %v971_v56 = vmul.f32 0.001, %v202_v51  ;;  %1225 = vst [vmem:[#allocation11 + $0xd8] sm:$0xff] %v1097_v47  ;;  %v1080_v57 = vadd.f32 %v952_v44, %v824_v48  ;;  %v1081_v58 = vadd.f32 %v953_v45, %v825_v49  ;;  %v699_v17 = vld [vmem:[#allocation6 + $0x68] sm:$0xff]  ;;  %v204_v25 = vld [vmem:[%s4260_s28 + $0xf8] sm:$0xff] }
  0x5b   :  { %v842_v59 = vmul.f32 0.999, %v714_v53  ;;  %v843_v60 = vmul.f32 0.999, %v715_v54  ;;  %v186_v62 = vld [vmem:[%s4260_s28 + $0x68] sm:$0xff]  ;;  %v203_v24 = vld [vmem:[%s4260_s28 + $0xf0] sm:$0xff] }
  0x5c   :  { %2363 = vmatprep.subr.bf16.mxu1 %v358_v52  ;;  %v350_v63 = vpack.c.bf16 %v186_v62, %v185_v61  ;;  %v698_v16 = vld [vmem:[#allocation6 + $0x60] sm:$0xff]  ;;  %v954_v18 = vmul.f32 0.001, %v185_v61  ;;  %v955_v19 = vmul.f32 0.001, %v186_v62  ;;  %1208 = vst [vmem:[#allocation11 + $0x50] sm:$0xff] %v1080_v57  ;;  %v359_v26 = vpack.c.bf16 %v204_v25, %v203_v24 }
  0x5d   :  { %1209 = vst [vmem:[#allocation11 + $0x58] sm:$0xff] %v1081_v58  ;;  %v1098_v20 = vadd.f32 %v970_v55, %v842_v59  ;;  %v1099_v21 = vadd.f32 %v971_v56, %v843_v60  ;;  %v826_v22 = vmul.f32 0.999, %v698_v16  ;;  %v827_v23 = vmul.f32 0.999, %v699_v17  ;;  %v716_v27 = vld [vmem:[#allocation6 + $0xf0] sm:$0xff] }
  0x5e   :  { %2364 = vmatpush3.bf16.msra.mxu1 %v350_v63  ;;  %v717_v28 = vld [vmem:[#allocation6 + $0xf8] sm:$0xff]  ;;  %v972_v29 = vmul.f32 0.001, %v203_v24  ;;  %v973_v30 = vmul.f32 0.001, %v204_v25  ;;  %v187_v35 = vld [vmem:[%s4260_s28 + $0x70] sm:$0xff] }
  0x5f   :  { %1226 = vst [vmem:[#allocation11 + $0xe0] sm:$0xff] %v1098_v20  ;;  %1227 = vst [vmem:[#allocation11 + $0xe8] sm:$0xff] %v1099_v21  ;;  %v1082_v31 = vadd.f32 %v954_v18, %v826_v22  ;;  %v1083_v32 = vadd.f32 %v955_v19, %v827_v23  ;;  %v844_v33 = vmul.f32 0.999, %v716_v27  ;;  %v845_v34 = vmul.f32 0.999, %v717_v28  ;;  %2365 = vmatprep.subr.bf16.mxu1 %v359_v26 }
  0x60   :  { %v188_v36 = vld [vmem:[%s4260_s28 + $0x78] sm:$0xff]  ;;  %v701_v39 = vld [vmem:[#allocation6 + $0x78] sm:$0xff]  ;;  %v956_v40 = vmul.f32 0.001, %v187_v35  ;;  %v166_v46 = vld [vmem:[%s4261_s15 + $0x8] sm:$0xff] }
  0x61   :  { %v351_v37 = vpack.c.bf16 %v188_v36, %v187_v35  ;;  %v700_v38 = vld [vmem:[#allocation6 + $0x70] sm:$0xff]  ;;  %v957_v41 = vmul.f32 0.001, %v188_v36  ;;  %1210 = vst [vmem:[#allocation11 + $0x60] sm:$0xff] %v1082_v31  ;;  %1211 = vst [vmem:[#allocation11 + $0x68] sm:$0xff] %v1083_v32  ;;  %v1100_v42 = vadd.f32 %v972_v29, %v844_v33  ;;  %v1101_v43 = vadd.f32 %v973_v30, %v845_v34  ;;  %v165_v47 = vld [vmem:[%s4261_s15] sm:$0xff] }
  0x62   :  { %v828_v44 = vmul.f32 0.999, %v700_v38  ;;  %v829_v45 = vmul.f32 0.999, %v701_v39  ;;  %v337_v48 = vpack.c.bf16 %v166_v46, %v166_v46  ;;  %v336_v49 = vpack.c.bf16 %v165_v47, %v165_v47  ;;  %v221_v50 = vld [vmem:[%s4260_s28 + $0x180] sm:$0xff]  ;;  %v222_v51 = vld [vmem:[%s4260_s28 + $0x188] sm:$0xff] }
  0x63   :  { %2366 = vmatpush3.bf16.msra.mxu1 %v351_v37  ;;  %v734_v52 = vld [vmem:[#allocation6 + $0x180] sm:$0xff]  ;;  %1228 = vst [vmem:[#allocation11 + $0xf0] sm:$0xff] %v1100_v42  ;;  %1229 = vst [vmem:[#allocation11 + $0xf8] sm:$0xff] %v1101_v43  ;;  %v368_v55 = vpack.c.bf16 %v222_v51, %v221_v50  ;;  %v735_v56 = vld [vmem:[#allocation6 + $0x188] sm:$0xff]  ;;  %v990_v61 = vmul.f32 0.001, %v221_v50 }
  0x64   :  { %v1084_v53 = vadd.f32 %v956_v40, %v828_v44  ;;  %v1085_v54 = vadd.f32 %v957_v41, %v829_v45  ;;  %v862_v57 = vmul.f32 0.999, %v734_v52  ;;  %v205_v58 = vld [vmem:[%s4260_s28 + $0x100] sm:$0xff]  ;;  %v206_v59 = vld [vmem:[%s4260_s28 + $0x108] sm:$0xff]  ;;  %446 = vmatprep.mubr.bf16.mxu1 %v337_v48  ;;  %v863_v60 = vmul.f32 0.999, %v735_v56 }
  0x65   :  { %v991_v62 = vmul.f32 0.001, %v222_v51  ;;  %v360_v63 = vpack.c.bf16 %v206_v59, %v205_v58  ;;  %2373 = vmatprep.subr.bf16.mxu1 %v368_v55  ;;  %v718_v16 = vld [vmem:[#allocation6 + $0x100] sm:$0xff]  ;;  %v719_v17 = vld [vmem:[#allocation6 + $0x108] sm:$0xff]  ;;  %v974_v18 = vmul.f32 0.001, %v205_v58 }
  0x66   :  { %1212 = vst [vmem:[#allocation11 + $0x70] sm:$0xff] %v1084_v53  ;;  %1213 = vst [vmem:[#allocation11 + $0x78] sm:$0xff] %v1085_v54  ;;  %447 = vmatmul.mubr.bf16.vlgmr.msra.gmra.mrb[0].mxu1 %v336_v49  ;;  %v975_v19 = vmul.f32 0.001, %v206_v59  ;;  %v1118_v20 = vadd.f32 %v990_v61, %v862_v57  ;;  %v846_v22 = vmul.f32 0.999, %v718_v16 }
  0x67   :  { %v1119_v21 = vadd.f32 %v991_v62, %v863_v60  ;;  %2374 = vmatpush3.bf16.msra.mxu1 %v360_v63  ;;  %v847_v23 = vmul.f32 0.999, %v719_v17  ;;  %v253_v24 = vld [vmem:[%s4260_s28 + $0x280] sm:$0xff]  ;;  %v254_v25 = vld [vmem:[%s4260_s28 + $0x288] sm:$0xff]  ;;  %v767_v28 = vld [vmem:[#allocation6 + $0x288] sm:$0xff] }
  0x68   :  { %v384_v26 = vpack.c.bf16 %v254_v25, %v253_v24  ;;  %v766_v27 = vld [vmem:[#allocation6 + $0x280] sm:$0xff]  ;;  %v1022_v29 = vmul.f32 0.001, %v253_v24  ;;  %v1023_v30 = vmul.f32 0.001, %v254_v25  ;;  %1246 = vst [vmem:[#allocation11 + $0x180] sm:$0xff] %v1118_v20  ;;  %v1102_v31 = vadd.f32 %v974_v18, %v846_v22 }
  0x69   :  { %1247 = vst [vmem:[#allocation11 + $0x188] sm:$0xff] %v1119_v21  ;;  %v1103_v32 = vadd.f32 %v975_v19, %v847_v23  ;;  %v894_v33 = vmul.f32 0.999, %v766_v27  ;;  %v895_v34 = vmul.f32 0.999, %v767_v28  ;;  %v237_v35 = vld [vmem:[%s4260_s28 + $0x200] sm:$0xff] }
  0x6a   :  { %v238_v36 = vld [vmem:[%s4260_s28 + $0x208] sm:$0xff]  ;;  %2395 = vmatprep.subr.bf16.mxu0 %v384_v26  ;;  %v751_v39 = vld [vmem:[#allocation6 + $0x208] sm:$0xff]  ;;  %v1006_v40 = vmul.f32 0.001, %v237_v35  ;;  %1230 = vst [vmem:[#allocation11 + $0x100] sm:$0xff] %v1102_v31  ;;  %v224_v47 = vld [vmem:[%s4260_s28 + $0x198] sm:$0xff] }
  0x6b   :  { %v376_v37 = vpack.c.bf16 %v238_v36, %v237_v35  ;;  %v750_v38 = vld [vmem:[#allocation6 + $0x200] sm:$0xff]  ;;  %v1007_v41 = vmul.f32 0.001, %v238_v36  ;;  %1231 = vst [vmem:[#allocation11 + $0x108] sm:$0xff] %v1103_v32  ;;  %v1150_v42 = vadd.f32 %v1022_v29, %v894_v33  ;;  %v1151_v43 = vadd.f32 %v1023_v30, %v895_v34  ;;  %v223_v46 = vld [vmem:[%s4260_s28 + $0x190] sm:$0xff]  ;;  %v736_v49 = vld [vmem:[#allocation6 + $0x190] sm:$0xff] }
  0x6c   :  { %v878_v44 = vmul.f32 0.999, %v750_v38  ;;  %v879_v45 = vmul.f32 0.999, %v751_v39  ;;  %v369_v48 = vpack.c.bf16 %v224_v47, %v223_v46  ;;  %v737_v50 = vld [vmem:[#allocation6 + $0x198] sm:$0xff]  ;;  %v207_v57 = vld [vmem:[%s4260_s28 + $0x110] sm:$0xff] }
  0x6d   :  { %2396 = vmatpush3.bf16.msra.mxu0 %v376_v37  ;;  %v992_v51 = vmul.f32 0.001, %v223_v46  ;;  %v993_v52 = vmul.f32 0.001, %v224_v47  ;;  %1278 = vst [vmem:[#allocation11 + $0x280] sm:$0xff] %v1150_v42  ;;  %1279 = vst [vmem:[#allocation11 + $0x288] sm:$0xff] %v1151_v43 }
  0x6e   :  { %v1134_v53 = vadd.f32 %v1006_v40, %v878_v44  ;;  %v1135_v54 = vadd.f32 %v1007_v41, %v879_v45  ;;  %v864_v55 = vmul.f32 0.999, %v736_v49  ;;  %v865_v56 = vmul.f32 0.999, %v737_v50  ;;  %v208_v58 = vld [vmem:[%s4260_s28 + $0x118] sm:$0xff]  ;;  %2375 = vmatprep.subr.bf16.mxu1 %v369_v48  ;;  %v721_v61 = vld [vmem:[#allocation6 + $0x118] sm:$0xff] }
  0x6f   :  { %v361_v59 = vpack.c.bf16 %v208_v58, %v207_v57  ;;  %v720_v60 = vld [vmem:[#allocation6 + $0x110] sm:$0xff]  ;;  %v976_v62 = vmul.f32 0.001, %v207_v57  ;;  %v977_v63 = vmul.f32 0.001, %v208_v58  ;;  %v255_v20 = vld [vmem:[%s4260_s28 + $0x290] sm:$0xff] }
  0x70   :  { %1262 = vst [vmem:[#allocation11 + $0x200] sm:$0xff] %v1134_v53  ;;  %1263 = vst [vmem:[#allocation11 + $0x208] sm:$0xff] %v1135_v54  ;;  %v1120_v16 = vadd.f32 %v992_v51, %v864_v55  ;;  %v1121_v17 = vadd.f32 %v993_v52, %v865_v56  ;;  %v848_v18 = vmul.f32 0.999, %v720_v60  ;;  %v849_v19 = vmul.f32 0.999, %v721_v61 }
  0x71   :  { %v256_v21 = vld [vmem:[%s4260_s28 + $0x298] sm:$0xff]  ;;  %2376 = vmatpush3.bf16.msra.mxu1 %v361_v59  ;;  %v769_v24 = vld [vmem:[#allocation6 + $0x298] sm:$0xff]  ;;  %v1024_v25 = vmul.f32 0.001, %v255_v20  ;;  %v239_v31 = vld [vmem:[%s4260_s28 + $0x210] sm:$0xff] }
  0x72   :  { %v385_v22 = vpack.c.bf16 %v256_v21, %v255_v20  ;;  %v768_v23 = vld [vmem:[#allocation6 + $0x290] sm:$0xff]  ;;  %v1025_v26 = vmul.f32 0.001, %v256_v21  ;;  %1248 = vst [vmem:[#allocation11 + $0x190] sm:$0xff] %v1120_v16  ;;  %1249 = vst [vmem:[#allocation11 + $0x198] sm:$0xff] %v1121_v17  ;;  %v1104_v27 = vadd.f32 %v976_v62, %v848_v18  ;;  %v1105_v28 = vadd.f32 %v977_v63, %v849_v19  ;;  %v753_v35 = vld [vmem:[#allocation6 + $0x218] sm:$0xff] }
  0x73   :  { %v896_v29 = vmul.f32 0.999, %v768_v23  ;;  %v897_v30 = vmul.f32 0.999, %v769_v24  ;;  %v240_v32 = vld [vmem:[%s4260_s28 + $0x218] sm:$0xff]  ;;  %v225_v42 = vld [vmem:[%s4260_s28 + $0x1a0] sm:$0xff] }
  0x74   :  { %2397 = vmatprep.subr.bf16.mxu0 %v385_v22  ;;  %v377_v33 = vpack.c.bf16 %v240_v32, %v239_v31  ;;  %v752_v34 = vld [vmem:[#allocation6 + $0x210] sm:$0xff]  ;;  %v1008_v36 = vmul.f32 0.001, %v239_v31  ;;  %v1009_v37 = vmul.f32 0.001, %v240_v32  ;;  %1232 = vst [vmem:[#allocation11 + $0x110] sm:$0xff] %v1104_v27 }
  0x75   :  { %1233 = vst [vmem:[#allocation11 + $0x118] sm:$0xff] %v1105_v28  ;;  %v1152_v38 = vadd.f32 %v1024_v25, %v896_v29  ;;  %v1153_v39 = vadd.f32 %v1025_v26, %v897_v30  ;;  %v880_v40 = vmul.f32 0.999, %v752_v34  ;;  %v881_v41 = vmul.f32 0.999, %v753_v35  ;;  %v226_v43 = vld [vmem:[%s4260_s28 + $0x1a8] sm:$0xff] }
  0x76   :  { %2398 = vmatpush3.bf16.msra.mxu0 %v377_v33  ;;  %v370_v44 = vpack.c.bf16 %v226_v43, %v225_v42  ;;  %v738_v45 = vld [vmem:[#allocation6 + $0x1a0] sm:$0xff]  ;;  %v739_v46 = vld [vmem:[#allocation6 + $0x1a8] sm:$0xff]  ;;  %v994_v47 = vmul.f32 0.001, %v225_v42  ;;  %v995_v48 = vmul.f32 0.001, %v226_v43 }
  0x77   :  { %1280 = vst [vmem:[#allocation11 + $0x290] sm:$0xff] %v1152_v38  ;;  %1281 = vst [vmem:[#allocation11 + $0x298] sm:$0xff] %v1153_v39  ;;  %v1136_v49 = vadd.f32 %v1008_v36, %v880_v40  ;;  %v1137_v50 = vadd.f32 %v1009_v37, %v881_v41  ;;  %v866_v51 = vmul.f32 0.999, %v738_v45  ;;  %v867_v52 = vmul.f32 0.999, %v739_v46 }
  0x78   :  { %v209_v53 = vld [vmem:[%s4260_s28 + $0x120] sm:$0xff]  ;;  %v210_v54 = vld [vmem:[%s4260_s28 + $0x128] sm:$0xff]  ;;  %2377 = vmatprep.subr.bf16.mxu1 %v370_v44  ;;  %v723_v57 = vld [vmem:[#allocation6 + $0x128] sm:$0xff] }
  0x79   :  { %v362_v55 = vpack.c.bf16 %v210_v54, %v209_v53  ;;  %v722_v56 = vld [vmem:[#allocation6 + $0x120] sm:$0xff]  ;;  %v978_v58 = vmul.f32 0.001, %v209_v53  ;;  %v979_v59 = vmul.f32 0.001, %v210_v54  ;;  %1264 = vst [vmem:[#allocation11 + $0x210] sm:$0xff] %v1136_v49  ;;  %v1122_v60 = vadd.f32 %v994_v47, %v866_v51 }
  0x7a   :  { %1265 = vst [vmem:[#allocation11 + $0x218] sm:$0xff] %v1137_v50  ;;  %v1123_v61 = vadd.f32 %v995_v48, %v867_v52  ;;  %v850_v62 = vmul.f32 0.999, %v722_v56  ;;  %v851_v63 = vmul.f32 0.999, %v723_v57  ;;  %v257_v16 = vld [vmem:[%s4260_s28 + $0x2a0] sm:$0xff] }
  0x7b   :  { %v258_v17 = vld [vmem:[%s4260_s28 + $0x2a8] sm:$0xff]  ;;  %2378 = vmatpush3.bf16.msra.mxu1 %v362_v55  ;;  %v771_v20 = vld [vmem:[#allocation6 + $0x2a8] sm:$0xff]  ;;  %v1026_v21 = vmul.f32 0.001, %v257_v16  ;;  %1250 = vst [vmem:[#allocation11 + $0x1a0] sm:$0xff] %v1122_v60  ;;  %v241_v27 = vld [vmem:[%s4260_s28 + $0x220] sm:$0xff] }
  0x7c   :  { %v386_v18 = vpack.c.bf16 %v258_v17, %v257_v16  ;;  %v770_v19 = vld [vmem:[#allocation6 + $0x2a0] sm:$0xff]  ;;  %v1027_v22 = vmul.f32 0.001, %v258_v17  ;;  %1251 = vst [vmem:[#allocation11 + $0x1a8] sm:$0xff] %v1123_v61  ;;  %v1106_v23 = vadd.f32 %v978_v58, %v850_v62  ;;  %v1107_v24 = vadd.f32 %v979_v59, %v851_v63  ;;  %v755_v31 = vld [vmem:[#allocation6 + $0x228] sm:$0xff]  ;;  %v228_v39 = vld [vmem:[%s4260_s28 + $0x1b8] sm:$0xff] }
  0x7d   :  { %v898_v25 = vmul.f32 0.999, %v770_v19  ;;  %v899_v26 = vmul.f32 0.999, %v771_v20  ;;  %v242_v28 = vld [vmem:[%s4260_s28 + $0x228] sm:$0xff]  ;;  %v227_v38 = vld [vmem:[%s4260_s28 + $0x1b0] sm:$0xff] }
  0x7e   :  { %2399 = vmatprep.subr.bf16.mxu0 %v386_v18  ;;  %v378_v29 = vpack.c.bf16 %v242_v28, %v241_v27  ;;  %v754_v30 = vld [vmem:[#allocation6 + $0x220] sm:$0xff]  ;;  %v1010_v32 = vmul.f32 0.001, %v241_v27  ;;  %v1011_v33 = vmul.f32 0.001, %v242_v28  ;;  %1234 = vst [vmem:[#allocation11 + $0x120] sm:$0xff] %v1106_v23  ;;  %v371_v40 = vpack.c.bf16 %v228_v39, %v227_v38 }
  0x7f   :  { %1235 = vst [vmem:[#allocation11 + $0x128] sm:$0xff] %v1107_v24  ;;  %v1154_v34 = vadd.f32 %v1026_v21, %v898_v25  ;;  %v1155_v35 = vadd.f32 %v1027_v22, %v899_v26  ;;  %v882_v36 = vmul.f32 0.999, %v754_v30  ;;  %v883_v37 = vmul.f32 0.999, %v755_v31  ;;  %v740_v41 = vld [vmem:[#allocation6 + $0x1b0] sm:$0xff] }
  0x80   :  { %2400 = vmatpush3.bf16.msra.mxu0 %v378_v29  ;;  %v741_v42 = vld [vmem:[#allocation6 + $0x1b8] sm:$0xff]  ;;  %v996_v43 = vmul.f32 0.001, %v227_v38  ;;  %v997_v44 = vmul.f32 0.001, %v228_v39  ;;  %v211_v49 = vld [vmem:[%s4260_s28 + $0x130] sm:$0xff]  ;;  %2379 = vmatprep.subr.bf16.mxu1 %v371_v40 }
  0x81   :  { %1282 = vst [vmem:[#allocation11 + $0x2a0] sm:$0xff] %v1154_v34  ;;  %1283 = vst [vmem:[#allocation11 + $0x2a8] sm:$0xff] %v1155_v35  ;;  %v1138_v45 = vadd.f32 %v1010_v32, %v882_v36  ;;  %v1139_v46 = vadd.f32 %v1011_v33, %v883_v37  ;;  %v868_v47 = vmul.f32 0.999, %v740_v41  ;;  %v869_v48 = vmul.f32 0.999, %v741_v42 }
  0x82   :  { %v212_v50 = vld [vmem:[%s4260_s28 + $0x138] sm:$0xff]  ;;  %v725_v53 = vld [vmem:[#allocation6 + $0x138] sm:$0xff]  ;;  %v980_v54 = vmul.f32 0.001, %v211_v49  ;;  %v259_v60 = vld [vmem:[%s4260_s28 + $0x2b0] sm:$0xff] }
  0x83   :  { %v363_v51 = vpack.c.bf16 %v212_v50, %v211_v49  ;;  %v724_v52 = vld [vmem:[#allocation6 + $0x130] sm:$0xff]  ;;  %v981_v55 = vmul.f32 0.001, %v212_v50  ;;  %1266 = vst [vmem:[#allocation11 + $0x220] sm:$0xff] %v1138_v45  ;;  %1267 = vst [vmem:[#allocation11 + $0x228] sm:$0xff] %v1139_v46  ;;  %v1124_v56 = vadd.f32 %v996_v43, %v868_v47  ;;  %v1125_v57 = vadd.f32 %v997_v44, %v869_v48  ;;  %v773_v16 = vld [vmem:[#allocation6 + $0x2b8] sm:$0xff] }
  0x84   :  { %v852_v58 = vmul.f32 0.999, %v724_v52  ;;  %v853_v59 = vmul.f32 0.999, %v725_v53  ;;  %v260_v61 = vld [vmem:[%s4260_s28 + $0x2b8] sm:$0xff]  ;;  %v243_v23 = vld [vmem:[%s4260_s28 + $0x230] sm:$0xff] }
  0x85   :  { %2380 = vmatpush3.bf16.msra.mxu1 %v363_v51  ;;  %v387_v62 = vpack.c.bf16 %v260_v61, %v259_v60  ;;  %v772_v63 = vld [vmem:[#allocation6 + $0x2b0] sm:$0xff]  ;;  %v1028_v17 = vmul.f32 0.001, %v259_v60  ;;  %v1029_v18 = vmul.f32 0.001, %v260_v61  ;;  %1252 = vst [vmem:[#allocation11 + $0x1b0] sm:$0xff] %v1124_v56 }
  0x86   :  { %1253 = vst [vmem:[#allocation11 + $0x1b8] sm:$0xff] %v1125_v57  ;;  %v1108_v19 = vadd.f32 %v980_v54, %v852_v58  ;;  %v1109_v20 = vadd.f32 %v981_v55, %v853_v59  ;;  %v900_v21 = vmul.f32 0.999, %v772_v63  ;;  %v901_v22 = vmul.f32 0.999, %v773_v16  ;;  %v244_v24 = vld [vmem:[%s4260_s28 + $0x238] sm:$0xff] }
  0x87   :  { %2401 = vmatprep.subr.bf16.mxu0 %v387_v62  ;;  %v379_v25 = vpack.c.bf16 %v244_v24, %v243_v23  ;;  %v756_v26 = vld [vmem:[#allocation6 + $0x230] sm:$0xff]  ;;  %v757_v27 = vld [vmem:[#allocation6 + $0x238] sm:$0xff]  ;;  %v1012_v28 = vmul.f32 0.001, %v243_v23  ;;  %v1013_v29 = vmul.f32 0.001, %v244_v24 }
  0x88   :  { %1236 = vst [vmem:[#allocation11 + $0x130] sm:$0xff] %v1108_v19  ;;  %1237 = vst [vmem:[#allocation11 + $0x138] sm:$0xff] %v1109_v20  ;;  %v1156_v30 = vadd.f32 %v1028_v17, %v900_v21  ;;  %v1157_v31 = vadd.f32 %v1029_v18, %v901_v22  ;;  %v884_v32 = vmul.f32 0.999, %v756_v26  ;;  %v885_v33 = vmul.f32 0.999, %v757_v27 }
  0x89   :  { %v229_v34 = vld [vmem:[%s4260_s28 + $0x1c0] sm:$0xff]  ;;  %v230_v35 = vld [vmem:[%s4260_s28 + $0x1c8] sm:$0xff]  ;;  %2402 = vmatpush3.bf16.msra.mxu0 %v379_v25  ;;  %v743_v38 = vld [vmem:[#allocation6 + $0x1c8] sm:$0xff] }
  0x8a   :  { %v372_v36 = vpack.c.bf16 %v230_v35, %v229_v34  ;;  %v742_v37 = vld [vmem:[#allocation6 + $0x1c0] sm:$0xff]  ;;  %v998_v39 = vmul.f32 0.001, %v229_v34  ;;  %v999_v40 = vmul.f32 0.001, %v230_v35  ;;  %1284 = vst [vmem:[#allocation11 + $0x2b0] sm:$0xff] %v1156_v30  ;;  %v1140_v41 = vadd.f32 %v1012_v28, %v884_v32 }
  0x8b   :  { %1285 = vst [vmem:[#allocation11 + $0x2b8] sm:$0xff] %v1157_v31  ;;  %v1141_v42 = vadd.f32 %v1013_v29, %v885_v33  ;;  %v870_v43 = vmul.f32 0.999, %v742_v37  ;;  %v871_v44 = vmul.f32 0.999, %v743_v38  ;;  %v213_v45 = vld [vmem:[%s4260_s28 + $0x140] sm:$0xff] }
  0x8c   :  { %v214_v46 = vld [vmem:[%s4260_s28 + $0x148] sm:$0xff]  ;;  %2381 = vmatprep.subr.bf16.mxu1 %v372_v36  ;;  %v727_v49 = vld [vmem:[#allocation6 + $0x148] sm:$0xff]  ;;  %v982_v50 = vmul.f32 0.001, %v213_v45  ;;  %1268 = vst [vmem:[#allocation11 + $0x230] sm:$0xff] %v1140_v41  ;;  %v261_v56 = vld [vmem:[%s4260_s28 + $0x2c0] sm:$0xff] }
  0x8d   :  { %v364_v47 = vpack.c.bf16 %v214_v46, %v213_v45  ;;  %v726_v48 = vld [vmem:[#allocation6 + $0x140] sm:$0xff]  ;;  %v983_v51 = vmul.f32 0.001, %v214_v46  ;;  %1269 = vst [vmem:[#allocation11 + $0x238] sm:$0xff] %v1141_v42  ;;  %v1126_v52 = vadd.f32 %v998_v39, %v870_v43  ;;  %v1127_v53 = vadd.f32 %v999_v40, %v871_v44  ;;  %v775_v60 = vld [vmem:[#allocation6 + $0x2c8] sm:$0xff]  ;;  %v245_v19 = vld [vmem:[%s4260_s28 + $0x240] sm:$0xff] }
  0x8e   :  { %v854_v54 = vmul.f32 0.999, %v726_v48  ;;  %v855_v55 = vmul.f32 0.999, %v727_v49  ;;  %v262_v57 = vld [vmem:[%s4260_s28 + $0x2c8] sm:$0xff]  ;;  %v759_v23 = vld [vmem:[#allocation6 + $0x248] sm:$0xff] }
  0x8f   :  { %2382 = vmatpush3.bf16.msra.mxu1 %v364_v47  ;;  %v388_v58 = vpack.c.bf16 %v262_v57, %v261_v56  ;;  %v774_v59 = vld [vmem:[#allocation6 + $0x2c0] sm:$0xff]  ;;  %v1030_v61 = vmul.f32 0.001, %v261_v56  ;;  %v1031_v62 = vmul.f32 0.001, %v262_v57  ;;  %1254 = vst [vmem:[#allocation11 + $0x1c0] sm:$0xff] %v1126_v52 }
  0x90   :  { %1255 = vst [vmem:[#allocation11 + $0x1c8] sm:$0xff] %v1127_v53  ;;  %v1110_v63 = vadd.f32 %v982_v50, %v854_v54  ;;  %v1111_v16 = vadd.f32 %v983_v51, %v855_v55  ;;  %v902_v17 = vmul.f32 0.999, %v774_v59  ;;  %v903_v18 = vmul.f32 0.999, %v775_v60  ;;  %v246_v20 = vld [vmem:[%s4260_s28 + $0x248] sm:$0xff] }
  0x91   :  { %2403 = vmatprep.subr.bf16.mxu0 %v388_v58  ;;  %v380_v21 = vpack.c.bf16 %v246_v20, %v245_v19  ;;  %v758_v22 = vld [vmem:[#allocation6 + $0x240] sm:$0xff]  ;;  %v1014_v24 = vmul.f32 0.001, %v245_v19  ;;  %v1015_v25 = vmul.f32 0.001, %v246_v20  ;;  %v231_v30 = vld [vmem:[%s4260_s28 + $0x1d0] sm:$0xff] }
  0x92   :  { %1238 = vst [vmem:[#allocation11 + $0x140] sm:$0xff] %v1110_v63  ;;  %1239 = vst [vmem:[#allocation11 + $0x148] sm:$0xff] %v1111_v16  ;;  %v1158_v26 = vadd.f32 %v1030_v61, %v902_v17  ;;  %v1159_v27 = vadd.f32 %v1031_v62, %v903_v18  ;;  %v886_v28 = vmul.f32 0.999, %v758_v22  ;;  %v887_v29 = vmul.f32 0.999, %v759_v23 }
  0x93   :  { %v232_v31 = vld [vmem:[%s4260_s28 + $0x1d8] sm:$0xff]  ;;  %2404 = vmatpush3.bf16.msra.mxu0 %v380_v21  ;;  %v745_v34 = vld [vmem:[#allocation6 + $0x1d8] sm:$0xff]  ;;  %v1000_v35 = vmul.f32 0.001, %v231_v30  ;;  %v215_v41 = vld [vmem:[%s4260_s28 + $0x150] sm:$0xff] }
  0x94   :  { %v373_v32 = vpack.c.bf16 %v232_v31, %v231_v30  ;;  %v744_v33 = vld [vmem:[#allocation6 + $0x1d0] sm:$0xff]  ;;  %v1001_v36 = vmul.f32 0.001, %v232_v31  ;;  %1286 = vst [vmem:[#allocation11 + $0x2c0] sm:$0xff] %v1158_v26  ;;  %1287 = vst [vmem:[#allocation11 + $0x2c8] sm:$0xff] %v1159_v27  ;;  %v1142_v37 = vadd.f32 %v1014_v24, %v886_v28  ;;  %v1143_v38 = vadd.f32 %v1015_v25, %v887_v29  ;;  %v729_v45 = vld [vmem:[#allocation6 + $0x158] sm:$0xff] }
  0x95   :  { %v872_v39 = vmul.f32 0.999, %v744_v33  ;;  %v873_v40 = vmul.f32 0.999, %v745_v34  ;;  %v216_v42 = vld [vmem:[%s4260_s28 + $0x158] sm:$0xff]  ;;  %v263_v52 = vld [vmem:[%s4260_s28 + $0x2d0] sm:$0xff] }
  0x96   :  { %2383 = vmatprep.subr.bf16.mxu1 %v373_v32  ;;  %v365_v43 = vpack.c.bf16 %v216_v42, %v215_v41  ;;  %v728_v44 = vld [vmem:[#allocation6 + $0x150] sm:$0xff]  ;;  %v984_v46 = vmul.f32 0.001, %v215_v41  ;;  %v985_v47 = vmul.f32 0.001, %v216_v42  ;;  %1270 = vst [vmem:[#allocation11 + $0x240] sm:$0xff] %v1142_v37 }
  0x97   :  { %1271 = vst [vmem:[#allocation11 + $0x248] sm:$0xff] %v1143_v38  ;;  %v1128_v48 = vadd.f32 %v1000_v35, %v872_v39  ;;  %v1129_v49 = vadd.f32 %v1001_v36, %v873_v40  ;;  %v856_v50 = vmul.f32 0.999, %v728_v44  ;;  %v857_v51 = vmul.f32 0.999, %v729_v45  ;;  %v264_v53 = vld [vmem:[%s4260_s28 + $0x2d8] sm:$0xff] }
  0x98   :  { %2384 = vmatpush3.bf16.msra.mxu1 %v365_v43  ;;  %v389_v54 = vpack.c.bf16 %v264_v53, %v263_v52  ;;  %v776_v55 = vld [vmem:[#allocation6 + $0x2d0] sm:$0xff]  ;;  %v777_v56 = vld [vmem:[#allocation6 + $0x2d8] sm:$0xff]  ;;  %v1032_v57 = vmul.f32 0.001, %v263_v52  ;;  %v1033_v58 = vmul.f32 0.001, %v264_v53 }
  0x99   :  { %1256 = vst [vmem:[#allocation11 + $0x1d0] sm:$0xff] %v1128_v48  ;;  %1257 = vst [vmem:[#allocation11 + $0x1d8] sm:$0xff] %v1129_v49  ;;  %v1112_v59 = vadd.f32 %v984_v46, %v856_v50  ;;  %v1113_v60 = vadd.f32 %v985_v47, %v857_v51  ;;  %v904_v61 = vmul.f32 0.999, %v776_v55  ;;  %v905_v62 = vmul.f32 0.999, %v777_v56 }
  0x9a   :  { %v247_v63 = vld [vmem:[%s4260_s28 + $0x250] sm:$0xff]  ;;  %v248_v16 = vld [vmem:[%s4260_s28 + $0x258] sm:$0xff]  ;;  %2405 = vmatprep.subr.bf16.mxu0 %v389_v54  ;;  %v761_v19 = vld [vmem:[#allocation6 + $0x258] sm:$0xff] }
  0x9b   :  { %v381_v17 = vpack.c.bf16 %v248_v16, %v247_v63  ;;  %v760_v18 = vld [vmem:[#allocation6 + $0x250] sm:$0xff]  ;;  %v1016_v20 = vmul.f32 0.001, %v247_v63  ;;  %v1017_v21 = vmul.f32 0.001, %v248_v16  ;;  %1240 = vst [vmem:[#allocation11 + $0x150] sm:$0xff] %v1112_v59  ;;  %v1160_v22 = vadd.f32 %v1032_v57, %v904_v61 }
  0x9c   :  { %1241 = vst [vmem:[#allocation11 + $0x158] sm:$0xff] %v1113_v60  ;;  %v1161_v23 = vadd.f32 %v1033_v58, %v905_v62  ;;  %v888_v24 = vmul.f32 0.999, %v760_v18  ;;  %v889_v25 = vmul.f32 0.999, %v761_v19  ;;  %v233_v26 = vld [vmem:[%s4260_s28 + $0x1e0] sm:$0xff] }
  0x9d   :  { %v234_v27 = vld [vmem:[%s4260_s28 + $0x1e8] sm:$0xff]  ;;  %2406 = vmatpush3.bf16.msra.mxu0 %v381_v17  ;;  %v747_v30 = vld [vmem:[#allocation6 + $0x1e8] sm:$0xff]  ;;  %v1002_v31 = vmul.f32 0.001, %v233_v26  ;;  %1288 = vst [vmem:[#allocation11 + $0x2d0] sm:$0xff] %v1160_v22  ;;  %v217_v37 = vld [vmem:[%s4260_s28 + $0x160] sm:$0xff] }
  0x9e   :  { %v374_v28 = vpack.c.bf16 %v234_v27, %v233_v26  ;;  %v746_v29 = vld [vmem:[#allocation6 + $0x1e0] sm:$0xff]  ;;  %v1003_v32 = vmul.f32 0.001, %v234_v27  ;;  %1289 = vst [vmem:[#allocation11 + $0x2d8] sm:$0xff] %v1161_v23  ;;  %v1144_v33 = vadd.f32 %v1016_v20, %v888_v24  ;;  %v1145_v34 = vadd.f32 %v1017_v21, %v889_v25  ;;  %v731_v41 = vld [vmem:[#allocation6 + $0x168] sm:$0xff]  ;;  %v265_v48 = vld [vmem:[%s4260_s28 + $0x2e0] sm:$0xff] }
  0x9f   :  { %v874_v35 = vmul.f32 0.999, %v746_v29  ;;  %v875_v36 = vmul.f32 0.999, %v747_v30  ;;  %v218_v38 = vld [vmem:[%s4260_s28 + $0x168] sm:$0xff]  ;;  %v779_v52 = vld [vmem:[#allocation6 + $0x2e8] sm:$0xff] }
  0xa0   :  { %2385 = vmatprep.subr.bf16.mxu1 %v374_v28  ;;  %v366_v39 = vpack.c.bf16 %v218_v38, %v217_v37  ;;  %v730_v40 = vld [vmem:[#allocation6 + $0x160] sm:$0xff]  ;;  %v986_v42 = vmul.f32 0.001, %v217_v37  ;;  %v987_v43 = vmul.f32 0.001, %v218_v38  ;;  %1272 = vst [vmem:[#allocation11 + $0x250] sm:$0xff] %v1144_v33 }
  0xa1   :  { %1273 = vst [vmem:[#allocation11 + $0x258] sm:$0xff] %v1145_v34  ;;  %v1130_v44 = vadd.f32 %v1002_v31, %v874_v35  ;;  %v1131_v45 = vadd.f32 %v1003_v32, %v875_v36  ;;  %v858_v46 = vmul.f32 0.999, %v730_v40  ;;  %v859_v47 = vmul.f32 0.999, %v731_v41  ;;  %v266_v49 = vld [vmem:[%s4260_s28 + $0x2e8] sm:$0xff] }
  0xa2   :  { %2386 = vmatpush3.bf16.msra.mxu1 %v366_v39  ;;  %v390_v50 = vpack.c.bf16 %v266_v49, %v265_v48  ;;  %v778_v51 = vld [vmem:[#allocation6 + $0x2e0] sm:$0xff]  ;;  %v1034_v53 = vmul.f32 0.001, %v265_v48  ;;  %v1035_v54 = vmul.f32 0.001, %v266_v49  ;;  %v249_v59 = vld [vmem:[%s4260_s28 + $0x260] sm:$0xff] }
  0xa3   :  { %1258 = vst [vmem:[#allocation11 + $0x1e0] sm:$0xff] %v1130_v44  ;;  %1259 = vst [vmem:[#allocation11 + $0x1e8] sm:$0xff] %v1131_v45  ;;  %v1114_v55 = vadd.f32 %v986_v42, %v858_v46  ;;  %v1115_v56 = vadd.f32 %v987_v43, %v859_v47  ;;  %v906_v57 = vmul.f32 0.999, %v778_v51  ;;  %v907_v58 = vmul.f32 0.999, %v779_v52 }
  0xa4   :  { %v250_v60 = vld [vmem:[%s4260_s28 + $0x268] sm:$0xff]  ;;  %2407 = vmatprep.subr.bf16.mxu0 %v390_v50  ;;  %v763_v63 = vld [vmem:[#allocation6 + $0x268] sm:$0xff]  ;;  %v1018_v16 = vmul.f32 0.001, %v249_v59  ;;  %v236_v23 = vld [vmem:[%s4260_s28 + $0x1f8] sm:$0xff] }
  0xa5   :  { %v382_v61 = vpack.c.bf16 %v250_v60, %v249_v59  ;;  %v762_v62 = vld [vmem:[#allocation6 + $0x260] sm:$0xff]  ;;  %v1019_v17 = vmul.f32 0.001, %v250_v60  ;;  %1242 = vst [vmem:[#allocation11 + $0x160] sm:$0xff] %v1114_v55  ;;  %1243 = vst [vmem:[#allocation11 + $0x168] sm:$0xff] %v1115_v56  ;;  %v1162_v18 = vadd.f32 %v1034_v53, %v906_v57  ;;  %v1163_v19 = vadd.f32 %v1035_v54, %v907_v58  ;;  %v235_v22 = vld [vmem:[%s4260_s28 + $0x1f0] sm:$0xff] }
  0xa6   :  { %v890_v20 = vmul.f32 0.999, %v762_v62  ;;  %v891_v21 = vmul.f32 0.999, %v763_v63  ;;  %v375_v24 = vpack.c.bf16 %v236_v23, %v235_v22  ;;  %v748_v25 = vld [vmem:[#allocation6 + $0x1f0] sm:$0xff]  ;;  %v749_v26 = vld [vmem:[#allocation6 + $0x1f8] sm:$0xff] }
  0xa7   :  { %2408 = vmatpush3.bf16.msra.mxu0 %v382_v61  ;;  %v1004_v27 = vmul.f32 0.001, %v235_v22  ;;  %v1005_v28 = vmul.f32 0.001, %v236_v23  ;;  %1290 = vst [vmem:[#allocation11 + $0x2e0] sm:$0xff] %v1162_v18  ;;  %1291 = vst [vmem:[#allocation11 + $0x2e8] sm:$0xff] %v1163_v19 }
  0xa8   :  { %v1146_v29 = vadd.f32 %v1018_v16, %v890_v20  ;;  %v1147_v30 = vadd.f32 %v1019_v17, %v891_v21  ;;  %v876_v31 = vmul.f32 0.999, %v748_v25  ;;  %v877_v32 = vmul.f32 0.999, %v749_v26  ;;  %v219_v33 = vld [vmem:[%s4260_s28 + $0x170] sm:$0xff]  ;;  %v220_v34 = vld [vmem:[%s4260_s28 + $0x178] sm:$0xff]  ;;  %2387 = vmatprep.subr.bf16.mxu1 %v375_v24 }
  0xa9   :  { %v367_v35 = vpack.c.bf16 %v220_v34, %v219_v33  ;;  %v732_v36 = vld [vmem:[#allocation6 + $0x170] sm:$0xff]  ;;  %v733_v37 = vld [vmem:[#allocation6 + $0x178] sm:$0xff]  ;;  %v988_v38 = vmul.f32 0.001, %v219_v33  ;;  %v989_v39 = vmul.f32 0.001, %v220_v34 }
  0xaa   :  { %1274 = vst [vmem:[#allocation11 + $0x260] sm:$0xff] %v1146_v29  ;;  %1275 = vst [vmem:[#allocation11 + $0x268] sm:$0xff] %v1147_v30  ;;  %v1132_v40 = vadd.f32 %v1004_v27, %v876_v31  ;;  %v1133_v41 = vadd.f32 %v1005_v28, %v877_v32  ;;  %v860_v42 = vmul.f32 0.999, %v732_v36  ;;  %v861_v43 = vmul.f32 0.999, %v733_v37 }
  0xab   :  { %v267_v44 = vld [vmem:[%s4260_s28 + $0x2f0] sm:$0xff]  ;;  %v268_v45 = vld [vmem:[%s4260_s28 + $0x2f8] sm:$0xff]  ;;  %2388 = vmatpush3.bf16.msra.mxu1 %v367_v35  ;;  %v781_v48 = vld [vmem:[#allocation6 + $0x2f8] sm:$0xff] }
  0xac   :  { %v391_v46 = vpack.c.bf16 %v268_v45, %v267_v44  ;;  %v780_v47 = vld [vmem:[#allocation6 + $0x2f0] sm:$0xff]  ;;  %v1036_v49 = vmul.f32 0.001, %v267_v44  ;;  %v1037_v50 = vmul.f32 0.001, %v268_v45  ;;  %1260 = vst [vmem:[#allocation11 + $0x1f0] sm:$0xff] %v1132_v40  ;;  %v1116_v51 = vadd.f32 %v988_v38, %v860_v42 }
  0xad   :  { %1261 = vst [vmem:[#allocation11 + $0x1f8] sm:$0xff] %v1133_v41  ;;  %v1117_v52 = vadd.f32 %v989_v39, %v861_v43  ;;  %v908_v53 = vmul.f32 0.999, %v780_v47  ;;  %v909_v54 = vmul.f32 0.999, %v781_v48  ;;  %v168_v55 = vld [vmem:[%s4261_s15 + $0x18] sm:$0xff] }
  0xae   :  { %v251_v56 = vld [vmem:[%s4260_s28 + $0x270] sm:$0xff]  ;;  %2409 = vmatprep.subr.bf16.mxu0 %v391_v46  ;;  %v339_v57 = vpack.c.bf16 %v168_v55, %v168_v55  ;;  %v252_v58 = vld [vmem:[%s4260_s28 + $0x278] sm:$0xff]  ;;  %v765_v60 = vld [vmem:[#allocation6 + $0x278] sm:$0xff]  ;;  %1244 = vst [vmem:[#allocation11 + $0x170] sm:$0xff] %v1116_v51 }
  0xaf   :  { %v764_v59 = vld [vmem:[#allocation6 + $0x270] sm:$0xff]  ;;  %v1020_v61 = vmul.f32 0.001, %v251_v56  ;;  %1245 = vst [vmem:[#allocation11 + $0x178] sm:$0xff] %v1117_v52  ;;  %v1164_v62 = vadd.f32 %v1036_v49, %v908_v53  ;;  %v1165_v63 = vadd.f32 %v1037_v50, %v909_v54  ;;  %v383_v16 = vpack.c.bf16 %v252_v58, %v251_v56  ;;  %v167_v18 = vld [vmem:[%s4261_s15 + $0x10] sm:$0xff]  ;;  %v285_v19 = vld [vmem:[%s4260_s28 + $0x380] sm:$0xff] }
  0xb0   :  { %v892_v17 = vmul.f32 0.999, %v764_v59  ;;  %v286_v20 = vld [vmem:[%s4260_s28 + $0x388] sm:$0xff]  ;;  %486 = vmatprep.mubr.bf16.mxu1 %v339_v57  ;;  %v893_v21 = vmul.f32 0.999, %v765_v60  ;;  %v338_v23 = vpack.c.bf16 %v167_v18, %v167_v18  ;;  %v799_v26 = vld [vmem:[#allocation6 + $0x388] sm:$0xff] }
  0xb1   :  { %v1021_v22 = vmul.f32 0.001, %v252_v58  ;;  %v400_v24 = vpack.c.bf16 %v286_v20, %v285_v19  ;;  %v798_v25 = vld [vmem:[#allocation6 + $0x380] sm:$0xff]  ;;  %1292 = vst [vmem:[#allocation11 + $0x2f0] sm:$0xff] %v1164_v62  ;;  %1293 = vst [vmem:[#allocation11 + $0x2f8] sm:$0xff] %v1165_v63  ;;  %2410 = vmatpush3.bf16.msra.mxu0 %v383_v16  ;;  %v269_v34 = vld [vmem:[%s4260_s28 + $0x300] sm:$0xff] }
  0xb2   :  { %v1148_v27 = vadd.f32 %v1020_v61, %v892_v17  ;;  %v926_v28 = vmul.f32 0.999, %v798_v25  ;;  %v927_v29 = vmul.f32 0.999, %v799_v26  ;;  %v1054_v30 = vmul.f32 0.001, %v285_v19  ;;  %487 = vmatmul.mubr.bf16.vlgmr.msra.gmra.mrb[4].mxu1 %v338_v23 }
  0xb3   :  { %v1149_v31 = vadd.f32 %v1021_v22, %v893_v21  ;;  %2417 = vmatprep.subr.bf16.mxu1 %v400_v24  ;;  %v1055_v32 = vmul.f32 0.001, %v286_v20  ;;  %v170_v33 = vld [vmem:[%s4261_s15 + $0x28] sm:$0xff]  ;;  %v783_v40 = vld [vmem:[#allocation6 + $0x308] sm:$0xff]  ;;  %v1038_v41 = vmul.f32 0.001, %v269_v34 }
  0xb4   :  { %v270_v35 = vld [vmem:[%s4260_s28 + $0x308] sm:$0xff]  ;;  %1276 = vst [vmem:[#allocation11 + $0x270] sm:$0xff] %v1148_v27  ;;  %v1182_v36 = vadd.f32 %v1054_v30, %v926_v28  ;;  %v341_v37 = vpack.c.bf16 %v170_v33, %v170_v33  ;;  %v169_v42 = vld [vmem:[%s4261_s15 + $0x20] sm:$0xff]  ;;  %v911_v45 = vmul.f32 0.999, %v783_v40  ;;  %v287_v48 = vld [vmem:[%s4260_s28 + $0x390] sm:$0xff] }
  0xb5   :  { %v392_v38 = vpack.c.bf16 %v270_v35, %v269_v34  ;;  %v782_v39 = vld [vmem:[#allocation6 + $0x300] sm:$0xff]  ;;  %1277 = vst [vmem:[#allocation11 + $0x278] sm:$0xff] %v1149_v31  ;;  %v1183_v43 = vadd.f32 %v1055_v32, %v927_v29  ;;  %v1039_v46 = vmul.f32 0.001, %v270_v35  ;;  %v340_v47 = vpack.c.bf16 %v169_v42, %v169_v42  ;;  %v288_v49 = vld [vmem:[%s4260_s28 + $0x398] sm:$0xff]  ;;  %v801_v54 = vld [vmem:[#allocation6 + $0x398] sm:$0xff] }
  0xb6   :  { %v910_v44 = vmul.f32 0.999, %v782_v39  ;;  %1310 = vst [vmem:[#allocation11 + $0x380] sm:$0xff] %v1182_v36  ;;  %526 = vmatprep.mubr.bf16.mxu0 %v341_v37  ;;  %v800_v50 = vld [vmem:[#allocation6 + $0x390] sm:$0xff]  ;;  %v401_v53 = vpack.c.bf16 %v288_v49, %v287_v48  ;;  %v271_v56 = vld [vmem:[%s4260_s28 + $0x310] sm:$0xff]  ;;  %v785_v63 = vld [vmem:[#allocation6 + $0x318] sm:$0xff] }
  0xb7   :  { %2418 = vmatpush3.bf16.msra.mxu1 %v392_v38  ;;  %1311 = vst [vmem:[#allocation11 + $0x388] sm:$0xff] %v1183_v43  ;;  %v1167_v52 = vadd.f32 %v1039_v46, %v911_v45  ;;  %v928_v55 = vmul.f32 0.999, %v800_v50  ;;  %v272_v57 = vld [vmem:[%s4260_s28 + $0x318] sm:$0xff]  ;;  %527 = vmatmul.mubr.bf16.vlgmr.msra.gmra.mrb[0].mxu0 %v340_v47  ;;  %v929_v58 = vmul.f32 0.999, %v801_v54 }
  0xb8   :  { %v1166_v51 = vadd.f32 %v1038_v41, %v910_v44  ;;  %v1056_v59 = vmul.f32 0.001, %v287_v48  ;;  %v1057_v60 = vmul.f32 0.001, %v288_v49  ;;  %v393_v61 = vpack.c.bf16 %v272_v57, %v271_v56  ;;  %2419 = vmatprep.subr.bf16.mxu1 %v401_v53  ;;  %v784_v62 = vld [vmem:[#allocation6 + $0x310] sm:$0xff]  ;;  %v289_v22 = vld [vmem:[%s4260_s28 + $0x3a0] sm:$0xff] }
  0xb9   :  { %1295 = vst [vmem:[#allocation11 + $0x308] sm:$0xff] %v1167_v52  ;;  %v1040_v16 = vmul.f32 0.001, %v271_v56  ;;  %v1041_v17 = vmul.f32 0.001, %v272_v57  ;;  %v290_v23 = vld [vmem:[%s4260_s28 + $0x3a8] sm:$0xff] }
  0xba   :  { %1294 = vst [vmem:[#allocation11 + $0x300] sm:$0xff] %v1166_v51  ;;  %v1184_v18 = vadd.f32 %v1056_v59, %v928_v55  ;;  %v1185_v19 = vadd.f32 %v1057_v60, %v929_v58  ;;  %v912_v20 = vmul.f32 0.999, %v784_v62  ;;  %v913_v21 = vmul.f32 0.999, %v785_v63  ;;  %v802_v25 = vld [vmem:[#allocation6 + $0x3a0] sm:$0xff] }
  0xbb   :  { %2420 = vmatpush3.bf16.msra.mxu1 %v393_v61  ;;  %v402_v24 = vpack.c.bf16 %v290_v23, %v289_v22  ;;  %v803_v26 = vld [vmem:[#allocation6 + $0x3a8] sm:$0xff]  ;;  %v1058_v27 = vmul.f32 0.001, %v289_v22  ;;  %v1059_v28 = vmul.f32 0.001, %v290_v23  ;;  %v273_v33 = vld [vmem:[%s4260_s28 + $0x320] sm:$0xff] }
  0xbc   :  { %1312 = vst [vmem:[#allocation11 + $0x390] sm:$0xff] %v1184_v18  ;;  %1313 = vst [vmem:[#allocation11 + $0x398] sm:$0xff] %v1185_v19  ;;  %v1168_v29 = vadd.f32 %v1040_v16, %v912_v20  ;;  %v1169_v30 = vadd.f32 %v1041_v17, %v913_v21  ;;  %v930_v31 = vmul.f32 0.999, %v802_v25  ;;  %v931_v32 = vmul.f32 0.999, %v803_v26 }
  0xbd   :  { %v274_v34 = vld [vmem:[%s4260_s28 + $0x328] sm:$0xff]  ;;  %2421 = vmatprep.subr.bf16.mxu1 %v402_v24  ;;  %v787_v37 = vld [vmem:[#allocation6 + $0x328] sm:$0xff]  ;;  %v1042_v38 = vmul.f32 0.001, %v273_v33  ;;  %v292_v45 = vld [vmem:[%s4260_s28 + $0x3b8] sm:$0xff] }
  0xbe   :  { %v394_v35 = vpack.c.bf16 %v274_v34, %v273_v33  ;;  %v786_v36 = vld [vmem:[#allocation6 + $0x320] sm:$0xff]  ;;  %v1043_v39 = vmul.f32 0.001, %v274_v34  ;;  %1296 = vst [vmem:[#allocation11 + $0x310] sm:$0xff] %v1168_v29  ;;  %1297 = vst [vmem:[#allocation11 + $0x318] sm:$0xff] %v1169_v30  ;;  %v3443_v40 = vadd.f32 %v1058_v27, %v930_v31  ;;  %v3445_v41 = vadd.f32 %v1059_v28, %v931_v32  ;;  %v291_v44 = vld [vmem:[%s4260_s28 + $0x3b0] sm:$0xff] }
  0xbf   :  { %v914_v42 = vmul.f32 0.999, %v786_v36  ;;  %v915_v43 = vmul.f32 0.999, %v787_v37  ;;  %v403_v46 = vpack.c.bf16 %v292_v45, %v291_v44  ;;  %v804_v47 = vld [vmem:[#allocation6 + $0x3b0] sm:$0xff]  ;;  %v805_v48 = vld [vmem:[#allocation6 + $0x3b8] sm:$0xff] }
  0xc0   :  { %2422 = vmatpush3.bf16.msra.mxu1 %v394_v35  ;;  %v1060_v49 = vmul.f32 0.001, %v291_v44  ;;  %v1061_v50 = vmul.f32 0.001, %v292_v45  ;;  %1314 = vst [vmem:[#allocation11 + $0x3a0] sm:$0xff] %v3443_v40  ;;  %1315 = vst [vmem:[#allocation11 + $0x3a8] sm:$0xff] %v3445_v41 }
  0xc1   :  { %v3455_v51 = vadd.f32 %v1042_v38, %v914_v42  ;;  %v3457_v52 = vadd.f32 %v1043_v39, %v915_v43  ;;  %v932_v53 = vmul.f32 0.999, %v804_v47  ;;  %v933_v54 = vmul.f32 0.999, %v805_v48  ;;  %v275_v55 = vld [vmem:[%s4260_s28 + $0x330] sm:$0xff]  ;;  %v276_v56 = vld [vmem:[%s4260_s28 + $0x338] sm:$0xff]  ;;  %2423 = vmatprep.subr.bf16.mxu1 %v403_v46 }
  0xc2   :  { %v395_v57 = vpack.c.bf16 %v276_v56, %v275_v55  ;;  %v788_v58 = vld [vmem:[#allocation6 + $0x330] sm:$0xff]  ;;  %v789_v59 = vld [vmem:[#allocation6 + $0x338] sm:$0xff]  ;;  %v1044_v60 = vmul.f32 0.001, %v275_v55  ;;  %v1045_v61 = vmul.f32 0.001, %v276_v56 }
  0xc3   :  { %1298 = vst [vmem:[#allocation11 + $0x320] sm:$0xff] %v3455_v51  ;;  %1299 = vst [vmem:[#allocation11 + $0x328] sm:$0xff] %v3457_v52  ;;  %v3467_v62 = vadd.f32 %v1060_v49, %v932_v53  ;;  %v3469_v63 = vadd.f32 %v1061_v50, %v933_v54  ;;  %v916_v16 = vmul.f32 0.999, %v788_v58  ;;  %v917_v17 = vmul.f32 0.999, %v789_v59 }
  0xc4   :  { %v293_v18 = vld [vmem:[%s4260_s28 + $0x3c0] sm:$0xff]  ;;  %v294_v19 = vld [vmem:[%s4260_s28 + $0x3c8] sm:$0xff]  ;;  %2424 = vmatpush3.bf16.msra.mxu1 %v395_v57  ;;  %v807_v22 = vld [vmem:[#allocation6 + $0x3c8] sm:$0xff] }
  0xc5   :  { %v404_v20 = vpack.c.bf16 %v294_v19, %v293_v18  ;;  %v806_v21 = vld [vmem:[#allocation6 + $0x3c0] sm:$0xff]  ;;  %v1062_v23 = vmul.f32 0.001, %v293_v18  ;;  %v1063_v24 = vmul.f32 0.001, %v294_v19  ;;  %1316 = vst [vmem:[#allocation11 + $0x3b0] sm:$0xff] %v3467_v62  ;;  %v3479_v25 = vadd.f32 %v1044_v60, %v916_v16 }
  0xc6   :  { %1317 = vst [vmem:[#allocation11 + $0x3b8] sm:$0xff] %v3469_v63  ;;  %v3481_v26 = vadd.f32 %v1045_v61, %v917_v17  ;;  %v934_v27 = vmul.f32 0.999, %v806_v21  ;;  %v935_v28 = vmul.f32 0.999, %v807_v22  ;;  %v277_v29 = vld [vmem:[%s4260_s28 + $0x340] sm:$0xff] }
  0xc7   :  { %v278_v30 = vld [vmem:[%s4260_s28 + $0x348] sm:$0xff]  ;;  %2425 = vmatprep.subr.bf16.mxu1 %v404_v20  ;;  %v791_v33 = vld [vmem:[#allocation6 + $0x348] sm:$0xff]  ;;  %v1046_v34 = vmul.f32 0.001, %v277_v29  ;;  %1300 = vst [vmem:[#allocation11 + $0x330] sm:$0xff] %v3479_v25  ;;  %v296_v43 = vld [vmem:[%s4260_s28 + $0x3d8] sm:$0xff] }
  0xc8   :  { %v396_v31 = vpack.c.bf16 %v278_v30, %v277_v29  ;;  %v790_v32 = vld [vmem:[#allocation6 + $0x340] sm:$0xff]  ;;  %v1047_v35 = vmul.f32 0.001, %v278_v30  ;;  %1301 = vst [vmem:[#allocation11 + $0x338] sm:$0xff] %v3481_v26  ;;  %v3491_v36 = vadd.f32 %v1062_v23, %v934_v27  ;;  %v3493_v37 = vadd.f32 %v1063_v24, %v935_v28  ;;  %v295_v42 = vld [vmem:[%s4260_s28 + $0x3d0] sm:$0xff]  ;;  %v808_v45 = vld [vmem:[#allocation6 + $0x3d0] sm:$0xff] }
  0xc9   :  { %v918_v38 = vmul.f32 0.999, %v790_v32  ;;  %v919_v39 = vmul.f32 0.999, %v791_v33  ;;  %v405_v44 = vpack.c.bf16 %v296_v43, %v295_v42  ;;  %v809_v46 = vld [vmem:[#allocation6 + $0x3d8] sm:$0xff]  ;;  %v279_v55 = vld [vmem:[%s4260_s28 + $0x350] sm:$0xff] }
  0xca   :  { %2426 = vmatpush3.bf16.msra.mxu1 %v396_v31  ;;  %v1064_v47 = vmul.f32 0.001, %v295_v42  ;;  %v1065_v48 = vmul.f32 0.001, %v296_v43  ;;  %1318 = vst [vmem:[#allocation11 + $0x3c0] sm:$0xff] %v3491_v36  ;;  %1319 = vst [vmem:[#allocation11 + $0x3c8] sm:$0xff] %v3493_v37 }
  0xcb   :  { %v3503_v49 = vadd.f32 %v1046_v34, %v918_v38  ;;  %v3505_v50 = vadd.f32 %v1047_v35, %v919_v39  ;;  %v936_v53 = vmul.f32 0.999, %v808_v45  ;;  %v937_v54 = vmul.f32 0.999, %v809_v46  ;;  %v280_v56 = vld [vmem:[%s4260_s28 + $0x358] sm:$0xff]  ;;  %2427 = vmatprep.subr.bf16.mxu1 %v405_v44  ;;  %v793_v59 = vld [vmem:[#allocation6 + $0x358] sm:$0xff] }
  0xcc   :  { %v397_v57 = vpack.c.bf16 %v280_v56, %v279_v55  ;;  %v792_v58 = vld [vmem:[#allocation6 + $0x350] sm:$0xff]  ;;  %v1048_v60 = vmul.f32 0.001, %v279_v55  ;;  %v1049_v61 = vmul.f32 0.001, %v280_v56  ;;  %v297_v20 = vld [vmem:[%s4260_s28 + $0x3e0] sm:$0xff] }
  0xcd   :  { %1302 = vst [vmem:[#allocation11 + $0x340] sm:$0xff] %v3503_v49  ;;  %1303 = vst [vmem:[#allocation11 + $0x348] sm:$0xff] %v3505_v50  ;;  %v3515_v16 = vadd.f32 %v1064_v47, %v936_v53  ;;  %v3517_v17 = vadd.f32 %v1065_v48, %v937_v54  ;;  %v920_v18 = vmul.f32 0.999, %v792_v58  ;;  %v921_v19 = vmul.f32 0.999, %v793_v59 }
  0xce   :  { %v298_v21 = vld [vmem:[%s4260_s28 + $0x3e8] sm:$0xff]  ;;  %2428 = vmatpush3.bf16.msra.mxu1 %v397_v57  ;;  %v811_v24 = vld [vmem:[#allocation6 + $0x3e8] sm:$0xff]  ;;  %v1066_v27 = vmul.f32 0.001, %v297_v20  ;;  %v281_v33 = vld [vmem:[%s4260_s28 + $0x360] sm:$0xff] }
  0xcf   :  { %v406_v22 = vpack.c.bf16 %v298_v21, %v297_v20  ;;  %v810_v23 = vld [vmem:[#allocation6 + $0x3e0] sm:$0xff]  ;;  %v1067_v28 = vmul.f32 0.001, %v298_v21  ;;  %1320 = vst [vmem:[#allocation11 + $0x3d0] sm:$0xff] %v3515_v16  ;;  %1321 = vst [vmem:[#allocation11 + $0x3d8] sm:$0xff] %v3517_v17  ;;  %v3527_v29 = vadd.f32 %v1048_v60, %v920_v18  ;;  %v3529_v30 = vadd.f32 %v1049_v61, %v921_v19  ;;  %v795_v39 = vld [vmem:[#allocation6 + $0x368] sm:$0xff] }
  0xd0   :  { %v938_v31 = vmul.f32 0.999, %v810_v23  ;;  %v939_v32 = vmul.f32 0.999, %v811_v24  ;;  %v282_v34 = vld [vmem:[%s4260_s28 + $0x368] sm:$0xff]  ;;  %v299_v48 = vld [vmem:[%s4260_s28 + $0x3f0] sm:$0xff] }
  0xd1   :  { %2429 = vmatprep.subr.bf16.mxu1 %v406_v22  ;;  %v398_v35 = vpack.c.bf16 %v282_v34, %v281_v33  ;;  %v794_v38 = vld [vmem:[#allocation6 + $0x360] sm:$0xff]  ;;  %v1050_v42 = vmul.f32 0.001, %v281_v33  ;;  %v1051_v43 = vmul.f32 0.001, %v282_v34  ;;  %1304 = vst [vmem:[#allocation11 + $0x350] sm:$0xff] %v3527_v29 }
  0xd2   :  { %1305 = vst [vmem:[#allocation11 + $0x358] sm:$0xff] %v3529_v30  ;;  %v3539_v44 = vadd.f32 %v1066_v27, %v938_v31  ;;  %v3541_v45 = vadd.f32 %v1067_v28, %v939_v32  ;;  %v922_v46 = vmul.f32 0.999, %v794_v38  ;;  %v923_v47 = vmul.f32 0.999, %v795_v39  ;;  %v300_v53 = vld [vmem:[%s4260_s28 + $0x3f8] sm:$0xff] }
  0xd3   :  { %2430 = vmatpush3.bf16.msra.mxu1 %v398_v35  ;;  %v407_v54 = vpack.c.bf16 %v300_v53, %v299_v48  ;;  %v812_v55 = vld [vmem:[#allocation6 + $0x3f0] sm:$0xff]  ;;  %v813_v56 = vld [vmem:[#allocation6 + $0x3f8] sm:$0xff]  ;;  %v1068_v57 = vmul.f32 0.001, %v299_v48  ;;  %v1069_v58 = vmul.f32 0.001, %v300_v53 }
  0xd4   :  { %1322 = vst [vmem:[#allocation11 + $0x3e0] sm:$0xff] %v3539_v44  ;;  %1323 = vst [vmem:[#allocation11 + $0x3e8] sm:$0xff] %v3541_v45  ;;  %v3551_v59 = vadd.f32 %v1050_v42, %v922_v46  ;;  %v3553_v60 = vadd.f32 %v1051_v43, %v923_v47  ;;  %v940_v61 = vmul.f32 0.999, %v812_v55  ;;  %v941_v18 = vmul.f32 0.999, %v813_v56 }
  0xd5   :  { %v283_v19 = vld [vmem:[%s4260_s28 + $0x370] sm:$0xff]  ;;  %v284_v20 = vld [vmem:[%s4260_s28 + $0x378] sm:$0xff]  ;;  %2431 = vmatprep.subr.bf16.mxu1 %v407_v54  ;;  %v797_v23 = vld [vmem:[#allocation6 + $0x378] sm:$0xff]  ;;  %v4232_v53 = vmov 0.0  }
  0xd6   :  { %v399_v21 = vpack.c.bf16 %v284_v20, %v283_v19  ;;  %v796_v22 = vld [vmem:[#allocation6 + $0x370] sm:$0xff]  ;;  %v1052_v24 = vmul.f32 0.001, %v283_v19  ;;  %v1053_v27 = vmul.f32 0.001, %v284_v20  ;;  %1306 = vst [vmem:[#allocation11 + $0x360] sm:$0xff] %v3551_v59  ;;  %v3563_v28 = vadd.f32 %v1068_v57, %v940_v61  ;;  %2572 = vmatprep.subr.bf16.mxu0 %v4232_v53  ;;  %2588 = vmatprep.mubr.msk.bf16.mxu0 %vm2860_vm0, %v4232_v53 }
  0xd7   :  { %1307 = vst [vmem:[#allocation11 + $0x368] sm:$0xff] %v3553_v60  ;;  %v3565_v31 = vadd.f32 %v1069_v58, %v941_v18  ;;  %v924_v32 = vmul.f32 0.999, %v796_v22  ;;  %v925_v33 = vmul.f32 0.999, %v797_v23  ;;  %v172_v34 = vld [vmem:[%s4261_s15 + $0x38] sm:$0xff] }
  0xd8   :  { %v171_v35 = vld [vmem:[%s4261_s15 + $0x30] sm:$0xff]  ;;  %2432 = vmatpush3.bf16.msra.mxu1 %v399_v21  ;;  %v343_v38 = vpack.c.bf16 %v172_v34, %v172_v34  ;;  %1324 = vst [vmem:[#allocation11 + $0x3f0] sm:$0xff] %v3563_v28  ;;  %s4262_s15 = sld [smem:[#allocation49_spill]]  ;;  %v323_v13 = vld [vmem:[%s4264_s2 + $0x20] sm:$0xff]  ;;  %v1546_v1 = vld [vmem:[#allocation11] sm:$0xff] }
  0xd9   :  { %v342_v39 = vpack.c.bf16 %v171_v35, %v171_v35  ;;  %1325 = vst [vmem:[#allocation11 + $0x3f8] sm:$0xff] %v3565_v31  ;;  %v3575_v42 = vadd.f32 %v1052_v24, %v924_v32  ;;  %v3577_v43 = vadd.f32 %v1053_v27, %v925_v33  ;;  %2592 = vmatprep.subr.bf16.mxu1 %v4232_v53  ;;  %v1547_v0 = vld [vmem:[#allocation11 + $0x8] sm:$0xff] }
  0xda   :  { %566 = vmatprep.mubr.bf16.mxu1 %v343_v38 }
  0xdb   :  { %1308 = vst [vmem:[#allocation11 + $0x370] sm:$0xff] %v3575_v42  ;;  %1309 = vst [vmem:[#allocation11 + $0x378] sm:$0xff] %v3577_v43  ;;  %567 = vmatmul.mubr.bf16.vlgmr.msra.gmra.mrb[8].mxu1 %v342_v39 }
  0xdc   :  { %2608 = vmatprep.mubr.msk.bf16.mxu1 %vm2860_vm0, %v4232_v53 }
  0xde   :  { %v3584_v46 = vld [vmem:[%s4262_s15] sm:$0xff]  ;;  %v3589_v47 = vld [vmem:[%s4262_s15 + $0x8] sm:$0xff]  ;;  %v3594_v48 = vld [vmem:[%s4262_s15 + $0x10] sm:$0xff] }
  0xdf   :  { %v576_v54 = vpack.c.bf16 %v3589_v47, %v3584_v46  ;;  %v3602_v55 = vld [vmem:[%s4262_s15 + $0x18] sm:$0xff]  ;;  %v3611_v57 = vld [vmem:[%s4262_s15 + $0x20] sm:$0xff]  ;;  %v3616_v58 = vld [vmem:[%s4262_s15 + $0x28] sm:$0xff] }
  0xe0   :  { %v577_v56 = vpack.c.bf16 %v3602_v55, %v3594_v48  ;;  %v578_v61 = vpack.c.bf16 %v3616_v58, %v3611_v57  ;;  %v3624_v18 = vld [vmem:[%s4262_s15 + $0x30] sm:$0xff]  ;;  %v3629_v19 = vld [vmem:[%s4262_s15 + $0x38] sm:$0xff]  ;;  %v3637_v21 = vld [vmem:[%s4262_s15 + $0x40] sm:$0xff] }
  0xe1   :  { %2573 = vmatpush3.bf16.msra.mxu0 %v576_v54  ;;  %v579_v20 = vpack.c.bf16 %v3629_v19, %v3624_v18  ;;  %v3642_v22 = vld [vmem:[%s4262_s15 + $0x48] sm:$0xff]  ;;  %v3650_v24 = vld [vmem:[%s4262_s15 + $0x50] sm:$0xff]  ;;  %v3655_v27 = vld [vmem:[%s4262_s15 + $0x58] sm:$0xff] }
  0xe2   :  { %2574 = vmatprep.subr.bf16.mxu0 %v4232_v53  ;;  %v580_v23 = vpack.c.bf16 %v3642_v22, %v3637_v21  ;;  %v581_v32 = vpack.c.bf16 %v3655_v27, %v3650_v24  ;;  %v3664_v33 = vld [vmem:[%s4262_s15 + $0x60] sm:$0xff]  ;;  %v3669_v34 = vld [vmem:[%s4262_s15 + $0x68] sm:$0xff]  ;;  %v3677_v38 = vld [vmem:[%s4262_s15 + $0x70] sm:$0xff] }
  0xe3   :  { %v582_v35 = vpack.c.bf16 %v3669_v34, %v3664_v33  ;;  %v3682_v39 = vld [vmem:[%s4262_s15 + $0x78] sm:$0xff] }
  0xe4   :  { %4263 = vst [vmem:[#allocation43_spill] sm:$0xff] %v3682_v39  ;;  %v583_v54 = vpack.c.bf16 %v3682_v39, %v3677_v38  ;;  %v1564_v39 = vld [vmem:[#allocation11 + $0x90] sm:$0xff] }
  0xe5   :  { %2575 = vmatpush3.bf16.msra.mxu0 %v577_v56  ;;  %v319_v56 = vld [vmem:[%s4264_s2] sm:$0xff] }
  0xe6   :  { %2576 = vmatprep.subr.bf16.mxu0 %v4232_v53 }
  0xe9   :  { %2577 = vmatpush3.bf16.msra.mxu0 %v578_v61  ;;  %v320_v61 = vld [vmem:[%s4264_s2 + $0x8] sm:$0xff] }
  0xea   :  { %2578 = vmatprep.subr.bf16.mxu0 %v4232_v53 }
  0xed   :  { %2579 = vmatpush3.bf16.msra.mxu0 %v579_v20  ;;  %v1562_v20 = vld [vmem:[#allocation11 + $0x80] sm:$0xff] }
  0xee   :  { %2580 = vmatprep.subr.bf16.mxu0 %v4232_v53 }
  0xf1   :  { %2581 = vmatpush3.bf16.msra.mxu0 %v580_v23  ;;  %v632_v23 = vpack.c.bf16 %v320_v61, %v319_v56  ;;  %v324_v56 = vld [vmem:[%s4264_s2 + $0x28] sm:$0xff] }
  0xf2   :  { %2582 = vmatprep.subr.bf16.mxu0 %v4232_v53  ;;  %v634_v61 = vpack.c.bf16 %v324_v56, %v323_v13  ;;  %v328_v13 = vld [vmem:[%s4264_s2 + $0x48] sm:$0xff] }
  0xf3   :  { %2593 = vmatpush3.bf16.msra.mxu1 %v632_v23 }
  0xf4   :  { %2594 = vmatprep.subr.bf16.mxu1 %v4265_v14 }
  0xf5   :  { %2583 = vmatpush3.bf16.msra.mxu0 %v581_v32  ;;  %v1563_v32 = vld [vmem:[#allocation11 + $0x88] sm:$0xff] }
  0xf6   :  { %2584 = vmatprep.subr.bf16.mxu0 %v4232_v53 }
  0xf9   :  { %2585 = vmatpush3.bf16.msra.mxu0 %v582_v35  ;;  %v1725_v35 = vpack.c.bf16 %v1563_v32, %v1562_v20  ;;  %v325_v20 = vld [vmem:[%s4264_s2 + $0x30] sm:$0xff]  ;;  %v327_v32 = vld [vmem:[%s4264_s2 + $0x40] sm:$0xff] }
  0xfa   :  { %2586 = vmatprep.subr.bf16.mxu0 %v4232_v53  ;;  %v322_v53 = vld [vmem:[%s4264_s2 + $0x18] sm:$0xff] }
  0xfd   :  { %2587 = vmatpush3.bf16.msra.mxu0 %v583_v54  ;;  %v321_v54 = vld [vmem:[%s4264_s2 + $0x10] sm:$0xff] }
  0xfe   :  { %v633_v15 = vpack.c.bf16 %v322_v53, %v321_v54  ;;  %2457 = vmatprep.subr.bf16.mxu0 %v1725_v35  ;;  %v326_v53 = vld [vmem:[%s4264_s2 + $0x38] sm:$0xff]  ;;  %v329_v35 = vld [vmem:[%s4264_s2 + $0x50] sm:$0xff] }
  0xff   :  { %v635_v23 = vpack.c.bf16 %v326_v53, %v325_v20  ;;  %v330_v54 = vld [vmem:[%s4264_s2 + $0x58] sm:$0xff] }
 0x100   :  { %2595 = vmatpush3.bf16.msra.mxu1 %v633_v15  ;;  %v636_v15 = vpack.c.bf16 %v328_v13, %v327_v32  ;;  %v332_v32 = vld [vmem:[%s4264_s2 + $0x68] sm:$0xff] }
 0x101   :  { %2596 = vmatprep.subr.bf16.mxu1 %v4265_v14 }
 0x104   :  { %2597 = vmatpush3.bf16.msra.mxu1 %v634_v61  ;;  %v637_v61 = vpack.c.bf16 %v330_v54, %v329_v35 }
 0x105   :  { %2598 = vmatprep.subr.bf16.mxu1 %v4265_v14 }
 0x108   :  { %2599 = vmatpush3.bf16.msra.mxu1 %v635_v23  ;;  %v331_v23 = vld [vmem:[%s4264_s2 + $0x60] sm:$0xff] }
 0x109   :  { %2600 = vmatprep.subr.bf16.mxu1 %v4265_v14  ;;  %v638_v11 = vpack.c.bf16 %v332_v32, %v331_v23 }
 0x10c   :  { %2601 = vmatpush3.bf16.msra.mxu1 %v636_v15 }
 0x10d   :  { %2602 = vmatprep.subr.bf16.mxu1 %v4265_v14 }
 0x110   :  { %2603 = vmatpush3.bf16.msra.mxu1 %v637_v61 }
 0x111   :  { %2604 = vmatprep.subr.bf16.mxu1 %v4265_v14 }
 0x114   :  { %2605 = vmatpush3.bf16.msra.mxu1 %v638_v11 }
 0x115   :  { %2606 = vmatprep.subr.bf16.mxu1 %v4265_v14 }
 0x139   :  { %v2367_v56 = vpop.f32.mrb[0].mxu1 }
 0x13a   :  { %v2368_v20 = vpop.f32.mrb[1].mxu1 }
 0x13b   :  { %v2369_v53 = vadd.f32 %v2368_v20, %v2367_v56  ;;  %v2370_v12 = vpop.f32.mrb[2].mxu1 }
 0x13c   :  { %v2371_v13 = vpop.f32.mrb[3].mxu1  ;;  %v2342_v12 = vld [vmem:[%s4266_s11] ss:$0 sm:$0xff] }
 0x13d   :  { %v449_v54 = vadd.f32 %v2369_v53, %v2342_v12  ;;  %v1565_v53 = vld [vmem:[#allocation11 + $0x98] sm:$0xff] }
 0x185   :  { %v2389_v15 = vpop.f32.mrb[4].mxu1 }
 0x186   :  { %v2390_v35 = vpop.f32.mrb[5].mxu1 }
 0x187   :  { %v2391_v56 = vadd.f32 %v2390_v35, %v2389_v15  ;;  %v2392_v20 = vpop.f32.mrb[6].mxu1  ;;  %v1717_v15 = vpack.c.bf16 %v1547_v0, %v1546_v1  ;;  %v1726_v35 = vpack.c.bf16 %v1565_v53, %v1564_v39  ;;  %v1552_v0 = vld [vmem:[#allocation11 + $0x30] sm:$0xff]  ;;  %v1553_v1 = vld [vmem:[#allocation11 + $0x38] sm:$0xff]  ;;  %v1570_v39 = vld [vmem:[#allocation11 + $0xc0] sm:$0xff] }
 0x188   :  { %v2393_v10 = vpop.f32.mrb[7].mxu1  ;;  %v1567_v20 = vld [vmem:[#allocation11 + $0xa8] sm:$0xff] }
 0x189   :  { %v489_v9 = vadd.f32 %v2391_v56, %v449_v54  ;;  %v1548_v54 = vld [vmem:[#allocation11 + $0x10] sm:$0xff]  ;;  %v1549_v56 = vld [vmem:[#allocation11 + $0x18] sm:$0xff]  ;;  %v1555_v53 = vld [vmem:[#allocation11 + $0x48] sm:$0xff] }
 0x18a   :  { %v2411_v8 = vpop.f32.mrb[0].mxu0 }
 0x18b   :  { %v2412_v13 = vpop.f32.mrb[1].mxu0 }
 0x18c   :  { %v2413_v61 = vadd.f32 %v2412_v13, %v2411_v8  ;;  %v2414_v23 = vpop.f32.mrb[2].mxu0  ;;  %v1566_v8 = vld [vmem:[#allocation11 + $0xa0] sm:$0xff] }
 0x18d   :  { %v2415_v32 = vpop.f32.mrb[3].mxu0  ;;  %v1720_v23 = vpack.c.bf16 %v1553_v1, %v1552_v0  ;;  %v1576_v0 = vld [vmem:[#allocation11 + $0xf0] sm:$0xff]  ;;  %v1577_v1 = vld [vmem:[#allocation11 + $0xf8] sm:$0xff] }
 0x18e   :  { %v529_v7 = vadd.f32 %v2413_v61, %v489_v9  ;;  %v1718_v9 = vpack.c.bf16 %v1549_v56, %v1548_v54  ;;  %v1571_v61 = vld [vmem:[#allocation11 + $0xc8] sm:$0xff]  ;;  %v1556_v54 = vld [vmem:[#allocation11 + $0x50] sm:$0xff]  ;;  %v1557_v56 = vld [vmem:[#allocation11 + $0x58] sm:$0xff] }
 0x18f   :  { %v1729_v32 = vpack.c.bf16 %v1571_v61, %v1570_v39  ;;  %v1732_v39 = vpack.c.bf16 %v1577_v1, %v1576_v0  ;;  %v1560_v61 = vld [vmem:[#allocation11 + $0x70] sm:$0xff]  ;;  %v1630_v1 = vld [vmem:[#allocation11 + $0x2a0] sm:$0xff] }
 0x1ae   :  { %v2433_v11 = vpop.f32.mrb[8].mxu1 }
 0x1af   :  { %v2434_v6 = vpop.f32.mrb[9].mxu1 }
 0x1b0   :  { %v2435_v5 = vadd.f32 %v2434_v6, %v2433_v11  ;;  %v2436_v4 = vpop.f32.mrb[10].mxu1  ;;  %v1727_v6 = vpack.c.bf16 %v1567_v20, %v1566_v8  ;;  %v1554_v11 = vld [vmem:[#allocation11 + $0x40] sm:$0xff]  ;;  %v1722_v8 = vpack.c.bf16 %v1557_v56, %v1556_v54 }
 0x1b1   :  { %v2437_v3 = vpop.f32.mrb[11].mxu1  ;;  %v1550_v4 = vld [vmem:[#allocation11 + $0x20] sm:$0xff] }
 0x1b2   :  { %v569_v2 = vadd.f32 %v2435_v5, %v529_v7  ;;  %v1551_v3 = vld [vmem:[#allocation11 + $0x28] sm:$0xff]  ;;  %v1568_v5 = vld [vmem:[#allocation11 + $0xb0] sm:$0xff]  ;;  %v1569_v7 = vld [vmem:[#allocation11 + $0xb8] sm:$0xff] }
 0x1b3   :  { %v1719_v13 = vpack.c.bf16 %v1551_v3, %v1550_v4  ;;  %v1574_v20 = vld [vmem:[#allocation11 + $0xe0] sm:$0xff]  ;;  %v1559_v3 = vld [vmem:[#allocation11 + $0x68] sm:$0xff] }
 0x1b4   :  { %v574_v12 = vmax.f32 %v569_v2, 0.0  ;;  %v1728_v2 = vpack.c.bf16 %v1569_v7, %v1568_v5  ;;  %v1558_v4 = vld [vmem:[#allocation11 + $0x60] sm:$0xff]  ;;  %v333_v7 = vld [vmem:[%s4264_s2 + $0x70] sm:$0xff] }
 0x1b5   :  { %v1723_v5 = vpack.c.bf16 %v1559_v3, %v1558_v4  ;;  %v1628_v3 = vld [vmem:[#allocation11 + $0x290] sm:$0xff] }
 0x1b6   :  { %v575_v10 = vpack.c.bf16 %v574_v12, %v574_v12  ;;  %v1572_v12 = vld [vmem:[#allocation11 + $0xd0] sm:$0xff] }
 0x1b8   :  { %2589 = vmatmul.mubr.bf16.vlgmr.msra.gmra.mrb[4].mxu0 %v575_v10  ;;  %v1721_v10 = vpack.c.bf16 %v1555_v53, %v1554_v11  ;;  %v1594_v11 = vld [vmem:[#allocation11 + $0x180] sm:$0xff]  ;;  %v1595_v53 = vld [vmem:[#allocation11 + $0x188] sm:$0xff] }
 0x1b9   :  { %2458 = vmatpush3.bf16.msra.mxu0 %v1717_v15  ;;  %v1573_v15 = vld [vmem:[#allocation11 + $0xd8] sm:$0xff] }
 0x1ba   :  { %2459 = vmatprep.subr.bf16.mxu0 %v1726_v35  ;;  %v1730_v35 = vpack.c.bf16 %v1573_v15, %v1572_v12  ;;  %v1741_v12 = vpack.c.bf16 %v1595_v53, %v1594_v11  ;;  %v1539_v15 = vld [vmem:[%s4267_s9 + $0x8] sm:$0xff]  ;;  %v1632_v53 = vld [vmem:[#allocation11 + $0x2b0] sm:$0xff] }
 0x1bb   :  { %v1710_v54 = vpack.c.bf16 %v1539_v15, %v1539_v15 }
 0x1bd   :  { %2460 = vmatpush3.bf16.msra.mxu0 %v1718_v9  ;;  %v1575_v9 = vld [vmem:[#allocation11 + $0xe8] sm:$0xff]  ;;  %1819 = vmatprep.mubr.bf16.mxu0 %v1710_v54 }
 0x1be   :  { %2461 = vmatprep.subr.bf16.mxu0 %v1727_v6  ;;  %v1731_v6 = vpack.c.bf16 %v1575_v9, %v1574_v20  ;;  %v1610_v20 = vld [vmem:[#allocation11 + $0x200] sm:$0xff]  ;;  %v1611_v9 = vld [vmem:[#allocation11 + $0x208] sm:$0xff] }
 0x1bf   :  { %v1749_v4 = vpack.c.bf16 %v1611_v9, %v1610_v20  ;;  %v1618_v9 = vld [vmem:[#allocation11 + $0x240] sm:$0xff] }
 0x1c1   :  { %2462 = vmatpush3.bf16.msra.mxu0 %v1719_v13  ;;  %v334_v13 = vld [vmem:[%s4264_s2 + $0x78] sm:$0xff] }
 0x1c2   :  { %2463 = vmatprep.subr.bf16.mxu0 %v1728_v2  ;;  %v639_v2 = vpack.c.bf16 %v334_v13, %v333_v7  ;;  %v1612_v13 = vld [vmem:[#allocation11 + $0x210] sm:$0xff] }
 0x1c4   :  { %2607 = vmatpush3.bf16.msra.mxu1 %v639_v2  ;;  %v1613_v2 = vld [vmem:[#allocation11 + $0x218] sm:$0xff] }
 0x1c5   :  { %2464 = vmatpush3.bf16.msra.mxu0 %v1720_v23  ;;  %v1561_v23 = vld [vmem:[#allocation11 + $0x78] sm:$0xff]  ;;  %2479 = vmatprep.subr.bf16.mxu1 %v1741_v12  ;;  %v1750_v0 = vpack.c.bf16 %v1613_v2, %v1612_v13  ;;  %v1620_v13 = vld [vmem:[#allocation11 + $0x250] sm:$0xff] }
 0x1c6   :  { %2465 = vmatprep.subr.bf16.mxu0 %v1729_v32  ;;  %v1724_v32 = vpack.c.bf16 %v1561_v23, %v1560_v61  ;;  %v1614_v23 = vld [vmem:[#allocation11 + $0x220] sm:$0xff]  ;;  %v1633_v12 = vld [vmem:[#allocation11 + $0x2b8] sm:$0xff] }
 0x1c7   :  { %v1760_v15 = vpack.c.bf16 %v1633_v12, %v1632_v53  ;;  %v1621_v2 = vld [vmem:[#allocation11 + $0x258] sm:$0xff]  ;;  %v1640_v53 = vld [vmem:[#allocation11 + $0x2f0] sm:$0xff] }
 0x1c8   :  { %v1641_v12 = vld [vmem:[#allocation11 + $0x2f8] sm:$0xff] }
 0x1c9   :  { %2466 = vmatpush3.bf16.msra.mxu0 %v1721_v10  ;;  %v1626_v10 = vld [vmem:[#allocation11 + $0x280] sm:$0xff] }
 0x1ca   :  { %2467 = vmatprep.subr.bf16.mxu0 %v1730_v35  ;;  %v1627_v35 = vld [vmem:[#allocation11 + $0x288] sm:$0xff] }
 0x1cb   :  { %v1757_v56 = vpack.c.bf16 %v1627_v35, %v1626_v10  ;;  %v1616_v10 = vld [vmem:[#allocation11 + $0x230] sm:$0xff]  ;;  %v1617_v35 = vld [vmem:[#allocation11 + $0x238] sm:$0xff] }
 0x1cc   :  { %v1752_v54 = vpack.c.bf16 %v1617_v35, %v1616_v10  ;;  %v1624_v10 = vld [vmem:[#allocation11 + $0x270] sm:$0xff]  ;;  %v1625_v35 = vld [vmem:[#allocation11 + $0x278] sm:$0xff] }
 0x1cd   :  { %2468 = vmatpush3.bf16.msra.mxu0 %v1722_v8  ;;  %v1538_v8 = vld [vmem:[%s4267_s9] sm:$0xff] }
 0x1ce   :  { %2469 = vmatprep.subr.bf16.mxu0 %v1731_v6  ;;  %v1709_v6 = vpack.c.bf16 %v1538_v8, %v1538_v8  ;;  %v1635_v8 = vld [vmem:[#allocation11 + $0x2c8] sm:$0xff] }
 0x1d1   :  { %2470 = vmatpush3.bf16.msra.mxu0 %v1723_v5  ;;  %v1629_v5 = vld [vmem:[#allocation11 + $0x298] sm:$0xff] }
 0x1d2   :  { %2471 = vmatprep.subr.bf16.mxu0 %v1732_v39  ;;  %v1758_v7 = vpack.c.bf16 %v1629_v5, %v1628_v3  ;;  %v1631_v39 = vld [vmem:[#allocation11 + $0x2a8] sm:$0xff]  ;;  %v1636_v3 = vld [vmem:[#allocation11 + $0x2d0] sm:$0xff]  ;;  %v1637_v5 = vld [vmem:[#allocation11 + $0x2d8] sm:$0xff] }
 0x1d3   :  { %v1759_v61 = vpack.c.bf16 %v1631_v39, %v1630_v1  ;;  %v1638_v1 = vld [vmem:[#allocation11 + $0x2e0] sm:$0xff]  ;;  %v1639_v39 = vld [vmem:[#allocation11 + $0x2e8] sm:$0xff] }
 0x1d5   :  { %2472 = vmatpush3.bf16.msra.mxu0 %v1724_v32  ;;  %v1615_v32 = vld [vmem:[#allocation11 + $0x228] sm:$0xff] }
 0x1d6   :  { %2501 = vmatprep.subr.bf16.mxu0 %v1757_v56  ;;  %v1751_v11 = vpack.c.bf16 %v1615_v32, %v1614_v23  ;;  %v1634_v56 = vld [vmem:[#allocation11 + $0x2c0] sm:$0xff]  ;;  %v1623_v32 = vld [vmem:[#allocation11 + $0x268] sm:$0xff] }
 0x1d7   :  { %v1761_v20 = vpack.c.bf16 %v1635_v8, %v1634_v56  ;;  %v1622_v23 = vld [vmem:[#allocation11 + $0x260] sm:$0xff] }
 0x1d8   :  { %1820 = vmatmul.mubr.bf16.vlgmr.msra.gmra.mrb[8].mxu0 %v1709_v6  ;;  %v1619_v6 = vld [vmem:[#allocation11 + $0x248] sm:$0xff]  ;;  %v1543_v56 = vld [vmem:[%s4267_s9 + $0x28] sm:$0xff] }
 0x1d9   :  { %2502 = vmatpush3.bf16.msra.mxu0 %v1749_v4  ;;  %v1753_v4 = vpack.c.bf16 %v1619_v6, %v1618_v9  ;;  %v1714_v8 = vpack.c.bf16 %v1543_v56, %v1543_v56  ;;  %v2343_v6 = vld [vmem:[%s4268_s29] ss:$0 sm:$0xff] }
 0x1da   :  { %2503 = vmatprep.subr.bf16.mxu0 %v1758_v7  ;;  %v1762_v7 = vpack.c.bf16 %v1637_v5, %v1636_v3 }
 0x1db   :  { %1899 = vmatprep.mubr.bf16.mxu0 %v1714_v8 }
 0x1dd   :  { %2504 = vmatpush3.bf16.msra.mxu0 %v1750_v0  ;;  %v1754_v0 = vpack.c.bf16 %v1621_v2, %v1620_v13  ;;  %v1579_v13 = vld [vmem:[#allocation11 + $0x108] sm:$0xff]  ;;  %v1541_v2 = vld [vmem:[%s4267_s9 + $0x18] sm:$0xff] }
 0x1de   :  { %2505 = vmatprep.subr.bf16.mxu0 %v1759_v61  ;;  %v1763_v61 = vpack.c.bf16 %v1639_v39, %v1638_v1  ;;  %v1596_v1 = vld [vmem:[#allocation11 + $0x190] sm:$0xff]  ;;  %v1597_v39 = vld [vmem:[#allocation11 + $0x198] sm:$0xff] }
 0x1e1   :  { %2506 = vmatpush3.bf16.msra.mxu0 %v1751_v11  ;;  %v1755_v11 = vpack.c.bf16 %v1623_v32, %v1622_v23 }
 0x1e2   :  { %2507 = vmatprep.subr.bf16.mxu0 %v1760_v15  ;;  %v1764_v15 = vpack.c.bf16 %v1641_v12, %v1640_v53  ;;  %v1742_v12 = vpack.c.bf16 %v1597_v39, %v1596_v1 }
 0x1e5   :  { %2508 = vmatpush3.bf16.msra.mxu0 %v1752_v54  ;;  %v1756_v54 = vpack.c.bf16 %v1625_v35, %v1624_v10  ;;  %v1581_v10 = vld [vmem:[#allocation11 + $0x118] sm:$0xff]  ;;  %v1598_v35 = vld [vmem:[#allocation11 + $0x1a0] sm:$0xff] }
 0x1e6   :  { %2509 = vmatprep.subr.bf16.mxu0 %v1761_v20  ;;  %v1542_v20 = vld [vmem:[%s4267_s9 + $0x20] sm:$0xff] }
 0x1e7   :  { %v1713_v9 = vpack.c.bf16 %v1542_v20, %v1542_v20  ;;  %v1582_v20 = vld [vmem:[#allocation11 + $0x120] sm:$0xff] }
 0x1e9   :  { %2510 = vmatpush3.bf16.msra.mxu0 %v1753_v4 }
 0x1ea   :  { %2511 = vmatprep.subr.bf16.mxu0 %v1762_v7  ;;  %v1578_v7 = vld [vmem:[#allocation11 + $0x100] sm:$0xff] }
 0x1eb   :  { %v1733_v32 = vpack.c.bf16 %v1579_v13, %v1578_v7  ;;  %v1584_v7 = vld [vmem:[#allocation11 + $0x130] sm:$0xff]  ;;  %v1585_v13 = vld [vmem:[#allocation11 + $0x138] sm:$0xff] }
 0x1ec   :  { %v1736_v1 = vpack.c.bf16 %v1585_v13, %v1584_v7  ;;  %v1592_v7 = vld [vmem:[#allocation11 + $0x170] sm:$0xff]  ;;  %v1593_v13 = vld [vmem:[#allocation11 + $0x178] sm:$0xff] }
 0x1ed   :  { %2512 = vmatpush3.bf16.msra.mxu0 %v1754_v0 }
 0x1ee   :  { %2513 = vmatprep.subr.bf16.mxu0 %v1763_v61 }
 0x1f1   :  { %2514 = vmatpush3.bf16.msra.mxu0 %v1755_v11  ;;  %v1712_v11 = vpack.c.bf16 %v1541_v2, %v1541_v2  ;;  %v1602_v2 = vld [vmem:[#allocation11 + $0x1c0] sm:$0xff] }
 0x1f2   :  { %2515 = vmatprep.subr.bf16.mxu0 %v1764_v15  ;;  %v1580_v15 = vld [vmem:[#allocation11 + $0x110] sm:$0xff] }
 0x1f3   :  { %v1734_v56 = vpack.c.bf16 %v1581_v10, %v1580_v15  ;;  %v1588_v15 = vld [vmem:[#allocation11 + $0x150] sm:$0xff]  ;;  %v1589_v10 = vld [vmem:[#allocation11 + $0x158] sm:$0xff] }
 0x1f5   :  { %2516 = vmatpush3.bf16.msra.mxu0 %v1756_v54  ;;  %v1599_v54 = vld [vmem:[#allocation11 + $0x1a8] sm:$0xff] }
 0x1f6   :  { %2612 = vmatprep.subr.bf16.mxu0 %v4265_v14  ;;  %v1743_v8 = vpack.c.bf16 %v1599_v54, %v1598_v35  ;;  %v1606_v35 = vld [vmem:[#allocation11 + $0x1e0] sm:$0xff]  ;;  %v1607_v54 = vld [vmem:[#allocation11 + $0x1e8] sm:$0xff] }
 0x1f8   :  { %1900 = vmatmul.mubr.bf16.vlgmr.msra.gmra.mrb[12].mxu0 %v1713_v9  ;;  %v1583_v9 = vld [vmem:[#allocation11 + $0x128] sm:$0xff] }
 0x1f9   :  { %2628 = vmatprep.mubr.msk.bf16.mxu0 %vm2860_vm0, %v4265_v14 }
 0x28b   :  { %v624_v4 = vpop.f32.mrb[4].mxu0 }
 0x28c   :  { %v625_v3 = vadd.f32 %v2343_v6, %v624_v4  ;;  %v2590_v5 = vpop.f32.mrb[5].mxu0  ;;  %v1600_v6 = vld [vmem:[#allocation11 + $0x1b0] sm:$0xff]  ;;  %v1601_v4 = vld [vmem:[#allocation11 + $0x1b8] sm:$0xff] }
 0x28d   :  { %v627_v0 = vpop.f32.mrb[6].mxu0  ;;  %v1744_v5 = vpack.c.bf16 %v1601_v4, %v1600_v6  ;;  %v1608_v6 = vld [vmem:[#allocation11 + $0x1f0] sm:$0xff]  ;;  %v1609_v4 = vld [vmem:[#allocation11 + $0x1f8] sm:$0xff] }
 0x28e   :  { %v630_v61 = vmax.f32 %v625_v3, 0.0  ;;  %v2591_v23 = vpop.f32.mrb[7].mxu0  ;;  %v1735_v3 = vpack.c.bf16 %v1583_v9, %v1582_v20  ;;  %v1603_v0 = vld [vmem:[#allocation11 + $0x1c8] sm:$0xff]  ;;  %v1590_v20 = vld [vmem:[#allocation11 + $0x160] sm:$0xff] }
 0x28f   :  { %v1745_v39 = vpack.c.bf16 %v1603_v0, %v1602_v2  ;;  %v1587_v23 = vld [vmem:[#allocation11 + $0x148] sm:$0xff]  ;;  %v1658_v2 = vld [vmem:[#allocation11 + $0x380] sm:$0xff] }
 0x290   :  { %v631_v53 = vpack.c.bf16 %v630_v61, %v630_v61  ;;  %v1586_v61 = vld [vmem:[#allocation11 + $0x140] sm:$0xff]  ;;  %v1591_v9 = vld [vmem:[#allocation11 + $0x168] sm:$0xff] }
 0x291   :  { %v1659_v0 = vld [vmem:[#allocation11 + $0x388] sm:$0xff] }
 0x292   :  { %2609 = vmatmul.mubr.bf16.vlgmr.msra.gmra.mrb[12].mxu1 %v631_v53  ;;  %v1737_v53 = vpack.c.bf16 %v1587_v23, %v1586_v61  ;;  %v1773_v61 = vpack.c.bf16 %v1659_v0, %v1658_v2  ;;  %v1642_v23 = vld [vmem:[#allocation11 + $0x300] sm:$0xff]  ;;  %v1380_v2 = vmul.f32 0.001, %v3584_v46  ;;  %v1381_v0 = vmul.f32 0.001, %v3589_v47 }
 0x293   :  { %2480 = vmatpush3.bf16.msra.mxu1 %v1733_v32  ;;  %1859 = vmatprep.mubr.bf16.mxu1 %v1712_v11  ;;  %v1604_v32 = vld [vmem:[#allocation11 + $0x1d0] sm:$0xff]  ;;  %v1605_v11 = vld [vmem:[#allocation11 + $0x1d8] sm:$0xff] }
 0x294   :  { %2481 = vmatprep.subr.bf16.mxu1 %v1742_v12  ;;  %v1746_v12 = vpack.c.bf16 %v1605_v11, %v1604_v32  ;;  %v1643_v32 = vld [vmem:[#allocation11 + $0x308] sm:$0xff]  ;;  %v1545_v11 = vld [vmem:[%s4267_s9 + $0x38] sm:$0xff] }
 0x297   :  { %2482 = vmatpush3.bf16.msra.mxu1 %v1734_v56  ;;  %v1738_v56 = vpack.c.bf16 %v1589_v10, %v1588_v15  ;;  %v1765_v10 = vpack.c.bf16 %v1643_v32, %v1642_v23 }
 0x298   :  { %2483 = vmatprep.subr.bf16.mxu1 %v1743_v8  ;;  %v1747_v8 = vpack.c.bf16 %v1607_v54, %v1606_v35  ;;  %v1716_v35 = vpack.c.bf16 %v1545_v11, %v1545_v11 }
 0x29b   :  { %2484 = vmatpush3.bf16.msra.mxu1 %v1735_v3  ;;  %v1739_v3 = vpack.c.bf16 %v1591_v9, %v1590_v20  ;;  %v1775_v9 = vpack.c.bf16 %v3445_v41, %v3443_v40  ;;  %v1769_v40 = vpack.c.bf16 %v3505_v50, %v3503_v49  ;;  %v1778_v41 = vpack.c.bf16 %v3517_v17, %v3515_v16  ;;  %v1326_v49 = vld [vmem:[%s4209_s10] sm:$0x1] }
 0x29c   :  { %2485 = vmatprep.subr.bf16.mxu1 %v1744_v5  ;;  %v1748_v5 = vpack.c.bf16 %v1609_v4, %v1608_v6  ;;  %v1767_v6 = vpack.c.bf16 %v3457_v52, %v3455_v51  ;;  %v1776_v4 = vpack.c.bf16 %v3469_v63, %v3467_v62  ;;  %v1770_v51 = vpack.c.bf16 %v3529_v30, %v3527_v29  ;;  %v1328_v50 = vld [vmem:[%s4266_s11] sm:$0x1] }
 0x29d   :  { %v1779_v52 = vpack.c.bf16 %v3541_v45, %v3539_v44  ;;  %v1771_v62 = vpack.c.bf16 %v3553_v60, %v3551_v59  ;;  %v1780_v63 = vpack.c.bf16 %v3565_v31, %v3563_v28  ;;  %v1327_v16 = vmul.f32 0.999, %v1326_v49  ;;  %v1332_v31 = vld [vmem:[#allocation9] sm:$0xff]  ;;  %v1343_v49 = vld [vmem:[#allocation9 + $0x58] sm:$0xff] }
 0x29e   :  { %v1329_v17 = vmul.f32 0.001, %v1328_v50 }
 0x29f   :  { %2486 = vmatpush3.bf16.msra.mxu1 %v1736_v1  ;;  %v1740_v1 = vpack.c.bf16 %v1593_v13, %v1592_v7  ;;  %v1348_v7 = vmul.f32 0.999, %v1332_v31 }
 0x2a0   :  { %2487 = vmatprep.subr.bf16.mxu1 %v1745_v39  ;;  %v1540_v39 = vld [vmem:[%s4267_s9 + $0x10] sm:$0xff]  ;;  %v1330_v45 = vadd.f32 %v1329_v17, %v1327_v16  ;;  %v1359_v16 = vmul.f32 0.999, %v1343_v49  ;;  %v1390_v17 = vmul.f32 0.001, %v3650_v24  ;;  %v1470_v49 = vld [vmem:[%s4264_s2 + $0x20] sm:$0xff] }
 0x2a1   :  { %v1711_v15 = vpack.c.bf16 %v1540_v39, %v1540_v39  ;;  %v1335_v39 = vld [vmem:[#allocation9 + $0x18] sm:$0xff]  ;;  %v1396_v23 = vadd.f32 %v1380_v2, %v1348_v7  ;;  %v1392_v7 = vmul.f32 0.001, %v3664_v33 }
 0x2a2   :  { %1331 = vst [vmem:[#allocation12] sm:$0x1] %v1330_v45  ;;  %v1351_v11 = vmul.f32 0.999, %v1335_v39  ;;  %v1347_v39 = vld [vmem:[#allocation9 + $0x78] sm:$0xff] }
 0x2a3   :  { %2488 = vmatpush3.bf16.msra.mxu1 %v1737_v53  ;;  %v1660_v53 = vld [vmem:[#allocation11 + $0x390] sm:$0xff]  ;;  %1412 = vst [vmem:[#allocation14] sm:$0xff] %v1396_v23 }
 0x2a4   :  { %2489 = vmatprep.subr.bf16.mxu1 %v1746_v12  ;;  %v1661_v12 = vld [vmem:[#allocation11 + $0x398] sm:$0xff] }
 0x2a5   :  { %v1774_v54 = vpack.c.bf16 %v1661_v12, %v1660_v53  ;;  %v1383_v53 = vmul.f32 0.001, %v3602_v55  ;;  %v1386_v55 = vmul.f32 0.001, %v3624_v18 }
 0x2a7   :  { %2490 = vmatpush3.bf16.msra.mxu1 %v1738_v56  ;;  %v1644_v56 = vld [vmem:[#allocation11 + $0x310] sm:$0xff] }
 0x2a8   :  { %2491 = vmatprep.subr.bf16.mxu1 %v1747_v8  ;;  %v1645_v8 = vld [vmem:[#allocation11 + $0x318] sm:$0xff] }
 0x2a9   :  { %v1766_v20 = vpack.c.bf16 %v1645_v8, %v1644_v56  ;;  %v1399_v56 = vadd.f32 %v1383_v53, %v1351_v11  ;;  %v4269_v53 = vld [vmem:[#allocation43_spill] sm:$0xff] }
 0x2ab   :  { %2492 = vmatpush3.bf16.msra.mxu1 %v1739_v3  ;;  %v1768_v3 = vpack.c.bf16 %v3481_v26, %v3479_v25  ;;  %v1772_v25 = vpack.c.bf16 %v3577_v43, %v3575_v42  ;;  %v1544_v26 = vld [vmem:[%s4267_s9 + $0x30] sm:$0xff]  ;;  %1415 = vst [vmem:[#allocation14 + $0x18] sm:$0xff] %v1399_v56  ;;  %s4270_s9 = sld [smem:[#allocation52_spill]] }
 0x2ac   :  { %2493 = vmatprep.subr.bf16.mxu1 %v1748_v5  ;;  %v1777_v5 = vpack.c.bf16 %v3493_v37, %v3491_v36  ;;  %v1715_v36 = vpack.c.bf16 %v1544_v26, %v1544_v26  ;;  %v2473_v37 = vpop.f32.mrb[8].mxu0  ;;  %v1333_v42 = vld [vmem:[#allocation9 + $0x8] sm:$0xff]  ;;  %v1388_v26 = vmul.f32 0.001, %v3637_v21 }
 0x2ad   :  { %v2474_v29 = vpop.f32.mrb[9].mxu0  ;;  %v1349_v13 = vmul.f32 0.999, %v1333_v42 }
 0x2ae   :  { %v3811_v30 = vadd.f32 %v2474_v29, %v2473_v37  ;;  %v2476_v44 = vpop.f32.mrb[10].mxu0  ;;  %v1391_v29 = vmul.f32 0.001, %v3655_v27 }
 0x2af   :  { %2494 = vmatpush3.bf16.msra.mxu1 %v1740_v1  ;;  %v2477_v59 = vpop.f32.mrb[11].mxu0  ;;  %v1334_v1 = vld [vmem:[#allocation9 + $0x10] sm:$0xff]  ;;  %v1397_v12 = vadd.f32 %v1381_v0, %v1349_v13  ;;  %v1393_v13 = vmul.f32 0.001, %v3669_v34 }
 0x2b0   :  { %2523 = vmatprep.subr.bf16.mxu1 %v1773_v61  ;;  %v1382_v61 = vmul.f32 0.001, %v3594_v48  ;;  %v1350_v32 = vmul.f32 0.999, %v1334_v1  ;;  %v1407_v59 = vadd.f32 %v1391_v29, %v1359_v16  ;;  %v1346_v1 = vld [vmem:[#allocation9 + $0x70] sm:$0xff]  ;;  %v1471_v16 = vld [vmem:[%s4264_s2 + $0x28] sm:$0xff] }
 0x2b1   :  { %1413 = vst [vmem:[#allocation14 + $0x8] sm:$0xff] %v1397_v12  ;;  %v1949_v48 = vpack.c.bf16 %v1397_v12, %v1396_v23  ;;  %v1363_v23 = vmul.f32 0.999, %v1347_v39  ;;  %v1395_v12 = vmul.f32 0.001, %v4269_v53 }
 0x2b2   :  { %1860 = vmatmul.mubr.bf16.vlgmr.msra.gmra.mrb[16].mxu1 %v1711_v15  ;;  %v1336_v15 = vld [vmem:[#allocation9 + $0x20] sm:$0xff]  ;;  %v1398_v46 = vadd.f32 %v1382_v61, %v1350_v32  ;;  %1423 = vst [vmem:[#allocation14 + $0x58] sm:$0xff] %v1407_v59  ;;  %v1362_v61 = vmul.f32 0.999, %v1346_v1  ;;  %v1394_v32 = vmul.f32 0.001, %v3677_v38 }
 0x2b3   :  { %2524 = vmatpush3.bf16.msra.mxu1 %v1765_v10  ;;  %1939 = vmatprep.mubr.bf16.mxu1 %v1716_v35  ;;  %v1337_v10 = vld [vmem:[#allocation9 + $0x28] sm:$0xff]  ;;  %v1384_v35 = vmul.f32 0.001, %v3611_v57  ;;  %v1352_v47 = vmul.f32 0.999, %v1336_v15  ;;  %v1411_v33 = vadd.f32 %v1395_v12, %v1363_v23  ;;  %v1475_v23 = vld [vmem:[%s4264_s2 + $0x48] sm:$0xff] }
 0x2b4   :  { %2525 = vmatprep.subr.bf16.mxu1 %v1774_v54  ;;  %v1385_v54 = vmul.f32 0.001, %v3616_v58  ;;  %v1353_v8 = vmul.f32 0.999, %v1337_v10  ;;  %1414 = vst [vmem:[#allocation14 + $0x10] sm:$0xff] %v1398_v46  ;;  %2613 = vmatpush3.bf16.msra.mxu0 %v1949_v48  ;;  %v1410_v15 = vadd.f32 %v1394_v32, %v1362_v61  ;;  %v1466_v48 = vld [vmem:[%s4264_s2] sm:$0xff] }
 0x2b5   :  { %v1387_v58 = vmul.f32 0.001, %v3629_v19  ;;  %2614 = vmatprep.subr.bf16.mxu0 %v4265_v14  ;;  %1427 = vst [vmem:[#allocation14 + $0x78] sm:$0xff] %v1411_v33  ;;  %v2344_v10 = vld [vmem:[%s4270_s9] ss:$0 sm:$0xff]  ;;  %v1444_v32 = vld [vmem:[%s4212_s13 + $0x50] sm:$0xff] }
 0x2b6   :  { %v1401_v57 = vadd.f32 %v1385_v54, %v1353_v8  ;;  %1426 = vst [vmem:[#allocation14 + $0x70] sm:$0xff] %v1410_v15  ;;  %v1956_v34 = vpack.c.bf16 %v1411_v33, %v1410_v15  ;;  %v1491_v15 = vmul.f32 0.001, %v1475_v23  ;;  %v1445_v33 = vld [vmem:[%s4212_s13 + $0x58] sm:$0xff] }
 0x2b7   :  { %2526 = vmatpush3.bf16.msra.mxu1 %v1766_v20  ;;  %v1338_v20 = vld [vmem:[#allocation9 + $0x30] sm:$0xff] }
 0x2b8   :  { %2527 = vmatprep.subr.bf16.mxu1 %v1775_v9  ;;  %v1339_v9 = vld [vmem:[#allocation9 + $0x38] sm:$0xff]  ;;  %1417 = vst [vmem:[#allocation14 + $0x28] sm:$0xff] %v1401_v57 }
 0x2bb   :  { %2528 = vmatpush3.bf16.msra.mxu1 %v1767_v6  ;;  %v1354_v6 = vmul.f32 0.999, %v1338_v20  ;;  %v1434_v20 = vld [vmem:[%s4212_s13] sm:$0xff] }
 0x2bc   :  { %2529 = vmatprep.subr.bf16.mxu1 %v1776_v4  ;;  %v1355_v4 = vmul.f32 0.999, %v1339_v9  ;;  %v1435_v9 = vld [vmem:[%s4212_s13 + $0x8] sm:$0xff] }
 0x2be   :  { %v1403_v18 = vadd.f32 %v1387_v58, %v1355_v4  ;;  %v1451_v4 = vmul.f32 0.999, %v1435_v9  ;;  %v1437_v58 = vld [vmem:[%s4212_s13 + $0x18] sm:$0xff] }
 0x2bf   :  { %2530 = vmatpush3.bf16.msra.mxu1 %v1768_v3  ;;  %v1950_v3 = vpack.c.bf16 %v1399_v56, %v1398_v46 }
 0x2c0   :  { %2531 = vmatprep.subr.bf16.mxu1 %v1777_v5  ;;  %v1400_v5 = vadd.f32 %v1384_v35, %v1352_v47  ;;  %1419 = vst [vmem:[#allocation14 + $0x38] sm:$0xff] %v1403_v18 }
 0x2c1   :  { %2615 = vmatpush3.bf16.msra.mxu0 %v1950_v3  ;;  %v1436_v3 = vld [vmem:[%s4212_s13 + $0x10] sm:$0xff] }
 0x2c2   :  { %1416 = vst [vmem:[#allocation14 + $0x20] sm:$0xff] %v1400_v5  ;;  %v1951_v21 = vpack.c.bf16 %v1401_v57, %v1400_v5  ;;  %2616 = vmatprep.subr.bf16.mxu0 %v4265_v14  ;;  %v1482_v5 = vmul.f32 0.001, %v1466_v48  ;;  %v1428_v48 = vld [vmem:[%s4211_s12] sm:$0x1] }
 0x2c3   :  { %2532 = vmatpush3.bf16.msra.mxu1 %v1769_v40  ;;  %v1340_v40 = vld [vmem:[#allocation9 + $0x40] sm:$0xff] }
 0x2c4   :  { %2533 = vmatprep.subr.bf16.mxu1 %v1778_v41  ;;  %v1341_v41 = vld [vmem:[#allocation9 + $0x48] sm:$0xff] }
 0x2c5   :  { %2617 = vmatpush3.bf16.msra.mxu0 %v1951_v21  ;;  %v1486_v21 = vmul.f32 0.001, %v1470_v49 }
 0x2c6   :  { %2618 = vmatprep.subr.bf16.mxu0 %v4265_v14 }
 0x2c7   :  { %2534 = vmatpush3.bf16.msra.mxu1 %v1770_v51 }
 0x2c8   :  { %2535 = vmatprep.subr.bf16.mxu1 %v1779_v52  ;;  %v1342_v52 = vld [vmem:[#allocation9 + $0x50] sm:$0xff] }
 0x2c9   :  { %v1358_v19 = vmul.f32 0.999, %v1342_v52  ;;  %v1469_v52 = vld [vmem:[%s4264_s2 + $0x18] sm:$0xff] }
 0x2cb   :  { %2536 = vmatpush3.bf16.msra.mxu1 %v1771_v62  ;;  %v2517_v60 = vpop.f32.mrb[12].mxu0  ;;  %v1402_v62 = vadd.f32 %v1386_v55, %v1354_v6  ;;  %v1406_v45 = vadd.f32 %v1390_v17, %v1358_v19  ;;  %v1450_v6 = vmul.f32 0.999, %v1434_v20  ;;  %v1467_v55 = vld [vmem:[%s4264_s2 + $0x8] sm:$0xff]  ;;  %v1440_v17 = vld [vmem:[%s4212_s13 + $0x30] sm:$0xff]  ;;  %v1477_v20 = vld [vmem:[%s4264_s2 + $0x58] sm:$0xff] }
 0x2cc   :  { %2537 = vmatprep.subr.bf16.mxu1 %v1780_v63  ;;  %v2518_v28 = vpop.f32.mrb[13].mxu0  ;;  %v1356_v63 = vmul.f32 0.999, %v1340_v40  ;;  %v1483_v57 = vmul.f32 0.001, %v1467_v55  ;;  %v1468_v40 = vld [vmem:[%s4264_s2 + $0x10] sm:$0xff] }
 0x2cd   :  { %v3813_v43 = vadd.f32 %v2518_v28, %v2517_v60  ;;  %v2520_v51 = vpop.f32.mrb[14].mxu0  ;;  %1418 = vst [vmem:[#allocation14 + $0x30] sm:$0xff] %v1402_v62  ;;  %1422 = vst [vmem:[#allocation14 + $0x50] sm:$0xff] %v1406_v45  ;;  %v1954_v27 = vpack.c.bf16 %v1407_v59, %v1406_v45  ;;  %v1344_v60 = vld [vmem:[#allocation9 + $0x60] sm:$0xff]  ;;  %v1345_v28 = vld [vmem:[#allocation9 + $0x68] sm:$0xff] }
 0x2ce   :  { %v2521_v37 = vpop.f32.mrb[15].mxu0  ;;  %v1404_v50 = vadd.f32 %v1388_v26, %v1356_v63  ;;  %v1360_v31 = vmul.f32 0.999, %v1344_v60  ;;  %v1361_v42 = vmul.f32 0.999, %v1345_v28  ;;  %v1499_v26 = vadd.f32 %v1483_v57, %v1451_v4  ;;  %v1441_v59 = vld [vmem:[%s4212_s13 + $0x38] sm:$0xff] }
 0x2cf   :  { %2538 = vmatpush3.bf16.msra.mxu1 %v1772_v25  ;;  %v1357_v25 = vmul.f32 0.999, %v1341_v41  ;;  %v1452_v41 = vmul.f32 0.999, %v1436_v3  ;;  %v1453_v51 = vmul.f32 0.999, %v1437_v58 }
 0x2d0   :  { %2632 = vmatprep.subr.bf16.mxu1 %v4265_v14  ;;  %1420 = vst [vmem:[#allocation14 + $0x40] sm:$0xff] %v1404_v50  ;;  %v1408_v2 = vadd.f32 %v1392_v7, %v1360_v31  ;;  %v1409_v0 = vadd.f32 %v1393_v13, %v1361_v42  ;;  %v2345_v63 = vld [vmem:[#allocation12] ss:$0 sm:$0xff]  ;;  %1516 = vst.msk [vmem:[%s4221_s22 + $0x8] sm:$0xff] %vm1514_vm1, %v1499_v26  ;;  %v1487_v45 = vmul.f32 0.001, %v1471_v16 }
 0x2d1   :  { %v1439_v37 = vld [vmem:[%s4212_s13 + $0x28] sm:$0xff]  ;;  %v1473_v60 = vld [vmem:[%s4264_s2 + $0x38] sm:$0xff]  ;;  %v1442_v28 = vld [vmem:[%s4212_s13 + $0x40] sm:$0xff]  ;;  %v1822_v1 = vadd.f32 %v3811_v30, %v2345_v63  ;;  %v1493_v3 = vmul.f32 0.001, %v1477_v20 }
 0x2d2   :  { %1940 = vmatmul.mubr.bf16.vlgmr.msra.gmra.mrb[20].mxu1 %v1715_v36  ;;  %v1389_v36 = vmul.f32 0.001, %v3642_v22  ;;  %v1952_v22 = vpack.c.bf16 %v1403_v18, %v1402_v62  ;;  %1424 = vst [vmem:[#allocation14 + $0x60] sm:$0xff] %v1408_v2  ;;  %1425 = vst [vmem:[#allocation14 + $0x68] sm:$0xff] %v1409_v0  ;;  %v1955_v11 = vpack.c.bf16 %v1409_v0, %v1408_v2  ;;  %v1438_v62 = vld [vmem:[%s4212_s13 + $0x20] sm:$0xff]  ;;  %v1443_v2 = vld [vmem:[%s4212_s13 + $0x48] sm:$0xff] }
 0x2d3   :  { %2648 = vmatprep.mubr.msk.bf16.mxu1 %vm2860_vm0, %v4265_v14  ;;  %v1484_v18 = vmul.f32 0.001, %v1468_v40  ;;  %v1454_v19 = vmul.f32 0.999, %v1438_v62  ;;  %v1489_v13 = vmul.f32 0.001, %v1473_v60 }
 0x2d4   :  { %v1405_v44 = vadd.f32 %v1389_v36, %v1357_v25  ;;  %2619 = vmatpush3.bf16.msra.mxu0 %v1952_v22  ;;  %v1498_v25 = vadd.f32 %v1482_v5, %v1450_v6  ;;  %v1485_v36 = vmul.f32 0.001, %v1469_v52  ;;  %v1472_v22 = vld [vmem:[%s4264_s2 + $0x30] sm:$0xff]  ;;  %v1474_v0 = vld [vmem:[%s4264_s2 + $0x40] sm:$0xff]  ;;  %v1458_v39 = vmul.f32 0.999, %v1442_v28 }
 0x2d5   :  { %2620 = vmatprep.subr.bf16.mxu0 %v4265_v14  ;;  %v1500_v29 = vadd.f32 %v1484_v18, %v1452_v41  ;;  %v1502_v31 = vadd.f32 %v1486_v21, %v1454_v19  ;;  %v1488_v7 = vmul.f32 0.001, %v1472_v22  ;;  %v1459_v61 = vmul.f32 0.999, %v1443_v2  ;;  %v1430_v41 = vld [vmem:[%s4268_s29] sm:$0x1] }
 0x2d6   :  { %1421 = vst [vmem:[#allocation14 + $0x48] sm:$0xff] %v1405_v44  ;;  %v1953_v24 = vpack.c.bf16 %v1405_v44, %v1404_v50  ;;  %v1455_v50 = vmul.f32 0.999, %v1439_v37  ;;  %1515 = vst.msk [vmem:[%s4221_s22] sm:$0xff] %vm1514_vm1, %v1498_v25  ;;  %v1501_v44 = vadd.f32 %v1485_v36, %v1453_v51  ;;  %v1490_v12 = vmul.f32 0.001, %v1474_v0 }
 0x2d7   :  { %1517 = vst.msk [vmem:[%s4221_s22 + $0x10] sm:$0xff] %vm1514_vm1, %v1500_v29  ;;  %1519 = vst.msk [vmem:[%s4221_s22 + $0x20] sm:$0xff] %vm1514_vm1, %v1502_v31  ;;  %v1693_v55 = vld [vmem:[%s4221_s22 + $0x8] sm:$0xff]  ;;  %v1429_v40 = vmul.f32 0.999, %v1428_v48  ;;  %v1478_v2 = vld [vmem:[%s4264_s2 + $0x60] sm:$0xff] }
 0x2d8   :  { %2621 = vmatpush3.bf16.msra.mxu0 %v1953_v24  ;;  %v1456_v24 = vmul.f32 0.999, %v1440_v17  ;;  %1518 = vst.msk [vmem:[%s4221_s22 + $0x18] sm:$0xff] %vm1514_vm1, %v1501_v44  ;;  %v1503_v42 = vadd.f32 %v1487_v45, %v1455_v50  ;;  %v1431_v63 = vmul.f32 0.001, %v1430_v41 }
 0x2d9   :  { %2622 = vmatprep.subr.bf16.mxu0 %v4265_v14 }
 0x2da   :  { %1520 = vst.msk [vmem:[%s4221_s22 + $0x28] sm:$0xff] %vm1514_vm1, %v1503_v42  ;;  %v1504_v30 = vadd.f32 %v1488_v7, %v1456_v24  ;;  %v1446_v7 = vld [vmem:[%s4212_s13 + $0x60] sm:$0xff] }
 0x2db   :  { %v1462_v0 = vmul.f32 0.999, %v1446_v7 }
 0x2dc   :  { %2623 = vmatpush3.bf16.msra.mxu0 %v1954_v27  ;;  %v1457_v27 = vmul.f32 0.999, %v1441_v59  ;;  %1521 = vst.msk [vmem:[%s4221_s22 + $0x30] sm:$0xff] %vm1514_vm1, %v1504_v30  ;;  %v1448_v30 = vld [vmem:[%s4212_s13 + $0x70] sm:$0xff] }
 0x2dd   :  { %2624 = vmatprep.subr.bf16.mxu0 %v4265_v14  ;;  %v1692_v4 = vld [vmem:[%s4221_s22] sm:$0xff] }
 0x2de   :  { %v1505_v53 = vadd.f32 %v1489_v13, %v1457_v27  ;;  %v2005_v57 = vpack.c.bf16 %v1693_v55, %v1692_v4  ;;  %v1694_v51 = vld [vmem:[%s4221_s22 + $0x10] sm:$0xff]  ;;  %v1696_v18 = vld [vmem:[%s4221_s22 + $0x20] sm:$0xff]  ;;  %v1447_v13 = vld [vmem:[%s4212_s13 + $0x68] sm:$0xff] }
 0x2df   :  { %v1695_v52 = vld [vmem:[%s4221_s22 + $0x18] sm:$0xff]  ;;  %v1533_v4 = vld [vmem:[%s4270_s9] sm:$0x1] }
 0x2e0   :  { %2625 = vmatpush3.bf16.msra.mxu0 %v1955_v11  ;;  %1522 = vst.msk [vmem:[%s4221_s22 + $0x38] sm:$0xff] %vm1514_vm1, %v1505_v53  ;;  %2633 = vmatpush3.bf16.msra.mxu1 %v2005_v57  ;;  %v2006_v26 = vpack.c.bf16 %v1695_v52, %v1694_v51  ;;  %v1449_v53 = vld [vmem:[%s4212_s13 + $0x78] sm:$0xff] }
 0x2e1   :  { %2626 = vmatprep.subr.bf16.mxu0 %v4265_v14  ;;  %2634 = vmatprep.subr.bf16.mxu1 %v4265_v14  ;;  %v1697_v36 = vld [vmem:[%s4221_s22 + $0x28] sm:$0xff] }
 0x2e2   :  { %v2007_v37 = vpack.c.bf16 %v1697_v36, %v1696_v18 }
 0x2e3   :  { %v1698_v49 = vld [vmem:[%s4221_s22 + $0x30] sm:$0xff] }
 0x2e4   :  { %2627 = vmatpush3.bf16.msra.mxu0 %v1956_v34  ;;  %2635 = vmatpush3.bf16.msra.mxu1 %v2006_v26 }
 0x2e5   :  { %2636 = vmatprep.subr.bf16.mxu1 %v4265_v14  ;;  %2652 = vmatprep.subr.bf16.mxu0 %v4265_v14 }
 0x2e7   :  { %v1699_v19 = vld [vmem:[%s4221_s22 + $0x38] sm:$0xff] }
 0x2e8   :  { %2637 = vmatpush3.bf16.msra.mxu1 %v2007_v37  ;;  %v2008_v50 = vpack.c.bf16 %v1699_v19, %v1698_v49 }
 0x2e9   :  { %2638 = vmatprep.subr.bf16.mxu1 %v4265_v14 }
 0x2ec   :  { %2639 = vmatpush3.bf16.msra.mxu1 %v2008_v50 }
 0x2ed   :  { %2640 = vmatprep.subr.bf16.mxu1 %v4265_v14 }
 0x365   :  { %v680_v35 = vpop.f32.mrb[12].mxu1 }
 0x366   :  { %v3841_v54 = vadd.f32 %v2344_v10, %v680_v35  ;;  %v2610_v38 = vpop.f32.mrb[13].mxu1  ;;  %v1460_v10 = vmul.f32 0.999, %v1444_v32  ;;  %v1461_v35 = vmul.f32 0.999, %v1445_v33 }
 0x367   :  { %v683_v46 = vpop.f32.mrb[14].mxu1  ;;  %v1476_v38 = vld [vmem:[%s4264_s2 + $0x50] sm:$0xff]  ;;  %v1465_v33 = vmul.f32 0.999, %v1449_v53 }
 0x368   :  { %v2611_v56 = vpop.f32.mrb[15].mxu1  ;;  %v2059_v47 = vmul.f32 %v3841_v54, %v3841_v54  ;;  %v1492_v9 = vmul.f32 0.001, %v1476_v38  ;;  %v1509_v62 = vadd.f32 %v1493_v3, %v1461_v35  ;;  %v1534_v3 = vmul.f32 0.001, %v1533_v4 }
 0x36a   :  { %v2060_v8 = vsel %vm1514_vm1, %v2059_v47, 0.0  ;;  %v1506_v47 = vadd.f32 %v1490_v12, %v1458_v39  ;;  %v1508_v58 = vadd.f32 %v1492_v9, %v1460_v10  ;;  %1526 = vst.msk [vmem:[%s4221_s22 + $0x58] sm:$0xff] %vm1514_vm1, %v1509_v62  ;;  %v1479_v39 = vld [vmem:[%s4264_s2 + $0x68] sm:$0xff]  ;;  %v1480_v12 = vld [vmem:[%s4264_s2 + $0x70] sm:$0xff] }
 0x36b   :  { %2061 = vadd.xlane.f32.xlu0 %v2060_v8  ;;  %v1507_v8 = vadd.f32 %v1491_v15, %v1459_v61  ;;  %v1494_v61 = vmul.f32 0.001, %v1478_v2  ;;  %v1495_v23 = vmul.f32 0.001, %v1479_v39  ;;  %v1464_v15 = vmul.f32 0.999, %v1448_v30 }
 0x36c   :  { %1523 = vst.msk [vmem:[%s4221_s22 + $0x40] sm:$0xff] %vm1514_vm1, %v1506_v47  ;;  %1525 = vst.msk [vmem:[%s4221_s22 + $0x50] sm:$0xff] %vm1514_vm1, %v1508_v58  ;;  %v1496_v10 = vmul.f32 0.001, %v1480_v12 }
 0x36d   :  { %1524 = vst.msk [vmem:[%s4221_s22 + $0x48] sm:$0xff] %vm1514_vm1, %v1507_v8  ;;  %v1510_v32 = vadd.f32 %v1494_v61, %v1462_v0 }
 0x36e   :  { %v1512_v38 = vadd.f32 %v1496_v10, %v1464_v15 }
 0x36f   :  { %1527 = vst.msk [vmem:[%s4221_s22 + $0x60] sm:$0xff] %vm1514_vm1, %v1510_v32 }
 0x370   :  { %1529 = vst.msk [vmem:[%s4221_s22 + $0x70] sm:$0xff] %vm1514_vm1, %v1512_v38 }
 0x371   :  { %v1703_v21 = vld [vmem:[%s4221_s22 + $0x58] sm:$0xff] }
 0x373   :  { %v1700_v16 = vld [vmem:[%s4221_s22 + $0x40] sm:$0xff]  ;;  %v1702_v44 = vld [vmem:[%s4221_s22 + $0x50] sm:$0xff] }
 0x374   :  { %v1701_v17 = vld [vmem:[%s4221_s22 + $0x48] sm:$0xff]  ;;  %v2010_v45 = vpack.c.bf16 %v1703_v21, %v1702_v44 }
 0x375   :  { %v2009_v29 = vpack.c.bf16 %v1701_v17, %v1700_v16 }
 0x377   :  { %2641 = vmatpush3.bf16.msra.mxu1 %v2009_v29  ;;  %v1706_v20 = vld [vmem:[%s4221_s22 + $0x70] sm:$0xff] }
 0x378   :  { %2642 = vmatprep.subr.bf16.mxu1 %v4265_v14 }
 0x37b   :  { %2643 = vmatpush3.bf16.msra.mxu1 %v2010_v45 }
 0x37c   :  { %2644 = vmatprep.subr.bf16.mxu1 %v4265_v14 }
 0x385   :  { %v2495_v11 = vpop.f32.mrb[16].mxu1 }
 0x386   :  { %v2496_v34 = vpop.f32.mrb[17].mxu1 }
 0x387   :  { %v2497_v46 = vadd.f32 %v2496_v34, %v2495_v11  ;;  %v2498_v56 = vpop.f32.mrb[18].mxu1  ;;  %v1481_v34 = vld [vmem:[%s4264_s2 + $0x78] sm:$0xff] }
 0x388   :  { %v2499_v6 = vpop.f32.mrb[19].mxu1  ;;  %v1497_v35 = vmul.f32 0.001, %v1481_v34  ;;  %v1704_v56 = vld [vmem:[%s4221_s22 + $0x60] sm:$0xff] }
 0x389   :  { %v1862_v5 = vadd.f32 %v2497_v46, %v1822_v1  ;;  %v1463_v1 = vmul.f32 0.999, %v1447_v13  ;;  %v1531_v6 = vld [vmem:[%s4213_s14] sm:$0x1] }
 0x38a   :  { %v1513_v46 = vadd.f32 %v1497_v35, %v1465_v33  ;;  %v1532_v55 = vmul.f32 0.999, %v1531_v6 }
 0x38b   :  { %v1902_v25 = vadd.f32 %v3813_v43, %v1862_v5  ;;  %v1432_v43 = vadd.f32 %v1431_v63, %v1429_v40  ;;  %v1511_v11 = vadd.f32 %v1495_v23, %v1463_v1 }
 0x38c   :  { %1530 = vst.msk [vmem:[%s4221_s22 + $0x78] sm:$0xff] %vm1514_vm1, %v1513_v46  ;;  %v1535_v5 = vadd.f32 %v1534_v3, %v1532_v55 }
 0x38d   :  { %1433 = vst [vmem:[#allocation15] sm:$0x1] %v1432_v43  ;;  %1528 = vst.msk [vmem:[%s4221_s22 + $0x68] sm:$0xff] %vm1514_vm1, %v1511_v11 }
 0x38e   :  { %1537 = vst.msk [vmem:[#allocation17] sm:$0x1] %vm1536_vm2, %v1535_v5 }
 0x393   :  { %v1707_v9 = vld [vmem:[%s4221_s22 + $0x78] sm:$0xff] }
 0x394   :  { %v1705_v47 = vld [vmem:[%s4221_s22 + $0x68] sm:$0xff]  ;;  %v2012_v48 = vpack.c.bf16 %v1707_v9, %v1706_v20 }
 0x395   :  { %v2011_v8 = vpack.c.bf16 %v1705_v47, %v1704_v56  ;;  %v2346_v57 = vld [vmem:[#allocation15] ss:$0 sm:$0xff] }
 0x397   :  { %2645 = vmatpush3.bf16.msra.mxu1 %v2011_v8 }
 0x398   :  { %2646 = vmatprep.subr.bf16.mxu1 %v4265_v14 }
 0x39b   :  { %2647 = vmatpush3.bf16.msra.mxu1 %v2012_v48 }
 0x3a5   :  { %v2539_v59 = vpop.f32.mrb[20].mxu1 }
 0x3a6   :  { %v2540_v22 = vpop.f32.mrb[21].mxu1 }
 0x3a7   :  { %v2541_v24 = vadd.f32 %v2540_v22, %v2539_v59  ;;  %v2542_v27 = vpop.f32.mrb[22].mxu1 }
 0x3a8   :  { %v2543_v60 = vpop.f32.mrb[23].mxu1 }
 0x3a9   :  { %v1942_v28 = vadd.f32 %v2541_v24, %v1902_v25  ;;  %v2347_v25 = vld [vmem:[#allocation17] ss:$0 sm:$0xff] }
 0x3ab   :  { %v1947_v31 = vmax.f32 %v1942_v28, 0.0  ;;  %v4271_v28 = vld [vmem:[#allocation27_spill] sm:$0xff] }
 0x3ad   :  { %v1948_v42 = vpack.c.bf16 %v1947_v31, %v1947_v31  ;;  %v4272_v31 = vld [vmem:[#allocation28_spill] sm:$0xff] }
 0x3af   :  { %2629 = vmatmul.mubr.bf16.vlgmr.msra.gmra.mrb[16].mxu0 %v1948_v42  ;;  %v2100_v42 = vpack.c.bf16 %v4272_v31, %v4271_v28 }
 0x3f8   :  { %v2062_v50 = vpop.xlane.xlu0 %2061 }
 0x3f9   :  { %v2063_v16 = vmax.f32 %v2062_v50, 1e-24 }
 0x3fb   :  { %2683 = vrsqrt.f32 %v2063_v16 }
 0x405   :  { %v2684_v44 = vpop.eup %2683 }
 0x406   :  { %v2065_v45 = vmul.f32 %v2684_v44, %v3841_v54 }
 0x482   :  { %v1997_v58 = vpop.f32.mrb[16].mxu0 }
 0x483   :  { %v1998_v40 = vadd.f32 %v2346_v57, %v1997_v58  ;;  %v2630_v41 = vpop.f32.mrb[17].mxu0 }
 0x484   :  { %v2000_v51 = vpop.f32.mrb[18].mxu0 }
 0x485   :  { %v2003_v52 = vmax.f32 %v1998_v40, 0.0  ;;  %v2631_v62 = vpop.f32.mrb[19].mxu0 }
 0x487   :  { %v2004_v63 = vpack.c.bf16 %v2003_v52, %v2003_v52 }
 0x489   :  { %2649 = vmatmul.mubr.bf16.vlgmr.msra.gmra.mrb[24].mxu1 %v2004_v63 }
 0x55c   :  { %v2053_v26 = vpop.f32.mrb[24].mxu1 }
 0x55d   :  { %v2054_v18 = vadd.f32 %v2347_v25, %v2053_v26  ;;  %v2650_v36 = vpop.f32.mrb[25].mxu1 }
 0x55e   :  { %v2056_v43 = vpop.f32.mrb[26].mxu1 }
 0x55f   :  { %v2651_v37 = vpop.f32.mrb[27].mxu1  ;;  %v2066_v49 = vmul.f32 %v2054_v18, %v2054_v18 }
 0x561   :  { %v2067_v19 = vsel %vm1514_vm1, %v2066_v49, 0.0 }
 0x562   :  { %2068 = vadd.xlane.f32.xlu0 %v2067_v19 }
 0x5ef   :  { %v2069_v17 = vpop.xlane.xlu0 %2068 }
 0x5f0   :  { %v2070_v29 = vmax.f32 %v2069_v17, 1e-24 }
 0x5f2   :  { %2685 = vrsqrt.f32 %v2070_v29 }
 0x5fc   :  { %v2686_v21 = vpop.eup %2685 }
 0x5fd   :  { %v2072_v59 = vmul.f32 %v2686_v21, %v2054_v18 }
 0x5ff   :  { %v2073_v22 = vmul.f32 %v2072_v59, %v2065_v45 }
 0x601   :  { %v2074_v24 = vsel %vm1514_vm1, %v2073_v22, 0.0 }
 0x602   :  { %2075 = vadd.xlane.f32.xlu1 %v2074_v24 }
 0x68f   :  { %v2076_v27 = vpop.xlane.xlu1 %2075 }
 0x690   :  { %v2077_v60 = vmul.f32 14.285714, %v2076_v27 }
 0x692   :  { %2079 = vst.msk [vmem:[%s4215_s16] sm:$0xff] %vm2078_vm3, %v2077_v60 }
 0x693   :  { %2845 = dma.done.wait [#allocation4], 2048 }
 0x694   :  { %2846 = vsyncadd [#allocation4], 4294965248  ;;  %2668 = vmatprep.mubr.msk.bf16.mxu0 %vm2860_vm0, %v4265_v14  ;;  %2177 = vst.msk [vmem:[#allocation3] sm:$0xff] %vm1514_vm1, %v2072_v59  ;;  %v2112_v54 = vsel %vm1514_vm1, %v2100_v42, 0  ;;  %v4273_v7 = vld [vmem:[#allocation29_spill] sm:$0xff]  ;;  %v4274_v13 = vld [vmem:[#allocation30_spill] sm:$0xff]  ;;  %v2083_v3 = vpack.c.bf16 %v2065_v45, %v2065_v45 }
 0x695   :  { %2653 = vmatpush3.bf16.xpose.msra.mxu0 %v2112_v54  ;;  %v2101_v2 = vpack.c.bf16 %v4274_v13, %v4273_v7  ;;  %s4275_s0 = sld [smem:[#allocation44_spill]]  ;;  %v4276_v39 = vld [vmem:[#allocation31_spill] sm:$0xff]  ;;  %v4277_v61 = vld [vmem:[#allocation32_spill] sm:$0xff]  ;;  %v4278_v11 = vld [vmem:[#allocation33_spill] sm:$0xff] }
 0x696   :  { %2654 = vmatprep.subr.bf16.mxu0 %v4265_v14  ;;  %v2102_v23 = vpack.c.bf16 %v4277_v61, %v4276_v39  ;;  %v4279_v30 = vld [vmem:[#allocation34_spill] sm:$0xff]  ;;  %v4280_v15 = vld [vmem:[#allocation35_spill] sm:$0xff]  ;;  %v4281_v33 = vld [vmem:[#allocation36_spill] sm:$0xff] }
 0x697   :  { %v2115_v0 = vsel %vm1514_vm1, %v2101_v2, 0  ;;  %v2103_v53 = vpack.c.bf16 %v4279_v30, %v4278_v11  ;;  %v2104_v34 = vpack.c.bf16 %v4281_v33, %v4280_v15  ;;  %v4282_v35 = vld [vmem:[#allocation37_spill] sm:$0xff]  ;;  %v4283_v38 = vld [vmem:[#allocation38_spill] sm:$0xff]  ;;  %v4284_v47 = vld [vmem:[#allocation39_spill] sm:$0xff] }
 0x698   :  { %v2118_v32 = vsel %vm1514_vm1, %v2102_v23, 0  ;;  %v2105_v46 = vpack.c.bf16 %v4283_v38, %v4282_v35  ;;  %v4285_v8 = vld [vmem:[#allocation40_spill] sm:$0xff]  ;;  %v4286_v48 = vld [vmem:[#allocation41_spill] sm:$0xff]  ;;  %v4287_v6 = vld [vmem:[#allocation42_spill] sm:$0xff] }
 0x699   :  { %v2121_v12 = vsel %vm1514_vm1, %v2103_v53, 0  ;;  %v2124_v10 = vsel %vm1514_vm1, %v2104_v34, 0  ;;  %v2106_v20 = vpack.c.bf16 %v4285_v8, %v4284_v47  ;;  %v2107_v4 = vpack.c.bf16 %v4287_v6, %v4286_v48 }
 0x69a   :  { %v2127_v56 = vsel %vm1514_vm1, %v2105_v46, 0 }
 0x69b   :  { %s2179_s7 = scalar_lea.vmem %s4223_s24, %s4275_s0  ;;  %v2213_v1 = vld [vmem:[#allocation3] sm:$0xff]  ;;  %v2130_v9 = vsel %vm1514_vm1, %v2106_v20, 0  ;;  %v2133_v55 = vsel %vm1514_vm1, %v2107_v4, 0 }
 0x69c   :  { %2214 = vst [vmem:[%s2179_s7] sm:$0xff] %v2213_v1 }
 0x69d   :  { %2655 = vmatpush3.bf16.xpose.msra.mxu0 %v2115_v0 }
 0x69e   :  { %2656 = vmatprep.subr.bf16.mxu0 %v4265_v14 }
 0x6a5   :  { %2657 = vmatpush3.bf16.xpose.msra.mxu0 %v2118_v32 }
 0x6a6   :  { %2658 = vmatprep.subr.bf16.mxu0 %v4265_v14 }
 0x6ad   :  { %2659 = vmatpush3.bf16.xpose.msra.mxu0 %v2121_v12 }
 0x6ae   :  { %2660 = vmatprep.subr.bf16.mxu0 %v4265_v14 }
 0x6b5   :  { %2661 = vmatpush3.bf16.xpose.msra.mxu0 %v2124_v10 }
 0x6b6   :  { %2662 = vmatprep.subr.bf16.mxu0 %v4265_v14 }
 0x6bd   :  { %2663 = vmatpush3.bf16.xpose.msra.mxu0 %v2127_v56 }
 0x6be   :  { %2664 = vmatprep.subr.bf16.mxu0 %v4265_v14 }
 0x6c5   :  { %2665 = vmatpush3.bf16.xpose.msra.mxu0 %v2130_v9 }
 0x6c6   :  { %2666 = vmatprep.subr.bf16.mxu0 %v4265_v14 }
 0x6cd   :  { %2667 = vmatpush3.bf16.xpose.msra.mxu0 %v2133_v55 }
 0x6d4   :  { %2669 = vmatmul.mubr.msk.bf16.vlgmr.msra.gmra.mrb[20].mxu0 %vm1514_vm1, %v2083_v3 }
 0x7a7   :  { %v2169_v5 = vpop.f32.mrb[20].mxu0 }
 0x7a8   :  { %v2175_v57 = vmul.f32 14.285714, %v2169_v5  ;;  %v2670_v58 = vpop.f32.mrb[21].mxu0 }
 0x7a9   :  { %v2172_v40 = vpop.f32.mrb[22].mxu0 }
 0x7aa   :  { %2176 = vst [vmem:[%s4216_s17] sm:$0xff] %v2175_v57  ;;  %v2671_v41 = vpop.f32.mrb[23].mxu0 }
 0x7ab   :  { %2222 = vsyncadd [#allocation4 + $0x1], 128 }
 0x7ac   :  { %2847 = dma.done.wait [#allocation4 + $0x1], 128 }
 0x7ad   :  { %2848 = vsyncadd [#allocation4 + $0x1], 4294967168  ;;  %s2861_s12 = smov [#allocation12]   ;;  %s2862_s26 = smov [#allocation15]  }
 0x7ae   :  { %s2248_s30 = sshll.u32 %s2861_s12, 4  ;;  %s2270_s8 = sshll.u32 %s2862_s26, 4  ;;  %s2249_s30 = int_to_ptr.vmem [resolvable:$true] %s2248_s30  ;;  %s2271_s8 = int_to_ptr.vmem [resolvable:$true] %s2270_s8 }
 0x7af   :  { %s2731_s4 = scalar_lea.vmem %s2249_s30, 16  ;;  %s2735_s28 = scalar_lea.vmem %s2249_s30, 32 }
 0x7b0   :  { %p2732_p2 = scmp.ne.s32.totalorder %s2249_s30, %s2731_s4  ;;  %p2736_p3 = scmp.lt.s32.totalorder %s2249_s30, %s2249_s30 }
 0x7b1   :  { %p2737_p4 = scmp.lt.s32.totalorder %s2735_s28, %s2731_s4 }
 0x7b3   :  { %p2738_p5 = por %p2737_p4, %p2736_p3 }
 0x7b5   :  { %p2739_p6 = pnand %p2738_p5, %p2732_p2 }
 0x7b7   :  { %2742 = shalt.err (!%p2739_p6)
}
 0x7b8   :  { %s2743_s27 = scalar_lea.hbm %s4218_s19, 16 }
 0x7b9   :  { %p2744_p7 = scmp.ne.s32.totalorder %s4218_s19, %s2743_s27  ;;  %p2747_p8 = scmp.lt.u32.totalorder %s2743_s27, %s4218_s19 }
 0x7bb   :  { %p2749_p9 = pnand %p2747_p8, %p2744_p7 }
 0x7bd   :  { %2752 = shalt.err (!%p2749_p9)
}
 0x7be   :  { %2251 = dma.vmem_to_hbm [thread:$0]  %s2249_s30, 16, %s4218_s19, [#allocation13]  }
 0x7bf   :  { %s2753_s22 = scalar_lea.vmem %s2271_s8, 16  ;;  %s2757_s16 = scalar_lea.vmem %s2271_s8, 32 }
 0x7c0   :  { %p2754_p10 = scmp.ne.s32.totalorder %s2271_s8, %s2753_s22  ;;  %p2758_p11 = scmp.lt.s32.totalorder %s2271_s8, %s2271_s8 }
 0x7c1   :  { %p2759_p12 = scmp.lt.s32.totalorder %s2757_s16, %s2753_s22 }
 0x7c3   :  { %p2760_p13 = por %p2759_p12, %p2758_p11 }
 0x7c5   :  { %p2761_p0 = pnand %p2760_p13, %p2754_p10 }
 0x7c7   :  { %2764 = shalt.err (!%p2761_p0)
}
 0x7c8   :  { %s2765_s15 = scalar_lea.hbm %s4220_s21, 16 }
 0x7c9   :  { %p2766_p1 = scmp.ne.s32.totalorder %s4220_s21, %s2765_s15  ;;  %p2769_p2 = scmp.lt.u32.totalorder %s2765_s15, %s4220_s21 }
 0x7cb   :  { %p2771_p3 = pnand %p2769_p2, %p2766_p1 }
 0x7cd   :  { %2774 = shalt.err (!%p2771_p3)
}
 0x7ce   :  { %2273 = dma.vmem_to_hbm [thread:$0]  %s2271_s8, 16, %s4220_s21, [#allocation16]  }
 0x7cf   :  { %s2863_s30 = smov [#allocation11]   ;;  %s2864_s4 = smov [#allocation14]  }
 0x7d0   :  { %s2235_s26 = sshll.u32 %s2863_s30, 4  ;;  %s2257_s28 = sshll.u32 %s2864_s4, 4  ;;  %s2236_s26 = int_to_ptr.vmem [resolvable:$true] %s2235_s26  ;;  %s4150_s28 = int_to_ptr.vmem [resolvable:$true] %s2257_s28 }
 0x7d1   :  { %s2775_s1 = scalar_lea.vmem %s2236_s26, 16384  ;;  %p2780_p5 = scmp.lt.s32.totalorder %s2236_s26, %s2236_s26 }
 0x7d2   :  { %p2776_p4 = scmp.ne.s32.totalorder %s2236_s26, %s2775_s1  ;;  %p2781_p6 = scmp.lt.s32.totalorder %s2775_s1, %s2775_s1 }
 0x7d4   :  { %p2782_p7 = por %p2781_p6, %p2780_p5 }
 0x7d6   :  { %p2783_p8 = pnand %p2782_p7, %p2776_p4 }
 0x7d8   :  { %2786 = shalt.err (!%p2783_p8)
}
 0x7d9   :  { %s2787_s6 = scalar_lea.hbm %s4217_s18, 16384 }
 0x7da   :  { %p2788_p9 = scmp.ne.s32.totalorder %s4217_s18, %s2787_s6  ;;  %p2791_p10 = scmp.lt.u32.totalorder %s2787_s6, %s4217_s18 }
 0x7dc   :  { %p2793_p11 = pnand %p2791_p10, %p2788_p9 }
 0x7de   :  { %2796 = shalt.err (!%p2793_p11)
}
 0x7df   :  { %2241 = dma.vmem_to_hbm [thread:$0]  %s2236_s26, 16384, %s4217_s18, [#allocation8], %s2856_s3, %s2856_s3, %s2857_s25  }
 0x7e0   :  { %s2797_s14 = scalar_lea.vmem %s4150_s28, 2048  ;;  %p2802_p13 = scmp.lt.s32.totalorder %s4150_s28, %s4150_s28 }
 0x7e1   :  { %p2798_p12 = scmp.ne.s32.totalorder %s4150_s28, %s2797_s14  ;;  %p2803_p0 = scmp.lt.s32.totalorder %s2797_s14, %s2797_s14 }
 0x7e3   :  { %p2804_p1 = por %p2803_p0, %p2802_p13 }
 0x7e5   :  { %p2805_p2 = pnand %p2804_p1, %p2798_p12 }
 0x7e7   :  { %2808 = shalt.err (!%p2805_p2)
}
 0x7e8   :  { %s2809_s9 = scalar_lea.hbm %s4219_s20, 2048 }
 0x7e9   :  { %p2810_p3 = scmp.ne.s32.totalorder %s4219_s20, %s2809_s9  ;;  %p2813_p4 = scmp.lt.u32.totalorder %s2809_s9, %s4219_s20 }
 0x7eb   :  { %p2815_p5 = pnand %p2813_p4, %p2810_p3 }
 0x7ed   :  { %2818 = shalt.err (!%p2815_p5)
}
 0x7ee   :  { %2263 = dma.vmem_to_hbm [thread:$0]  %s4150_s28, 2048, %s4219_s20, [#allocation13], %s2856_s3, %s2856_s3, %s2857_s25  }
 0x7ef   :  { %s2865_s2 = smov [#allocation17]  }
 0x7f0   :  { %s2282_s19 = sshll.u32 %s2865_s2, 4  ;;  %s2283_s19 = int_to_ptr.vmem [resolvable:$true] %s2282_s19 }
 0x7f1   :  { %s2819_s12 = scalar_lea.vmem %s2283_s19, 16  ;;  %s2823_s30 = scalar_lea.vmem %s2283_s19, 32 }
 0x7f2   :  { %p2820_p6 = scmp.ne.s32.totalorder %s2283_s19, %s2819_s12  ;;  %p2824_p7 = scmp.lt.s32.totalorder %s2283_s19, %s2283_s19 }
 0x7f3   :  { %p2825_p8 = scmp.lt.s32.totalorder %s2823_s30, %s2819_s12 }
 0x7f5   :  { %p2826_p9 = por %p2825_p8, %p2824_p7 }
 0x7f7   :  { %p2827_p10 = pnand %p2826_p9, %p2820_p6 }
 0x7f9   :  { %2830 = shalt.err (!%p2827_p10)
}
 0x7fa   :  { %s2831_s1 = scalar_lea.hbm %s4222_s23, 16 }
 0x7fb   :  { %p2832_p11 = scmp.ne.s32.totalorder %s4222_s23, %s2831_s1  ;;  %p2835_p12 = scmp.lt.u32.totalorder %s2831_s1, %s4222_s23 }
 0x7fd   :  { %p2837_p13 = pnand %p2835_p12, %p2832_p11 }
 0x7ff   :  { %2840 = shalt.err (!%p2837_p13)
}
 0x800   :  { %2285 = dma.vmem_to_hbm [thread:$0]  %s2283_s19, 16, %s4222_s23, [#allocation16]  }
 0x801   :  { %2849 = dma.done.wait [#allocation8], 16384  }
 0x802   :  { %2850 = vsyncadd [#allocation8], 4294950912 }
 0x803   :  { %2851 = dma.done.wait [#allocation13], 2064  }
 0x804   :  { %2852 = vsyncadd [#allocation13], 4294965232 }
 0x805   :  { %2853 = dma.done.wait [#allocation16], 32  }
 0x806   :  { %2854 = vsyncadd [#allocation16], 4294967264 }
 0x807   :  { %2307 = vsyncpa [#allocation7], 1 }
 0x808   :  { %2308 = vsyncpa [#allocation10], 1 }
 0x809   :  { %2309 = vsyncpa [#allocation8], 1 }
 0x80a   :  { %2310 = vsyncpa [#allocation13], 1 }
 0x80b   :  { %2311 = vsyncpa [#allocation16], 1 }
 0x80c   :  { %2312 = vsyncmov [#allocation4] }
 0x80f   :  { %s2313_s6 = vpop.sfrf %2312 }
 0x810   :  { %p2349_p0 = scmp.ne.s32.totalorder %s2313_s6, 0 }
 0x812   :  { %2317 = shalt.err (%p2349_p0)  }
 0x813   :  { %2319 = vsyncmov [#allocation4 + $0x1] }
 0x816   :  { %s2320_s29 = vpop.sfrf %2319 }
 0x817   :  { %p2350_p1 = scmp.ne.s32.totalorder %s2320_s29, 0 }
 0x819   :  { %2324 = shalt.err (%p2350_p1)  }

</bundles_post_ra>
